<compile_context>
chip_gen: v5e
topology: v5e:2x2
jax: 0.10.0
libtpu: 0.0.40
codegen_flags: <defaults>
</compile_context>

<pallas_src>
import math
from functools import partial

import jax
import jax.numpy as jnp
from jax.experimental import pallas as pl
from jax.experimental.pallas import tpu as pltpu

NEG_SLOPE = 0.01     # F.leaky_relu default negative_slope
BN_EPS = 1e-5        # nn.BatchNorm1d default eps
NUM_HEADS = 4        # CrossLayer MultiheadAttention num_heads
HIGH = jax.lax.Precision.HIGHEST

_VMEM = pl.BlockSpec(memory_space=pltpu.MemorySpace.VMEM)

# GCN relation-stack order is (poi, s, d, n): the order rel_emb / edge_index
# are unpacked inside RelationGCN.forward.
# HRE.forward's tuple-unpack shuffle + CrossLayer's internal stack order give:
#   cross-attn seq position (0..3) <- GCN stack index:
_CROSS_FROM_GCN = (2, 3, 1, 0)
#   final output multiplies (n_f, poi_f, s_f, d_f) use relation vectors at
#   GCN stack indices:
_RF_FROM_GCN = (2, 3, 0, 1)


def _leaky(x):
    return jnp.maximum(x, NEG_SLOPE * x)


# --------------------------------------------------------------------------
# The single fused Pallas kernel
# --------------------------------------------------------------------------
def hre_fused_kernel(
    adj_ref,        # [4N, 4N]  block-diagonal normalized adjacency (poi,s,d,n)
    x0_ref,         # [4N, E]   features tiled 4x (one block per relation)
    r0_ref,         # [4, E]    initial relation embeddings (poi,s,d,n)
    sel_ref,        # [4N, 4]   row -> relation one-hot selector
    gcn_W_ref,      # [L, E, E]
    gcn_b_ref,      # [L, 1, E]
    bn_g_ref,       # [max(L-1,1), 1, E]
    bn_b_ref,       # [max(L-1,1), 1, E]
    rel_Wt_ref,     # [L, E, E]  (transposed: r @ rel_Wt + rel_b)
    rel_b_ref,      # [L, 1, E]
    wq_ref, wk_ref, wv_ref, wo_ref,    # [4E, 4E] block-diagonal projections
    bq_ref, bk_ref, bv_ref, bo_ref,    # [1, 4E]  lane-tiled biases
    hmask_ref,      # [E, H]   one-hot lane -> head
    hmaskT_ref,     # [H, E]
    alpha_ref,      # [1, 4E]  (alpha_n, alpha_poi, alpha_d, alpha_s) per block
    wf_ref,         # [4E, 4E] block-diagonal fusion linear
    bf_ref,         # [1, 4E]
    q_ref,          # [1, 4E]
    expand_ref,     # [4, 4E]  one-hot position -> lane-block expand
    pos_sum_ref,    # [4E, 4]  lane-block -> position sum
    collapse_ref,   # [4E, E]  sum lane blocks back to [*, E]
    region_ref,     # out [N, E]
    rf_ref,         # out [N, 4E]  (n_f | poi_f | s_f | d_f)
):
    N, E = region_ref.shape
    S = 4
    H = NUM_HEADS
    D = E // H
    L = gcn_W_ref.shape[0]
    scale = 1.0 / math.sqrt(float(D))
    bn_scale = 1.0 / math.sqrt(1.0 + BN_EPS)

    adj = adj_ref[...]
    sel = sel_ref[...]
    x = x0_ref[...]              # [4N, E]
    r = r0_ref[...]              # [4, E]

    # -------- RelationGCN (is_training=False, shared GraphConv/BN weights) --------
    for i in range(L - 1):
        r_exp = jnp.dot(sel, r, preferred_element_type=jnp.float32)          # [4N, E]
        h = jnp.dot(adj, x * r_exp, preferred_element_type=jnp.float32)
        h = jnp.dot(h, gcn_W_ref[i], preferred_element_type=jnp.float32) + gcn_b_ref[i]
        # BatchNorm1d eval mode (running_mean=0, running_var=1)
        h = h * bn_scale * bn_g_ref[i] + bn_b_ref[i]
        x = x + _leaky(h)
        r = jnp.dot(r, rel_Wt_ref[i], preferred_element_type=jnp.float32) + rel_b_ref[i]

    # final GraphConv (no BN / residual), then last relation transformation
    r_exp = jnp.dot(sel, r, preferred_element_type=jnp.float32)
    h = jnp.dot(adj, x * r_exp, preferred_element_type=jnp.float32)
    x = jnp.dot(h, gcn_W_ref[L - 1], preferred_element_type=jnp.float32) + gcn_b_ref[L - 1]
    r = jnp.dot(r, rel_Wt_ref[L - 1], preferred_element_type=jnp.float32) + rel_b_ref[L - 1]

    # ---- HRE unpack shuffle + CrossLayer stacking, lane-packed to [N, 4E] ----
    x_cross = jnp.concatenate([x[g * N:(g + 1) * N, :] for g in _CROSS_FROM_GCN],
                              axis=1)                                          # [N, 4E]

    # ---------------- CrossLayer: 4-head self-attention (seq = 4) ----------------
    Qp = jnp.dot(x_cross, wq_ref[...], preferred_element_type=jnp.float32) + bq_ref[...]
    Kp = jnp.dot(x_cross, wk_ref[...], preferred_element_type=jnp.float32) + bk_ref[...]
    Vp = jnp.dot(x_cross, wv_ref[...], preferred_element_type=jnp.float32) + bv_ref[...]

    hmask = hmask_ref[...]       # [E, H]
    hmaskT = hmaskT_ref[...]     # [H, E]

    o_parts = []
    for s in range(S):
        qs = Qp[:, s * E:(s + 1) * E]
        # all-head scores via MXU dot against one-hot head mask
        scores = []
        for t in range(S):
            p = qs * Kp[:, t * E:(t + 1) * E]                                  # [N, E]
            scores.append(jnp.dot(p, hmask,
                                  preferred_element_type=jnp.float32) * scale)  # [N, H]
        m = scores[0]
        for t in range(1, S):
            m = jnp.maximum(m, scores[t])
        es = [jnp.exp(sc - m) for sc in scores]
        denom = es[0]
        for t in range(1, S):
            denom = denom + es[t]
        inv = pl.reciprocal(denom, approx=True)                                # [N, H]
        o = None
        for t in range(S):
            w_exp = jnp.dot(es[t] * inv, hmaskT,
                            preferred_element_type=jnp.float32)                # [N, E]
            part = w_exp * Vp[:, t * E:(t + 1) * E]
            o = part if o is None else o + part
        o_parts.append(o)
    o_pack = jnp.concatenate(o_parts, axis=1)                                  # [N, 4E]

    f_pack = jnp.dot(o_pack, wo_ref[...], preferred_element_type=jnp.float32) + bo_ref[...]
    alpha = alpha_ref[...]
    fused = f_pack * alpha + (1.0 - alpha) * x_cross                           # [N, 4E]

    # ------------------------- AttentionFusionLayer -------------------------
    hq = _leaky(jnp.dot(fused, wf_ref[...], preferred_element_type=jnp.float32)
                + bf_ref[...]) * q_ref[...]                                    # [N, 4E]
    per_pos = jnp.dot(hq, pos_sum_ref[...],
                      preferred_element_type=jnp.float32)                      # [N, 4]
    raw = jnp.sum(per_pos, axis=0, keepdims=True) * (1.0 / float(N))           # [1, 4]
    raw = jnp.broadcast_to(raw, (N, S))                                        # [N, 4]
    m4 = jnp.max(raw, axis=1, keepdims=True)
    e4 = jnp.exp(raw - m4)
    w4 = e4 * pl.reciprocal(jnp.sum(e4, axis=1, keepdims=True), approx=True)   # [N, 4]
    w_pack = jnp.dot(w4, expand_ref[...], preferred_element_type=jnp.float32)  # [N, 4E]
    region = jnp.dot(fused * w_pack, collapse_ref[...],
                     preferred_element_type=jnp.float32)                       # [N, E]
    region_ref[...] = region

    # ---------------- final region * relation multiplies ----------------
    rf_ref[...] = jnp.concatenate(
        [region * r[g:g + 1, :] for g in _RF_FROM_GCN], axis=1)


# --------------------------------------------------------------------------
# Wrapper: build packed / block-diagonal operands and run the single kernel
# --------------------------------------------------------------------------
def _block_diag4(w):
    return jax.scipy.linalg.block_diag(w, w, w, w)


def _tile_lane(v):
    return jnp.tile(v.reshape(1, -1), (1, 4))


@partial(jax.jit, static_argnames=("gcn_layers",))
def hre_forward_pallas(params, features, rel_emb, edge_index, gcn_layers=2):
    N, E = features.shape
    S, H = 4, NUM_HEADS
    L = gcn_layers

    # ---- GCN-stage operands, relation order (poi, s, d, n) ----
    adj_bd = jax.scipy.linalg.block_diag(*edge_index)               # [4N, 4N]
    x0 = jnp.tile(features, (S, 1))                                 # [4N, E]
    r0 = jnp.stack(rel_emb)                                         # [4, E]
    sel = jnp.repeat(jnp.eye(S, dtype=jnp.float32), N, axis=0)      # [4N, 4]

    gcn_W = jnp.stack(params['gcn_W'])                              # [L, E, E]
    gcn_b = jnp.stack(params['gcn_b']).reshape(L, 1, E)
    if L > 1:
        bn_g = jnp.stack(params['bn_gamma']).reshape(L - 1, 1, E)
        bn_b = jnp.stack(params['bn_beta']).reshape(L - 1, 1, E)
    else:                                                           # unused dummies
        bn_g = jnp.ones((1, 1, E), jnp.float32)
        bn_b = jnp.zeros((1, 1, E), jnp.float32)
    rel_Wt = jnp.stack([w.T for w in params['rel_W']])              # [L, E, E]
    rel_b = jnp.stack(params['rel_b']).reshape(L, 1, E)

    # ---- Cross-attention operands (lane-packed over the 4 seq positions) ----
    wq_bd = _block_diag4(params['in_proj_w'][:E].T)
    wk_bd = _block_diag4(params['in_proj_w'][E:2 * E].T)
    wv_bd = _block_diag4(params['in_proj_w'][2 * E:].T)
    wo_bd = _block_diag4(params['out_proj_w'].T)
    bq = _tile_lane(params['in_proj_b'][:E])
    bk = _tile_lane(params['in_proj_b'][E:2 * E])
    bv = _tile_lane(params['in_proj_b'][2 * E:])
    bo = _tile_lane(params['out_proj_b'])

    D = E // H
    hmask = (jnp.arange(E)[:, None] // D
             == jnp.arange(H)[None, :]).astype(jnp.float32)          # [E, H]
    hmaskT = hmask.T                                                 # [H, E]
    # CrossLayer stack order (n, poi, d, s), each alpha repeated over its E lanes
    alpha_lane = jnp.repeat(params['alpha'], E).reshape(1, S * E)

    # ---- Fusion operands ----
    wf_bd = _block_diag4(params['fusion_W'].T)
    bf = _tile_lane(params['fusion_b'])
    q_lane = _tile_lane(params['q'])

    lane = jnp.arange(S * E)
    expand = (jnp.arange(S)[:, None] == (lane // E)[None, :]).astype(jnp.float32)  # [4, 4E]
    pos_sum = expand.T                                                              # [4E, 4]
    collapse = ((lane % E)[:, None]
                == jnp.arange(E)[None, :]).astype(jnp.float32)                      # [4E, E]

    region, rf = pl.pallas_call(
        hre_fused_kernel,
        out_shape=(jax.ShapeDtypeStruct((N, E), jnp.float32),
                   jax.ShapeDtypeStruct((N, S * E), jnp.float32)),
        in_specs=[_VMEM] * 27,
        out_specs=(_VMEM, _VMEM),
    )(adj_bd, x0, r0, sel,
      gcn_W, gcn_b, bn_g, bn_b, rel_Wt, rel_b,
      wq_bd, wk_bd, wv_bd, wo_bd,
      bq, bk, bv, bo,
      hmask, hmaskT, alpha_lane,
      wf_bd, bf, q_lane,
      expand, pos_sum, collapse)

    n_f = rf[:, 0 * E:1 * E]
    poi_f = rf[:, 1 * E:2 * E]
    s_f = rf[:, 2 * E:3 * E]
    d_f = rf[:, 3 * E:4 * E]
    return region, n_f, poi_f, s_f, d_f


# --------------------------------------------------------------------------
# Pure-JAX reference (high precision) for validation
# --------------------------------------------------------------------------
def gcn_residual_ref(adj, x, r, W, b, gamma, beta):
    h = jnp.dot(adj, x * r[None, :], precision=HIGH)
    h = jnp.dot(h, W, precision=HIGH) + b[None, :]
    h = h * (1.0 / jnp.sqrt(1.0 + BN_EPS)) * gamma[None, :] + beta[None, :]
    return x + _leaky(h)


def gcn_conv_ref(adj, x, r, W, b):
    h = jnp.dot(adj, x * r[None, :], precision=HIGH)
    return jnp.dot(h, W, precision=HIGH) + b[None, :]


def cross_attn_ref(X, wq, wk, wv, bq, bk, bv, wo, bo, alphas):
    S, N, E = X.shape
    H, D = NUM_HEADS, E // NUM_HEADS
    Q = jnp.einsum('sne,ef->snf', X, wq, precision=HIGH) + bq[None, None, :]
    K = jnp.einsum('sne,ef->snf', X, wk, precision=HIGH) + bk[None, None, :]
    V = jnp.einsum('sne,ef->snf', X, wv, precision=HIGH) + bv[None, None, :]
    Qh, Kh, Vh = (t.reshape(S, N, H, D) for t in (Q, K, V))
    sc = jnp.einsum('snhd,tnhd->nhst', Qh, Kh, precision=HIGH) / math.sqrt(D)
    A = jax.nn.softmax(sc, axis=-1)
    O = jnp.einsum('nhst,tnhd->snhd', A, Vh, precision=HIGH).reshape(S, N, E)
    F_ = jnp.einsum('sne,ef->snf', O, wo, precision=HIGH) + bo[None, None, :]
    a = alphas.reshape(S, 1, 1)
    return F_ * a + (1.0 - a) * X


def fusion_ref(f_stk, wf_t, bf, q, r_stk):
    h = jnp.einsum('sne,ef->snf', f_stk, wf_t, precision=HIGH) + bf[None, None, :]
    h = _leaky(h)
    raw = jnp.mean(jnp.sum(h * q[None, None, :], axis=2), axis=1)
    w = jax.nn.softmax(raw)
    region = jnp.einsum('s,sne->ne', w, f_stk, precision=HIGH)
    rf = region[None, :, :] * r_stk[:, None, :]
    return region, rf


@partial(jax.jit, static_argnames=("gcn_layers",))
def hre_forward_ref(params, features, rel_emb, edge_index, gcn_layers=2):
    E = features.shape[1]
    n_emb = poi_emb = s_emb = d_emb = features
    poi_r, s_r, d_r, n_r = rel_emb
    poi_adj, s_adj, d_adj, n_adj = edge_index

    for i in range(gcn_layers - 1):
        W, b = params['gcn_W'][i], params['gcn_b'][i]
        g, be = params['bn_gamma'][i], params['bn_beta'][i]
        Rt, rb = params['rel_W'][i], params['rel_b'][i]
        n_emb = gcn_residual_ref(n_adj, n_emb, n_r, W, b, g, be)
        n_r = n_r @ Rt.T + rb
        poi_emb = gcn_residual_ref(poi_adj, poi_emb, poi_r, W, b, g, be)
        poi_r = poi_r @ Rt.T + rb
        s_emb = gcn_residual_ref(s_adj, s_emb, s_r, W, b, g, be)
        s_r = s_r @ Rt.T + rb
        d_emb = gcn_residual_ref(d_adj, d_emb, d_r, W, b, g, be)
        d_r = d_r @ Rt.T + rb

    W, b = params['gcn_W'][-1], params['gcn_b'][-1]
    Rt, rb = params['rel_W'][-1], params['rel_b'][-1]
    n_emb = gcn_conv_ref(n_adj, n_emb, n_r, W, b)
    poi_emb = gcn_conv_ref(poi_adj, poi_emb, poi_r, W, b)
    s_emb = gcn_conv_ref(s_adj, s_emb, s_r, W, b)
    d_emb = gcn_conv_ref(d_adj, d_emb, d_r, W, b)
    n_r = n_r @ Rt.T + rb
    poi_r = poi_r @ Rt.T + rb
    s_r = s_r @ Rt.T + rb
    d_r = d_r @ Rt.T + rb

    # HRE.forward's tuple-unpack name shuffle (as written)
    gcn_out = (n_emb, poi_emb, s_emb, d_emb, n_r, poi_r, s_r, d_r)
    poi_emb, s_emb, d_emb, n_emb, poi_r, s_r, d_r, n_r = gcn_out

    stk = jnp.stack((n_emb, poi_emb, d_emb, s_emb))
    wq = params['in_proj_w'][:E].T
    wk = params['in_proj_w'][E:2 * E].T
    wv = params['in_proj_w'][2 * E:].T
    bq = params['in_proj_b'][:E]
    bk = params['in_proj_b'][E:2 * E]
    bv = params['in_proj_b'][2 * E:]
    wo = params['out_proj_w'].T
    bo = params['out_proj_b']
    fused = cross_attn_ref(stk, wq, wk, wv, bq, bk, bv, wo, bo, params['alpha'])
    n_f, poi_f, d_f, s_f = fused[0], fused[1], fused[2], fused[3]

    f_stk = jnp.stack((n_f, poi_f, s_f, d_f))
    r_stk = jnp.stack((n_r, poi_r, s_r, d_r))
    region, rf = fusion_ref(f_stk, params['fusion_W'].T, params['fusion_b'],
                            params['q'], r_stk)
    return region, rf[0], rf[1], rf[2], rf[3]


# --------------------------------------------------------------------------
# Driver
# --------------------------------------------------------------------------
if __name__ == "__main__":
    N, E = 16, 32          # nodes, embedding_size (E % 4 == 0 for 4 heads)
    GCN_LAYERS = 2

    key = jax.random.PRNGKey(0)
    keys = jax.random.split(key, 32)

    features = jax.random.normal(keys[0], (N, E), jnp.float32)
    # rel_emb order as unpacked in RelationGCN: (poi_r, s_r, d_r, n_r)
    rel_emb = tuple(jax.random.normal(keys[1 + i], (E,), jnp.float32)
                    for i in range(4))

    def make_adj(k):
        a = (jax.random.uniform(k, (N, N)) < 0.3).astype(jnp.float32)
        a = jnp.maximum(a, a.T) + jnp.eye(N, dtype=jnp.float32)
        dinv = 1.0 / jnp.sqrt(jnp.sum(a, axis=1))
        return a * dinv[:, None] * dinv[None, :]

    # edge_index order as unpacked: (poi, s, d, n) graphs
    edge_index = tuple(make_adj(keys[5 + i]) for i in range(4))

    def w(k, shape, scale=0.1):
        return scale * jax.random.normal(k, shape, jnp.float32)

    params = {
        'gcn_W': [w(keys[9], (E, E)), w(keys[10], (E, E))],
        'gcn_b': [w(keys[11], (E,), 0.01), w(keys[12], (E,), 0.01)],
        'bn_gamma': [jnp.ones((E,), jnp.float32)],
        'bn_beta': [jnp.zeros((E,), jnp.float32)],
        'rel_W': [w(keys[13], (E, E)), w(keys[14], (E, E))],
        'rel_b': [w(keys[15], (E,), 0.01), w(keys[16], (E,), 0.01)],
        'alpha': jnp.full((4,), 0.95, jnp.float32),   # (n, poi, d, s)
        'in_proj_w': w(keys[17], (3 * E, E)),
        'in_proj_b': w(keys[18], (3 * E,), 0.01),
        'out_proj_w': w(keys[19], (E, E)),
        'out_proj_b': w(keys[20], (E,), 0.01),
        'q': jax.random.normal(keys[21], (E,), jnp.float32),
        'fusion_W': w(keys[22], (E, E)),
        'fusion_b': w(keys[23], (E,), 0.01),
    }

    outs = hre_forward_pallas(params, features, rel_emb, edge_index,
                              gcn_layers=GCN_LAYERS)
    outs = jax.block_until_ready(outs)

    refs = hre_forward_ref(params, features, rel_emb, edge_index,
                           gcn_layers=GCN_LAYERS)
    refs = jax.block_until_ready(refs)

    for a, b in zip(outs, refs):
        assert a.shape == b.shape
        assert bool(jnp.all(jnp.isfinite(a)))
        err = float(jnp.max(jnp.abs(a - b)))
        assert bool(jnp.allclose(a, b, rtol=2e-2, atol=2e-2)), err

    print("KERNEL_OK")
</pallas_src>

<mosaic_0001>
module attributes {stable_mosaic.version = 11 : i64} {
  func.func @hre_fused_kernel(%arg0: memref<64x64xf32, #tpu.memory_space<vmem>>, %arg1: memref<64x32xf32, #tpu.memory_space<vmem>>, %arg2: memref<4x32xf32, #tpu.memory_space<vmem>>, %arg3: memref<64x4xf32, #tpu.memory_space<vmem>>, %arg4: memref<2x32x32xf32, #tpu.memory_space<vmem>>, %arg5: memref<2x1x32xf32, #tpu.memory_space<vmem>>, %arg6: memref<1x1x32xf32, #tpu.memory_space<vmem>>, %arg7: memref<1x1x32xf32, #tpu.memory_space<vmem>>, %arg8: memref<2x32x32xf32, #tpu.memory_space<vmem>>, %arg9: memref<2x1x32xf32, #tpu.memory_space<vmem>>, %arg10: memref<128x128xf32, #tpu.memory_space<vmem>>, %arg11: memref<128x128xf32, #tpu.memory_space<vmem>>, %arg12: memref<128x128xf32, #tpu.memory_space<vmem>>, %arg13: memref<128x128xf32, #tpu.memory_space<vmem>>, %arg14: memref<1x128xf32, #tpu.memory_space<vmem>>, %arg15: memref<1x128xf32, #tpu.memory_space<vmem>>, %arg16: memref<1x128xf32, #tpu.memory_space<vmem>>, %arg17: memref<1x128xf32, #tpu.memory_space<vmem>>, %arg18: memref<32x4xf32, #tpu.memory_space<vmem>>, %arg19: memref<4x32xf32, #tpu.memory_space<vmem>>, %arg20: memref<1x128xf32, #tpu.memory_space<vmem>>, %arg21: memref<128x128xf32, #tpu.memory_space<vmem>>, %arg22: memref<1x128xf32, #tpu.memory_space<vmem>>, %arg23: memref<1x128xf32, #tpu.memory_space<vmem>>, %arg24: memref<4x128xf32, #tpu.memory_space<vmem>>, %arg25: memref<128x4xf32, #tpu.memory_space<vmem>>, %arg26: memref<128x32xf32, #tpu.memory_space<vmem>>, %arg27: memref<16x32xf32, #tpu.memory_space<vmem>>, %arg28: memref<16x128xf32, #tpu.memory_space<vmem>>) attributes {dimension_semantics = [], scalar_prefetch = 0 : i64, scratch_operands = 0 : i64, tpu.core_type = #tpu.core_type<tc>} {
    %c0 = arith.constant 0 : index
    %c0_0 = arith.constant 0 : index
    %0 = vector.load %arg0[%c0, %c0_0] : memref<64x64xf32, #tpu.memory_space<vmem>>, vector<64x64xf32>
    %c0_1 = arith.constant 0 : index
    %c0_2 = arith.constant 0 : index
    %1 = vector.load %arg3[%c0_1, %c0_2] : memref<64x4xf32, #tpu.memory_space<vmem>>, vector<64x4xf32>
    %c0_3 = arith.constant 0 : index
    %c0_4 = arith.constant 0 : index
    %2 = vector.load %arg1[%c0_3, %c0_4] : memref<64x32xf32, #tpu.memory_space<vmem>>, vector<64x32xf32>
    %c0_5 = arith.constant 0 : index
    %c0_6 = arith.constant 0 : index
    %3 = vector.load %arg2[%c0_5, %c0_6] : memref<4x32xf32, #tpu.memory_space<vmem>>, vector<4x32xf32>
    %cst = arith.constant dense<0.000000e+00> : vector<64x32xf32>
    %4 = tpu.matmul %1, %3, %cst {dimension_numbers = #tpu.dot_dimension_numbers<[1], [0], [0], [1], [0, 0, 1, 1], [], []>} : vector<64x4xf32>, vector<4x32xf32>, vector<64x32xf32> -> vector<64x32xf32>
    %5 = arith.mulf %2, %4 : vector<64x32xf32>
    %cst_7 = arith.constant dense<0.000000e+00> : vector<64x32xf32>
    %6 = tpu.matmul %0, %5, %cst_7 {dimension_numbers = #tpu.dot_dimension_numbers<[1], [0], [0], [1], [0, 0, 1, 1], [], []>} : vector<64x64xf32>, vector<64x32xf32>, vector<64x32xf32> -> vector<64x32xf32>
    %c0_8 = arith.constant 0 : index
    %c0_9 = arith.constant 0 : index
    %c0_10 = arith.constant 0 : index
    %7 = vector.load %arg4[%c0_8, %c0_9, %c0_10] : memref<2x32x32xf32, #tpu.memory_space<vmem>>, vector<1x32x32xf32>
    %8 = vector.shape_cast %7 : vector<1x32x32xf32> to vector<32x32xf32>
    %cst_11 = arith.constant dense<0.000000e+00> : vector<64x32xf32>
    %9 = tpu.matmul %6, %8, %cst_11 {dimension_numbers = #tpu.dot_dimension_numbers<[1], [0], [0], [1], [0, 0, 1, 1], [], []>} : vector<64x32xf32>, vector<32x32xf32>, vector<64x32xf32> -> vector<64x32xf32>
    %c0_12 = arith.constant 0 : index
    %c0_13 = arith.constant 0 : index
    %c0_14 = arith.constant 0 : index
    %10 = vector.load %arg5[%c0_12, %c0_13, %c0_14] : memref<2x1x32xf32, #tpu.memory_space<vmem>>, vector<1x1x32xf32>
    %11 = vector.shape_cast %10 : vector<1x1x32xf32> to vector<1x32xf32>
    %12 = vector.broadcast %11 : vector<1x32xf32> to vector<64x32xf32>
    %13 = arith.addf %9, %12 : vector<64x32xf32>
    %cst_15 = arith.constant 0.999994993 : f32
    %14 = vector.broadcast %cst_15 : f32 to vector<64x32xf32>
    %15 = arith.mulf %13, %14 : vector<64x32xf32>
    %c0_16 = arith.constant 0 : index
    %c0_17 = arith.constant 0 : index
    %c0_18 = arith.constant 0 : index
    %16 = vector.load %arg6[%c0_16, %c0_17, %c0_18] : memref<1x1x32xf32, #tpu.memory_space<vmem>>, vector<1x1x32xf32>
    %17 = vector.shape_cast %16 : vector<1x1x32xf32> to vector<1x32xf32>
    %18 = vector.broadcast %17 : vector<1x32xf32> to vector<64x32xf32>
    %19 = arith.mulf %15, %18 : vector<64x32xf32>
    %c0_19 = arith.constant 0 : index
    %c0_20 = arith.constant 0 : index
    %c0_21 = arith.constant 0 : index
    %20 = vector.load %arg7[%c0_19, %c0_20, %c0_21] : memref<1x1x32xf32, #tpu.memory_space<vmem>>, vector<1x1x32xf32>
    %21 = vector.shape_cast %20 : vector<1x1x32xf32> to vector<1x32xf32>
    %22 = vector.broadcast %21 : vector<1x32xf32> to vector<64x32xf32>
    %23 = arith.addf %19, %22 : vector<64x32xf32>
    %cst_22 = arith.constant 0.00999999977 : f32
    %24 = vector.broadcast %cst_22 : f32 to vector<64x32xf32>
    %25 = arith.mulf %24, %23 : vector<64x32xf32>
    %26 = arith.maximumf %23, %25 : vector<64x32xf32>
    %27 = arith.addf %2, %26 : vector<64x32xf32>
    %c0_23 = arith.constant 0 : index
    %c0_24 = arith.constant 0 : index
    %c0_25 = arith.constant 0 : index
    %28 = vector.load %arg8[%c0_23, %c0_24, %c0_25] : memref<2x32x32xf32, #tpu.memory_space<vmem>>, vector<1x32x32xf32>
    %29 = vector.shape_cast %28 : vector<1x32x32xf32> to vector<32x32xf32>
    %cst_26 = arith.constant dense<0.000000e+00> : vector<4x32xf32>
    %30 = tpu.matmul %3, %29, %cst_26 {dimension_numbers = #tpu.dot_dimension_numbers<[1], [0], [0], [1], [0, 0, 1, 1], [], []>} : vector<4x32xf32>, vector<32x32xf32>, vector<4x32xf32> -> vector<4x32xf32>
    %c0_27 = arith.constant 0 : index
    %c0_28 = arith.constant 0 : index
    %c0_29 = arith.constant 0 : index
    %31 = vector.load %arg9[%c0_27, %c0_28, %c0_29] : memref<2x1x32xf32, #tpu.memory_space<vmem>>, vector<1x1x32xf32>
    %32 = vector.shape_cast %31 : vector<1x1x32xf32> to vector<1x32xf32>
    %33 = vector.broadcast %32 : vector<1x32xf32> to vector<4x32xf32>
    %34 = arith.addf %30, %33 : vector<4x32xf32>
    %cst_30 = arith.constant dense<0.000000e+00> : vector<64x32xf32>
    %35 = tpu.matmul %1, %34, %cst_30 {dimension_numbers = #tpu.dot_dimension_numbers<[1], [0], [0], [1], [0, 0, 1, 1], [], []>} : vector<64x4xf32>, vector<4x32xf32>, vector<64x32xf32> -> vector<64x32xf32>
    %36 = arith.mulf %27, %35 : vector<64x32xf32>
    %cst_31 = arith.constant dense<0.000000e+00> : vector<64x32xf32>
    %37 = tpu.matmul %0, %36, %cst_31 {dimension_numbers = #tpu.dot_dimension_numbers<[1], [0], [0], [1], [0, 0, 1, 1], [], []>} : vector<64x64xf32>, vector<64x32xf32>, vector<64x32xf32> -> vector<64x32xf32>
    %c1 = arith.constant 1 : index
    %c0_32 = arith.constant 0 : index
    %c0_33 = arith.constant 0 : index
    %38 = vector.load %arg4[%c1, %c0_32, %c0_33] : memref<2x32x32xf32, #tpu.memory_space<vmem>>, vector<1x32x32xf32>
    %39 = vector.shape_cast %38 : vector<1x32x32xf32> to vector<32x32xf32>
    %cst_34 = arith.constant dense<0.000000e+00> : vector<64x32xf32>
    %40 = tpu.matmul %37, %39, %cst_34 {dimension_numbers = #tpu.dot_dimension_numbers<[1], [0], [0], [1], [0, 0, 1, 1], [], []>} : vector<64x32xf32>, vector<32x32xf32>, vector<64x32xf32> -> vector<64x32xf32>
    %c1_35 = arith.constant 1 : index
    %c0_36 = arith.constant 0 : index
    %c0_37 = arith.constant 0 : index
    %41 = vector.load %arg5[%c1_35, %c0_36, %c0_37] : memref<2x1x32xf32, #tpu.memory_space<vmem>>, vector<1x1x32xf32>
    %42 = vector.shape_cast %41 : vector<1x1x32xf32> to vector<1x32xf32>
    %43 = vector.broadcast %42 : vector<1x32xf32> to vector<64x32xf32>
    %44 = arith.addf %40, %43 : vector<64x32xf32>
    %c1_38 = arith.constant 1 : index
    %c0_39 = arith.constant 0 : index
    %c0_40 = arith.constant 0 : index
    %45 = vector.load %arg8[%c1_38, %c0_39, %c0_40] : memref<2x32x32xf32, #tpu.memory_space<vmem>>, vector<1x32x32xf32>
    %46 = vector.shape_cast %45 : vector<1x32x32xf32> to vector<32x32xf32>
    %cst_41 = arith.constant dense<0.000000e+00> : vector<4x32xf32>
    %47 = tpu.matmul %34, %46, %cst_41 {dimension_numbers = #tpu.dot_dimension_numbers<[1], [0], [0], [1], [0, 0, 1, 1], [], []>} : vector<4x32xf32>, vector<32x32xf32>, vector<4x32xf32> -> vector<4x32xf32>
    %c1_42 = arith.constant 1 : index
    %c0_43 = arith.constant 0 : index
    %c0_44 = arith.constant 0 : index
    %48 = vector.load %arg9[%c1_42, %c0_43, %c0_44] : memref<2x1x32xf32, #tpu.memory_space<vmem>>, vector<1x1x32xf32>
    %49 = vector.shape_cast %48 : vector<1x1x32xf32> to vector<1x32xf32>
    %50 = vector.broadcast %49 : vector<1x32xf32> to vector<4x32xf32>
    %51 = arith.addf %47, %50 : vector<4x32xf32>
    %52 = vector.extract_strided_slice %44 {offsets = [32, 0], sizes = [16, 32], strides = [1, 1]} : vector<64x32xf32> to vector<16x32xf32>
    %53 = vector.extract_strided_slice %44 {offsets = [48, 0], sizes = [16, 32], strides = [1, 1]} : vector<64x32xf32> to vector<16x32xf32>
    %54 = vector.extract_strided_slice %44 {offsets = [16, 0], sizes = [16, 32], strides = [1, 1]} : vector<64x32xf32> to vector<16x32xf32>
    %55 = vector.extract_strided_slice %44 {offsets = [0, 0], sizes = [16, 32], strides = [1, 1]} : vector<64x32xf32> to vector<16x32xf32>
    %56 = tpu.concatenate %52, %53, %54, %55 in 1 : vector<16x32xf32>, vector<16x32xf32>, vector<16x32xf32>, vector<16x32xf32> -> vector<16x128xf32>
    %c0_45 = arith.constant 0 : index
    %c0_46 = arith.constant 0 : index
    %57 = vector.load %arg10[%c0_45, %c0_46] : memref<128x128xf32, #tpu.memory_space<vmem>>, vector<128x128xf32>
    %cst_47 = arith.constant dense<0.000000e+00> : vector<16x128xf32>
    %58 = tpu.matmul %56, %57, %cst_47 {dimension_numbers = #tpu.dot_dimension_numbers<[1], [0], [0], [1], [0, 0, 1, 1], [], []>} : vector<16x128xf32>, vector<128x128xf32>, vector<16x128xf32> -> vector<16x128xf32>
    %c0_48 = arith.constant 0 : index
    %c0_49 = arith.constant 0 : index
    %59 = vector.load %arg14[%c0_48, %c0_49] : memref<1x128xf32, #tpu.memory_space<vmem>>, vector<1x128xf32>
    %60 = vector.broadcast %59 : vector<1x128xf32> to vector<16x128xf32>
    %61 = arith.addf %58, %60 : vector<16x128xf32>
    %c0_50 = arith.constant 0 : index
    %c0_51 = arith.constant 0 : index
    %62 = vector.load %arg11[%c0_50, %c0_51] : memref<128x128xf32, #tpu.memory_space<vmem>>, vector<128x128xf32>
    %cst_52 = arith.constant dense<0.000000e+00> : vector<16x128xf32>
    %63 = tpu.matmul %56, %62, %cst_52 {dimension_numbers = #tpu.dot_dimension_numbers<[1], [0], [0], [1], [0, 0, 1, 1], [], []>} : vector<16x128xf32>, vector<128x128xf32>, vector<16x128xf32> -> vector<16x128xf32>
    %c0_53 = arith.constant 0 : index
    %c0_54 = arith.constant 0 : index
    %64 = vector.load %arg15[%c0_53, %c0_54] : memref<1x128xf32, #tpu.memory_space<vmem>>, vector<1x128xf32>
    %65 = vector.broadcast %64 : vector<1x128xf32> to vector<16x128xf32>
    %66 = arith.addf %63, %65 : vector<16x128xf32>
    %c0_55 = arith.constant 0 : index
    %c0_56 = arith.constant 0 : index
    %67 = vector.load %arg12[%c0_55, %c0_56] : memref<128x128xf32, #tpu.memory_space<vmem>>, vector<128x128xf32>
    %cst_57 = arith.constant dense<0.000000e+00> : vector<16x128xf32>
    %68 = tpu.matmul %56, %67, %cst_57 {dimension_numbers = #tpu.dot_dimension_numbers<[1], [0], [0], [1], [0, 0, 1, 1], [], []>} : vector<16x128xf32>, vector<128x128xf32>, vector<16x128xf32> -> vector<16x128xf32>
    %c0_58 = arith.constant 0 : index
    %c0_59 = arith.constant 0 : index
    %69 = vector.load %arg16[%c0_58, %c0_59] : memref<1x128xf32, #tpu.memory_space<vmem>>, vector<1x128xf32>
    %70 = vector.broadcast %69 : vector<1x128xf32> to vector<16x128xf32>
    %71 = arith.addf %68, %70 : vector<16x128xf32>
    %c0_60 = arith.constant 0 : index
    %c0_61 = arith.constant 0 : index
    %72 = vector.load %arg18[%c0_60, %c0_61] : memref<32x4xf32, #tpu.memory_space<vmem>>, vector<32x4xf32>
    %c0_62 = arith.constant 0 : index
    %c0_63 = arith.constant 0 : index
    %73 = vector.load %arg19[%c0_62, %c0_63] : memref<4x32xf32, #tpu.memory_space<vmem>>, vector<4x32xf32>
    %74 = vector.extract_strided_slice %61 {offsets = [0, 0], sizes = [16, 32], strides = [1, 1]} : vector<16x128xf32> to vector<16x32xf32>
    %75 = vector.extract_strided_slice %66 {offsets = [0, 0], sizes = [16, 32], strides = [1, 1]} : vector<16x128xf32> to vector<16x32xf32>
    %76 = arith.mulf %74, %75 : vector<16x32xf32>
    %cst_64 = arith.constant dense<0.000000e+00> : vector<16x4xf32>
    %77 = tpu.matmul %76, %72, %cst_64 {dimension_numbers = #tpu.dot_dimension_numbers<[1], [0], [0], [1], [0, 0, 1, 1], [], []>} : vector<16x32xf32>, vector<32x4xf32>, vector<16x4xf32> -> vector<16x4xf32>
    %cst_65 = arith.constant 0.353553385 : f32
    %78 = vector.broadcast %cst_65 : f32 to vector<16x4xf32>
    %79 = arith.mulf %77, %78 : vector<16x4xf32>
    %80 = vector.extract_strided_slice %66 {offsets = [0, 32], sizes = [16, 32], strides = [1, 1]} : vector<16x128xf32> to vector<16x32xf32>
    %81 = arith.mulf %74, %80 : vector<16x32xf32>
    %cst_66 = arith.constant dense<0.000000e+00> : vector<16x4xf32>
    %82 = tpu.matmul %81, %72, %cst_66 {dimension_numbers = #tpu.dot_dimension_numbers<[1], [0], [0], [1], [0, 0, 1, 1], [], []>} : vector<16x32xf32>, vector<32x4xf32>, vector<16x4xf32> -> vector<16x4xf32>
    %cst_67 = arith.constant 0.353553385 : f32
    %83 = vector.broadcast %cst_67 : f32 to vector<16x4xf32>
    %84 = arith.mulf %82, %83 : vector<16x4xf32>
    %85 = vector.extract_strided_slice %66 {offsets = [0, 64], sizes = [16, 32], strides = [1, 1]} : vector<16x128xf32> to vector<16x32xf32>
    %86 = arith.mulf %74, %85 : vector<16x32xf32>
    %cst_68 = arith.constant dense<0.000000e+00> : vector<16x4xf32>
    %87 = tpu.matmul %86, %72, %cst_68 {dimension_numbers = #tpu.dot_dimension_numbers<[1], [0], [0], [1], [0, 0, 1, 1], [], []>} : vector<16x32xf32>, vector<32x4xf32>, vector<16x4xf32> -> vector<16x4xf32>
    %cst_69 = arith.constant 0.353553385 : f32
    %88 = vector.broadcast %cst_69 : f32 to vector<16x4xf32>
    %89 = arith.mulf %87, %88 : vector<16x4xf32>
    %90 = vector.extract_strided_slice %66 {offsets = [0, 96], sizes = [16, 32], strides = [1, 1]} : vector<16x128xf32> to vector<16x32xf32>
    %91 = arith.mulf %74, %90 : vector<16x32xf32>
    %cst_70 = arith.constant dense<0.000000e+00> : vector<16x4xf32>
    %92 = tpu.matmul %91, %72, %cst_70 {dimension_numbers = #tpu.dot_dimension_numbers<[1], [0], [0], [1], [0, 0, 1, 1], [], []>} : vector<16x32xf32>, vector<32x4xf32>, vector<16x4xf32> -> vector<16x4xf32>
    %cst_71 = arith.constant 0.353553385 : f32
    %93 = vector.broadcast %cst_71 : f32 to vector<16x4xf32>
    %94 = arith.mulf %92, %93 : vector<16x4xf32>
    %95 = arith.maximumf %79, %84 : vector<16x4xf32>
    %96 = arith.maximumf %95, %89 : vector<16x4xf32>
    %97 = arith.maximumf %96, %94 : vector<16x4xf32>
    %98 = arith.subf %79, %97 : vector<16x4xf32>
    %99 = math.exp %98 : vector<16x4xf32>
    %100 = arith.subf %84, %97 : vector<16x4xf32>
    %101 = math.exp %100 : vector<16x4xf32>
    %102 = arith.subf %89, %97 : vector<16x4xf32>
    %103 = math.exp %102 : vector<16x4xf32>
    %104 = arith.subf %94, %97 : vector<16x4xf32>
    %105 = math.exp %104 : vector<16x4xf32>
    %106 = arith.addf %99, %101 : vector<16x4xf32>
    %107 = arith.addf %106, %103 : vector<16x4xf32>
    %108 = arith.addf %107, %105 : vector<16x4xf32>
    %109 = tpu.reciprocal %108 {approx = true} : vector<16x4xf32> -> vector<16x4xf32>
    %110 = arith.mulf %99, %109 : vector<16x4xf32>
    %cst_72 = arith.constant dense<0.000000e+00> : vector<16x32xf32>
    %111 = tpu.matmul %110, %73, %cst_72 {dimension_numbers = #tpu.dot_dimension_numbers<[1], [0], [0], [1], [0, 0, 1, 1], [], []>} : vector<16x4xf32>, vector<4x32xf32>, vector<16x32xf32> -> vector<16x32xf32>
    %112 = vector.extract_strided_slice %71 {offsets = [0, 0], sizes = [16, 32], strides = [1, 1]} : vector<16x128xf32> to vector<16x32xf32>
    %113 = arith.mulf %111, %112 : vector<16x32xf32>
    %114 = arith.mulf %101, %109 : vector<16x4xf32>
    %cst_73 = arith.constant dense<0.000000e+00> : vector<16x32xf32>
    %115 = tpu.matmul %114, %73, %cst_73 {dimension_numbers = #tpu.dot_dimension_numbers<[1], [0], [0], [1], [0, 0, 1, 1], [], []>} : vector<16x4xf32>, vector<4x32xf32>, vector<16x32xf32> -> vector<16x32xf32>
    %116 = vector.extract_strided_slice %71 {offsets = [0, 32], sizes = [16, 32], strides = [1, 1]} : vector<16x128xf32> to vector<16x32xf32>
    %117 = arith.mulf %115, %116 : vector<16x32xf32>
    %118 = arith.addf %113, %117 : vector<16x32xf32>
    %119 = arith.mulf %103, %109 : vector<16x4xf32>
    %cst_74 = arith.constant dense<0.000000e+00> : vector<16x32xf32>
    %120 = tpu.matmul %119, %73, %cst_74 {dimension_numbers = #tpu.dot_dimension_numbers<[1], [0], [0], [1], [0, 0, 1, 1], [], []>} : vector<16x4xf32>, vector<4x32xf32>, vector<16x32xf32> -> vector<16x32xf32>
    %121 = vector.extract_strided_slice %71 {offsets = [0, 64], sizes = [16, 32], strides = [1, 1]} : vector<16x128xf32> to vector<16x32xf32>
    %122 = arith.mulf %120, %121 : vector<16x32xf32>
    %123 = arith.addf %118, %122 : vector<16x32xf32>
    %124 = arith.mulf %105, %109 : vector<16x4xf32>
    %cst_75 = arith.constant dense<0.000000e+00> : vector<16x32xf32>
    %125 = tpu.matmul %124, %73, %cst_75 {dimension_numbers = #tpu.dot_dimension_numbers<[1], [0], [0], [1], [0, 0, 1, 1], [], []>} : vector<16x4xf32>, vector<4x32xf32>, vector<16x32xf32> -> vector<16x32xf32>
    %126 = vector.extract_strided_slice %71 {offsets = [0, 96], sizes = [16, 32], strides = [1, 1]} : vector<16x128xf32> to vector<16x32xf32>
    %127 = arith.mulf %125, %126 : vector<16x32xf32>
    %128 = arith.addf %123, %127 : vector<16x32xf32>
    %129 = vector.extract_strided_slice %61 {offsets = [0, 32], sizes = [16, 32], strides = [1, 1]} : vector<16x128xf32> to vector<16x32xf32>
    %130 = vector.extract_strided_slice %66 {offsets = [0, 0], sizes = [16, 32], strides = [1, 1]} : vector<16x128xf32> to vector<16x32xf32>
    %131 = arith.mulf %129, %130 : vector<16x32xf32>
    %cst_76 = arith.constant dense<0.000000e+00> : vector<16x4xf32>
    %132 = tpu.matmul %131, %72, %cst_76 {dimension_numbers = #tpu.dot_dimension_numbers<[1], [0], [0], [1], [0, 0, 1, 1], [], []>} : vector<16x32xf32>, vector<32x4xf32>, vector<16x4xf32> -> vector<16x4xf32>
    %cst_77 = arith.constant 0.353553385 : f32
    %133 = vector.broadcast %cst_77 : f32 to vector<16x4xf32>
    %134 = arith.mulf %132, %133 : vector<16x4xf32>
    %135 = vector.extract_strided_slice %66 {offsets = [0, 32], sizes = [16, 32], strides = [1, 1]} : vector<16x128xf32> to vector<16x32xf32>
    %136 = arith.mulf %129, %135 : vector<16x32xf32>
    %cst_78 = arith.constant dense<0.000000e+00> : vector<16x4xf32>
    %137 = tpu.matmul %136, %72, %cst_78 {dimension_numbers = #tpu.dot_dimension_numbers<[1], [0], [0], [1], [0, 0, 1, 1], [], []>} : vector<16x32xf32>, vector<32x4xf32>, vector<16x4xf32> -> vector<16x4xf32>
    %cst_79 = arith.constant 0.353553385 : f32
    %138 = vector.broadcast %cst_79 : f32 to vector<16x4xf32>
    %139 = arith.mulf %137, %138 : vector<16x4xf32>
    %140 = vector.extract_strided_slice %66 {offsets = [0, 64], sizes = [16, 32], strides = [1, 1]} : vector<16x128xf32> to vector<16x32xf32>
    %141 = arith.mulf %129, %140 : vector<16x32xf32>
    %cst_80 = arith.constant dense<0.000000e+00> : vector<16x4xf32>
    %142 = tpu.matmul %141, %72, %cst_80 {dimension_numbers = #tpu.dot_dimension_numbers<[1], [0], [0], [1], [0, 0, 1, 1], [], []>} : vector<16x32xf32>, vector<32x4xf32>, vector<16x4xf32> -> vector<16x4xf32>
    %cst_81 = arith.constant 0.353553385 : f32
    %143 = vector.broadcast %cst_81 : f32 to vector<16x4xf32>
    %144 = arith.mulf %142, %143 : vector<16x4xf32>
    %145 = vector.extract_strided_slice %66 {offsets = [0, 96], sizes = [16, 32], strides = [1, 1]} : vector<16x128xf32> to vector<16x32xf32>
    %146 = arith.mulf %129, %145 : vector<16x32xf32>
    %cst_82 = arith.constant dense<0.000000e+00> : vector<16x4xf32>
    %147 = tpu.matmul %146, %72, %cst_82 {dimension_numbers = #tpu.dot_dimension_numbers<[1], [0], [0], [1], [0, 0, 1, 1], [], []>} : vector<16x32xf32>, vector<32x4xf32>, vector<16x4xf32> -> vector<16x4xf32>
    %cst_83 = arith.constant 0.353553385 : f32
    %148 = vector.broadcast %cst_83 : f32 to vector<16x4xf32>
    %149 = arith.mulf %147, %148 : vector<16x4xf32>
    %150 = arith.maximumf %134, %139 : vector<16x4xf32>
    %151 = arith.maximumf %150, %144 : vector<16x4xf32>
    %152 = arith.maximumf %151, %149 : vector<16x4xf32>
    %153 = arith.subf %134, %152 : vector<16x4xf32>
    %154 = math.exp %153 : vector<16x4xf32>
    %155 = arith.subf %139, %152 : vector<16x4xf32>
    %156 = math.exp %155 : vector<16x4xf32>
    %157 = arith.subf %144, %152 : vector<16x4xf32>
    %158 = math.exp %157 : vector<16x4xf32>
    %159 = arith.subf %149, %152 : vector<16x4xf32>
    %160 = math.exp %159 : vector<16x4xf32>
    %161 = arith.addf %154, %156 : vector<16x4xf32>
    %162 = arith.addf %161, %158 : vector<16x4xf32>
    %163 = arith.addf %162, %160 : vector<16x4xf32>
    %164 = tpu.reciprocal %163 {approx = true} : vector<16x4xf32> -> vector<16x4xf32>
    %165 = arith.mulf %154, %164 : vector<16x4xf32>
    %cst_84 = arith.constant dense<0.000000e+00> : vector<16x32xf32>
    %166 = tpu.matmul %165, %73, %cst_84 {dimension_numbers = #tpu.dot_dimension_numbers<[1], [0], [0], [1], [0, 0, 1, 1], [], []>} : vector<16x4xf32>, vector<4x32xf32>, vector<16x32xf32> -> vector<16x32xf32>
    %167 = vector.extract_strided_slice %71 {offsets = [0, 0], sizes = [16, 32], strides = [1, 1]} : vector<16x128xf32> to vector<16x32xf32>
    %168 = arith.mulf %166, %167 : vector<16x32xf32>
    %169 = arith.mulf %156, %164 : vector<16x4xf32>
    %cst_85 = arith.constant dense<0.000000e+00> : vector<16x32xf32>
    %170 = tpu.matmul %169, %73, %cst_85 {dimension_numbers = #tpu.dot_dimension_numbers<[1], [0], [0], [1], [0, 0, 1, 1], [], []>} : vector<16x4xf32>, vector<4x32xf32>, vector<16x32xf32> -> vector<16x32xf32>
    %171 = vector.extract_strided_slice %71 {offsets = [0, 32], sizes = [16, 32], strides = [1, 1]} : vector<16x128xf32> to vector<16x32xf32>
    %172 = arith.mulf %170, %171 : vector<16x32xf32>
    %173 = arith.addf %168, %172 : vector<16x32xf32>
    %174 = arith.mulf %158, %164 : vector<16x4xf32>
    %cst_86 = arith.constant dense<0.000000e+00> : vector<16x32xf32>
    %175 = tpu.matmul %174, %73, %cst_86 {dimension_numbers = #tpu.dot_dimension_numbers<[1], [0], [0], [1], [0, 0, 1, 1], [], []>} : vector<16x4xf32>, vector<4x32xf32>, vector<16x32xf32> -> vector<16x32xf32>
    %176 = vector.extract_strided_slice %71 {offsets = [0, 64], sizes = [16, 32], strides = [1, 1]} : vector<16x128xf32> to vector<16x32xf32>
    %177 = arith.mulf %175, %176 : vector<16x32xf32>
    %178 = arith.addf %173, %177 : vector<16x32xf32>
    %179 = arith.mulf %160, %164 : vector<16x4xf32>
    %cst_87 = arith.constant dense<0.000000e+00> : vector<16x32xf32>
    %180 = tpu.matmul %179, %73, %cst_87 {dimension_numbers = #tpu.dot_dimension_numbers<[1], [0], [0], [1], [0, 0, 1, 1], [], []>} : vector<16x4xf32>, vector<4x32xf32>, vector<16x32xf32> -> vector<16x32xf32>
    %181 = vector.extract_strided_slice %71 {offsets = [0, 96], sizes = [16, 32], strides = [1, 1]} : vector<16x128xf32> to vector<16x32xf32>
    %182 = arith.mulf %180, %181 : vector<16x32xf32>
    %183 = arith.addf %178, %182 : vector<16x32xf32>
    %184 = vector.extract_strided_slice %61 {offsets = [0, 64], sizes = [16, 32], strides = [1, 1]} : vector<16x128xf32> to vector<16x32xf32>
    %185 = vector.extract_strided_slice %66 {offsets = [0, 0], sizes = [16, 32], strides = [1, 1]} : vector<16x128xf32> to vector<16x32xf32>
    %186 = arith.mulf %184, %185 : vector<16x32xf32>
    %cst_88 = arith.constant dense<0.000000e+00> : vector<16x4xf32>
    %187 = tpu.matmul %186, %72, %cst_88 {dimension_numbers = #tpu.dot_dimension_numbers<[1], [0], [0], [1], [0, 0, 1, 1], [], []>} : vector<16x32xf32>, vector<32x4xf32>, vector<16x4xf32> -> vector<16x4xf32>
    %cst_89 = arith.constant 0.353553385 : f32
    %188 = vector.broadcast %cst_89 : f32 to vector<16x4xf32>
    %189 = arith.mulf %187, %188 : vector<16x4xf32>
    %190 = vector.extract_strided_slice %66 {offsets = [0, 32], sizes = [16, 32], strides = [1, 1]} : vector<16x128xf32> to vector<16x32xf32>
    %191 = arith.mulf %184, %190 : vector<16x32xf32>
    %cst_90 = arith.constant dense<0.000000e+00> : vector<16x4xf32>
    %192 = tpu.matmul %191, %72, %cst_90 {dimension_numbers = #tpu.dot_dimension_numbers<[1], [0], [0], [1], [0, 0, 1, 1], [], []>} : vector<16x32xf32>, vector<32x4xf32>, vector<16x4xf32> -> vector<16x4xf32>
    %cst_91 = arith.constant 0.353553385 : f32
    %193 = vector.broadcast %cst_91 : f32 to vector<16x4xf32>
    %194 = arith.mulf %192, %193 : vector<16x4xf32>
    %195 = vector.extract_strided_slice %66 {offsets = [0, 64], sizes = [16, 32], strides = [1, 1]} : vector<16x128xf32> to vector<16x32xf32>
    %196 = arith.mulf %184, %195 : vector<16x32xf32>
    %cst_92 = arith.constant dense<0.000000e+00> : vector<16x4xf32>
    %197 = tpu.matmul %196, %72, %cst_92 {dimension_numbers = #tpu.dot_dimension_numbers<[1], [0], [0], [1], [0, 0, 1, 1], [], []>} : vector<16x32xf32>, vector<32x4xf32>, vector<16x4xf32> -> vector<16x4xf32>
    %cst_93 = arith.constant 0.353553385 : f32
    %198 = vector.broadcast %cst_93 : f32 to vector<16x4xf32>
    %199 = arith.mulf %197, %198 : vector<16x4xf32>
    %200 = vector.extract_strided_slice %66 {offsets = [0, 96], sizes = [16, 32], strides = [1, 1]} : vector<16x128xf32> to vector<16x32xf32>
    %201 = arith.mulf %184, %200 : vector<16x32xf32>
    %cst_94 = arith.constant dense<0.000000e+00> : vector<16x4xf32>
    %202 = tpu.matmul %201, %72, %cst_94 {dimension_numbers = #tpu.dot_dimension_numbers<[1], [0], [0], [1], [0, 0, 1, 1], [], []>} : vector<16x32xf32>, vector<32x4xf32>, vector<16x4xf32> -> vector<16x4xf32>
    %cst_95 = arith.constant 0.353553385 : f32
    %203 = vector.broadcast %cst_95 : f32 to vector<16x4xf32>
    %204 = arith.mulf %202, %203 : vector<16x4xf32>
    %205 = arith.maximumf %189, %194 : vector<16x4xf32>
    %206 = arith.maximumf %205, %199 : vector<16x4xf32>
    %207 = arith.maximumf %206, %204 : vector<16x4xf32>
    %208 = arith.subf %189, %207 : vector<16x4xf32>
    %209 = math.exp %208 : vector<16x4xf32>
    %210 = arith.subf %194, %207 : vector<16x4xf32>
    %211 = math.exp %210 : vector<16x4xf32>
    %212 = arith.subf %199, %207 : vector<16x4xf32>
    %213 = math.exp %212 : vector<16x4xf32>
    %214 = arith.subf %204, %207 : vector<16x4xf32>
    %215 = math.exp %214 : vector<16x4xf32>
    %216 = arith.addf %209, %211 : vector<16x4xf32>
    %217 = arith.addf %216, %213 : vector<16x4xf32>
    %218 = arith.addf %217, %215 : vector<16x4xf32>
    %219 = tpu.reciprocal %218 {approx = true} : vector<16x4xf32> -> vector<16x4xf32>
    %220 = arith.mulf %209, %219 : vector<16x4xf32>
    %cst_96 = arith.constant dense<0.000000e+00> : vector<16x32xf32>
    %221 = tpu.matmul %220, %73, %cst_96 {dimension_numbers = #tpu.dot_dimension_numbers<[1], [0], [0], [1], [0, 0, 1, 1], [], []>} : vector<16x4xf32>, vector<4x32xf32>, vector<16x32xf32> -> vector<16x32xf32>
    %222 = vector.extract_strided_slice %71 {offsets = [0, 0], sizes = [16, 32], strides = [1, 1]} : vector<16x128xf32> to vector<16x32xf32>
    %223 = arith.mulf %221, %222 : vector<16x32xf32>
    %224 = arith.mulf %211, %219 : vector<16x4xf32>
    %cst_97 = arith.constant dense<0.000000e+00> : vector<16x32xf32>
    %225 = tpu.matmul %224, %73, %cst_97 {dimension_numbers = #tpu.dot_dimension_numbers<[1], [0], [0], [1], [0, 0, 1, 1], [], []>} : vector<16x4xf32>, vector<4x32xf32>, vector<16x32xf32> -> vector<16x32xf32>
    %226 = vector.extract_strided_slice %71 {offsets = [0, 32], sizes = [16, 32], strides = [1, 1]} : vector<16x128xf32> to vector<16x32xf32>
    %227 = arith.mulf %225, %226 : vector<16x32xf32>
    %228 = arith.addf %223, %227 : vector<16x32xf32>
    %229 = arith.mulf %213, %219 : vector<16x4xf32>
    %cst_98 = arith.constant dense<0.000000e+00> : vector<16x32xf32>
    %230 = tpu.matmul %229, %73, %cst_98 {dimension_numbers = #tpu.dot_dimension_numbers<[1], [0], [0], [1], [0, 0, 1, 1], [], []>} : vector<16x4xf32>, vector<4x32xf32>, vector<16x32xf32> -> vector<16x32xf32>
    %231 = vector.extract_strided_slice %71 {offsets = [0, 64], sizes = [16, 32], strides = [1, 1]} : vector<16x128xf32> to vector<16x32xf32>
    %232 = arith.mulf %230, %231 : vector<16x32xf32>
    %233 = arith.addf %228, %232 : vector<16x32xf32>
    %234 = arith.mulf %215, %219 : vector<16x4xf32>
    %cst_99 = arith.constant dense<0.000000e+00> : vector<16x32xf32>
    %235 = tpu.matmul %234, %73, %cst_99 {dimension_numbers = #tpu.dot_dimension_numbers<[1], [0], [0], [1], [0, 0, 1, 1], [], []>} : vector<16x4xf32>, vector<4x32xf32>, vector<16x32xf32> -> vector<16x32xf32>
    %236 = vector.extract_strided_slice %71 {offsets = [0, 96], sizes = [16, 32], strides = [1, 1]} : vector<16x128xf32> to vector<16x32xf32>
    %237 = arith.mulf %235, %236 : vector<16x32xf32>
    %238 = arith.addf %233, %237 : vector<16x32xf32>
    %239 = vector.extract_strided_slice %61 {offsets = [0, 96], sizes = [16, 32], strides = [1, 1]} : vector<16x128xf32> to vector<16x32xf32>
    %240 = vector.extract_strided_slice %66 {offsets = [0, 0], sizes = [16, 32], strides = [1, 1]} : vector<16x128xf32> to vector<16x32xf32>
    %241 = arith.mulf %239, %240 : vector<16x32xf32>
    %cst_100 = arith.constant dense<0.000000e+00> : vector<16x4xf32>
    %242 = tpu.matmul %241, %72, %cst_100 {dimension_numbers = #tpu.dot_dimension_numbers<[1], [0], [0], [1], [0, 0, 1, 1], [], []>} : vector<16x32xf32>, vector<32x4xf32>, vector<16x4xf32> -> vector<16x4xf32>
    %cst_101 = arith.constant 0.353553385 : f32
    %243 = vector.broadcast %cst_101 : f32 to vector<16x4xf32>
    %244 = arith.mulf %242, %243 : vector<16x4xf32>
    %245 = vector.extract_strided_slice %66 {offsets = [0, 32], sizes = [16, 32], strides = [1, 1]} : vector<16x128xf32> to vector<16x32xf32>
    %246 = arith.mulf %239, %245 : vector<16x32xf32>
    %cst_102 = arith.constant dense<0.000000e+00> : vector<16x4xf32>
    %247 = tpu.matmul %246, %72, %cst_102 {dimension_numbers = #tpu.dot_dimension_numbers<[1], [0], [0], [1], [0, 0, 1, 1], [], []>} : vector<16x32xf32>, vector<32x4xf32>, vector<16x4xf32> -> vector<16x4xf32>
    %cst_103 = arith.constant 0.353553385 : f32
    %248 = vector.broadcast %cst_103 : f32 to vector<16x4xf32>
    %249 = arith.mulf %247, %248 : vector<16x4xf32>
    %250 = vector.extract_strided_slice %66 {offsets = [0, 64], sizes = [16, 32], strides = [1, 1]} : vector<16x128xf32> to vector<16x32xf32>
    %251 = arith.mulf %239, %250 : vector<16x32xf32>
    %cst_104 = arith.constant dense<0.000000e+00> : vector<16x4xf32>
    %252 = tpu.matmul %251, %72, %cst_104 {dimension_numbers = #tpu.dot_dimension_numbers<[1], [0], [0], [1], [0, 0, 1, 1], [], []>} : vector<16x32xf32>, vector<32x4xf32>, vector<16x4xf32> -> vector<16x4xf32>
    %cst_105 = arith.constant 0.353553385 : f32
    %253 = vector.broadcast %cst_105 : f32 to vector<16x4xf32>
    %254 = arith.mulf %252, %253 : vector<16x4xf32>
    %255 = vector.extract_strided_slice %66 {offsets = [0, 96], sizes = [16, 32], strides = [1, 1]} : vector<16x128xf32> to vector<16x32xf32>
    %256 = arith.mulf %239, %255 : vector<16x32xf32>
    %cst_106 = arith.constant dense<0.000000e+00> : vector<16x4xf32>
    %257 = tpu.matmul %256, %72, %cst_106 {dimension_numbers = #tpu.dot_dimension_numbers<[1], [0], [0], [1], [0, 0, 1, 1], [], []>} : vector<16x32xf32>, vector<32x4xf32>, vector<16x4xf32> -> vector<16x4xf32>
    %cst_107 = arith.constant 0.353553385 : f32
    %258 = vector.broadcast %cst_107 : f32 to vector<16x4xf32>
    %259 = arith.mulf %257, %258 : vector<16x4xf32>
    %260 = arith.maximumf %244, %249 : vector<16x4xf32>
    %261 = arith.maximumf %260, %254 : vector<16x4xf32>
    %262 = arith.maximumf %261, %259 : vector<16x4xf32>
    %263 = arith.subf %244, %262 : vector<16x4xf32>
    %264 = math.exp %263 : vector<16x4xf32>
    %265 = arith.subf %249, %262 : vector<16x4xf32>
    %266 = math.exp %265 : vector<16x4xf32>
    %267 = arith.subf %254, %262 : vector<16x4xf32>
    %268 = math.exp %267 : vector<16x4xf32>
    %269 = arith.subf %259, %262 : vector<16x4xf32>
    %270 = math.exp %269 : vector<16x4xf32>
    %271 = arith.addf %264, %266 : vector<16x4xf32>
    %272 = arith.addf %271, %268 : vector<16x4xf32>
    %273 = arith.addf %272, %270 : vector<16x4xf32>
    %274 = tpu.reciprocal %273 {approx = true} : vector<16x4xf32> -> vector<16x4xf32>
    %275 = arith.mulf %264, %274 : vector<16x4xf32>
    %cst_108 = arith.constant dense<0.000000e+00> : vector<16x32xf32>
    %276 = tpu.matmul %275, %73, %cst_108 {dimension_numbers = #tpu.dot_dimension_numbers<[1], [0], [0], [1], [0, 0, 1, 1], [], []>} : vector<16x4xf32>, vector<4x32xf32>, vector<16x32xf32> -> vector<16x32xf32>
    %277 = vector.extract_strided_slice %71 {offsets = [0, 0], sizes = [16, 32], strides = [1, 1]} : vector<16x128xf32> to vector<16x32xf32>
    %278 = arith.mulf %276, %277 : vector<16x32xf32>
    %279 = arith.mulf %266, %274 : vector<16x4xf32>
    %cst_109 = arith.constant dense<0.000000e+00> : vector<16x32xf32>
    %280 = tpu.matmul %279, %73, %cst_109 {dimension_numbers = #tpu.dot_dimension_numbers<[1], [0], [0], [1], [0, 0, 1, 1], [], []>} : vector<16x4xf32>, vector<4x32xf32>, vector<16x32xf32> -> vector<16x32xf32>
    %281 = vector.extract_strided_slice %71 {offsets = [0, 32], sizes = [16, 32], strides = [1, 1]} : vector<16x128xf32> to vector<16x32xf32>
    %282 = arith.mulf %280, %281 : vector<16x32xf32>
    %283 = arith.addf %278, %282 : vector<16x32xf32>
    %284 = arith.mulf %268, %274 : vector<16x4xf32>
    %cst_110 = arith.constant dense<0.000000e+00> : vector<16x32xf32>
    %285 = tpu.matmul %284, %73, %cst_110 {dimension_numbers = #tpu.dot_dimension_numbers<[1], [0], [0], [1], [0, 0, 1, 1], [], []>} : vector<16x4xf32>, vector<4x32xf32>, vector<16x32xf32> -> vector<16x32xf32>
    %286 = vector.extract_strided_slice %71 {offsets = [0, 64], sizes = [16, 32], strides = [1, 1]} : vector<16x128xf32> to vector<16x32xf32>
    %287 = arith.mulf %285, %286 : vector<16x32xf32>
    %288 = arith.addf %283, %287 : vector<16x32xf32>
    %289 = arith.mulf %270, %274 : vector<16x4xf32>
    %cst_111 = arith.constant dense<0.000000e+00> : vector<16x32xf32>
    %290 = tpu.matmul %289, %73, %cst_111 {dimension_numbers = #tpu.dot_dimension_numbers<[1], [0], [0], [1], [0, 0, 1, 1], [], []>} : vector<16x4xf32>, vector<4x32xf32>, vector<16x32xf32> -> vector<16x32xf32>
    %291 = vector.extract_strided_slice %71 {offsets = [0, 96], sizes = [16, 32], strides = [1, 1]} : vector<16x128xf32> to vector<16x32xf32>
    %292 = arith.mulf %290, %291 : vector<16x32xf32>
    %293 = arith.addf %288, %292 : vector<16x32xf32>
    %294 = tpu.concatenate %128, %183, %238, %293 in 1 : vector<16x32xf32>, vector<16x32xf32>, vector<16x32xf32>, vector<16x32xf32> -> vector<16x128xf32>
    %c0_112 = arith.constant 0 : index
    %c0_113 = arith.constant 0 : index
    %295 = vector.load %arg13[%c0_112, %c0_113] : memref<128x128xf32, #tpu.memory_space<vmem>>, vector<128x128xf32>
    %cst_114 = arith.constant dense<0.000000e+00> : vector<16x128xf32>
    %296 = tpu.matmul %294, %295, %cst_114 {dimension_numbers = #tpu.dot_dimension_numbers<[1], [0], [0], [1], [0, 0, 1, 1], [], []>} : vector<16x128xf32>, vector<128x128xf32>, vector<16x128xf32> -> vector<16x128xf32>
    %c0_115 = arith.constant 0 : index
    %c0_116 = arith.constant 0 : index
    %297 = vector.load %arg17[%c0_115, %c0_116] : memref<1x128xf32, #tpu.memory_space<vmem>>, vector<1x128xf32>
    %298 = vector.broadcast %297 : vector<1x128xf32> to vector<16x128xf32>
    %299 = arith.addf %296, %298 : vector<16x128xf32>
    %c0_117 = arith.constant 0 : index
    %c0_118 = arith.constant 0 : index
    %300 = vector.load %arg20[%c0_117, %c0_118] : memref<1x128xf32, #tpu.memory_space<vmem>>, vector<1x128xf32>
    %301 = vector.broadcast %300 : vector<1x128xf32> to vector<16x128xf32>
    %302 = arith.mulf %299, %301 : vector<16x128xf32>
    %cst_119 = arith.constant 1.000000e+00 : f32
    %303 = vector.broadcast %cst_119 : f32 to vector<1x128xf32>
    %304 = arith.subf %303, %300 : vector<1x128xf32>
    %305 = vector.broadcast %304 : vector<1x128xf32> to vector<16x128xf32>
    %306 = arith.mulf %305, %56 : vector<16x128xf32>
    %307 = arith.addf %302, %306 : vector<16x128xf32>
    %c0_120 = arith.constant 0 : index
    %c0_121 = arith.constant 0 : index
    %308 = vector.load %arg21[%c0_120, %c0_121] : memref<128x128xf32, #tpu.memory_space<vmem>>, vector<128x128xf32>
    %cst_122 = arith.constant dense<0.000000e+00> : vector<16x128xf32>
    %309 = tpu.matmul %307, %308, %cst_122 {dimension_numbers = #tpu.dot_dimension_numbers<[1], [0], [0], [1], [0, 0, 1, 1], [], []>} : vector<16x128xf32>, vector<128x128xf32>, vector<16x128xf32> -> vector<16x128xf32>
    %c0_123 = arith.constant 0 : index
    %c0_124 = arith.constant 0 : index
    %310 = vector.load %arg22[%c0_123, %c0_124] : memref<1x128xf32, #tpu.memory_space<vmem>>, vector<1x128xf32>
    %311 = vector.broadcast %310 : vector<1x128xf32> to vector<16x128xf32>
    %312 = arith.addf %309, %311 : vector<16x128xf32>
    %cst_125 = arith.constant 0.00999999977 : f32
    %313 = vector.broadcast %cst_125 : f32 to vector<16x128xf32>
    %314 = arith.mulf %313, %312 : vector<16x128xf32>
    %315 = arith.maximumf %312, %314 : vector<16x128xf32>
    %c0_126 = arith.constant 0 : index
    %c0_127 = arith.constant 0 : index
    %316 = vector.load %arg23[%c0_126, %c0_127] : memref<1x128xf32, #tpu.memory_space<vmem>>, vector<1x128xf32>
    %317 = vector.broadcast %316 : vector<1x128xf32> to vector<16x128xf32>
    %318 = arith.mulf %315, %317 : vector<16x128xf32>
    %c0_128 = arith.constant 0 : index
    %c0_129 = arith.constant 0 : index
    %319 = vector.load %arg25[%c0_128, %c0_129] : memref<128x4xf32, #tpu.memory_space<vmem>>, vector<128x4xf32>
    %cst_130 = arith.constant dense<0.000000e+00> : vector<16x4xf32>
    %320 = tpu.matmul %318, %319, %cst_130 {dimension_numbers = #tpu.dot_dimension_numbers<[1], [0], [0], [1], [0, 0, 1, 1], [], []>} : vector<16x128xf32>, vector<128x4xf32>, vector<16x4xf32> -> vector<16x4xf32>
    %cst_131 = arith.constant dense<0.000000e+00> : vector<4xf32>
    %321 = vector.multi_reduction <add>, %320, %cst_131 [0] : vector<16x4xf32> to vector<4xf32>
    %322 = vector.shape_cast %321 : vector<4xf32> to vector<1x4xf32>
    %cst_132 = arith.constant 6.250000e-02 : f32
    %323 = vector.broadcast %cst_132 : f32 to vector<1x4xf32>
    %324 = arith.mulf %322, %323 : vector<1x4xf32>
    %325 = vector.shape_cast %324 : vector<1x4xf32> to vector<1x4xf32>
    %326 = vector.broadcast %325 : vector<1x4xf32> to vector<16x4xf32>
    %cst_133 = arith.constant dense<0xFF800000> : vector<16xf32>
    %327 = vector.multi_reduction <maximumf>, %326, %cst_133 [1] : vector<16x4xf32> to vector<16xf32>
    %328 = vector.shape_cast %327 : vector<16xf32> to vector<16x1xf32>
    %329 = vector.broadcast %328 : vector<16x1xf32> to vector<16x4xf32>
    %330 = arith.subf %326, %329 : vector<16x4xf32>
    %331 = math.exp %330 : vector<16x4xf32>
    %cst_134 = arith.constant dense<0.000000e+00> : vector<16xf32>
    %332 = vector.multi_reduction <add>, %331, %cst_134 [1] : vector<16x4xf32> to vector<16xf32>
    %333 = vector.shape_cast %332 : vector<16xf32> to vector<16x1xf32>
    %334 = tpu.reciprocal %333 {approx = true} : vector<16x1xf32> -> vector<16x1xf32>
    %335 = vector.broadcast %334 : vector<16x1xf32> to vector<16x4xf32>
    %336 = arith.mulf %331, %335 : vector<16x4xf32>
    %c0_135 = arith.constant 0 : index
    %c0_136 = arith.constant 0 : index
    %337 = vector.load %arg24[%c0_135, %c0_136] : memref<4x128xf32, #tpu.memory_space<vmem>>, vector<4x128xf32>
    %cst_137 = arith.constant dense<0.000000e+00> : vector<16x128xf32>
    %338 = tpu.matmul %336, %337, %cst_137 {dimension_numbers = #tpu.dot_dimension_numbers<[1], [0], [0], [1], [0, 0, 1, 1], [], []>} : vector<16x4xf32>, vector<4x128xf32>, vector<16x128xf32> -> vector<16x128xf32>
    %339 = arith.mulf %307, %338 : vector<16x128xf32>
    %c0_138 = arith.constant 0 : index
    %c0_139 = arith.constant 0 : index
    %340 = vector.load %arg26[%c0_138, %c0_139] : memref<128x32xf32, #tpu.memory_space<vmem>>, vector<128x32xf32>
    %cst_140 = arith.constant dense<0.000000e+00> : vector<16x32xf32>
    %341 = tpu.matmul %339, %340, %cst_140 {dimension_numbers = #tpu.dot_dimension_numbers<[1], [0], [0], [1], [0, 0, 1, 1], [], []>} : vector<16x128xf32>, vector<128x32xf32>, vector<16x32xf32> -> vector<16x32xf32>
    %c0_141 = arith.constant 0 : index
    %c0_142 = arith.constant 0 : index
    %342 = vector.load %arg27[%c0_141, %c0_142] : memref<16x32xf32, #tpu.memory_space<vmem>>, vector<16x32xf32>
    tpu.vector_store %arg27[%c0_141, %c0_142], %341 {strides = array<i32>} : memref<16x32xf32, #tpu.memory_space<vmem>>, vector<16x32xf32>,
    %343 = vector.extract_strided_slice %51 {offsets = [2, 0], sizes = [1, 32], strides = [1, 1]} : vector<4x32xf32> to vector<1x32xf32>
    %344 = vector.broadcast %343 : vector<1x32xf32> to vector<16x32xf32>
    %345 = arith.mulf %341, %344 : vector<16x32xf32>
    %346 = vector.extract_strided_slice %51 {offsets = [3, 0], sizes = [1, 32], strides = [1, 1]} : vector<4x32xf32> to vector<1x32xf32>
    %347 = vector.broadcast %346 : vector<1x32xf32> to vector<16x32xf32>
    %348 = arith.mulf %341, %347 : vector<16x32xf32>
    %349 = vector.extract_strided_slice %51 {offsets = [0, 0], sizes = [1, 32], strides = [1, 1]} : vector<4x32xf32> to vector<1x32xf32>
    %350 = vector.broadcast %349 : vector<1x32xf32> to vector<16x32xf32>
    %351 = arith.mulf %341, %350 : vector<16x32xf32>
    %352 = vector.extract_strided_slice %51 {offsets = [1, 0], sizes = [1, 32], strides = [1, 1]} : vector<4x32xf32> to vector<1x32xf32>
    %353 = vector.broadcast %352 : vector<1x32xf32> to vector<16x32xf32>
    %354 = arith.mulf %341, %353 : vector<16x32xf32>
    %355 = tpu.concatenate %345, %348, %351, %354 in 1 : vector<16x32xf32>, vector<16x32xf32>, vector<16x32xf32>, vector<16x32xf32> -> vector<16x128xf32>
    %c0_143 = arith.constant 0 : index
    %c0_144 = arith.constant 0 : index
    %356 = vector.load %arg28[%c0_143, %c0_144] : memref<16x128xf32, #tpu.memory_space<vmem>>, vector<16x128xf32>
    tpu.vector_store %arg28[%c0_143, %c0_144], %355 {strides = array<i32>} : memref<16x128xf32, #tpu.memory_space<vmem>>, vector<16x128xf32>,
    return
  }
}

</mosaic_0001>

<bundles_post_ra>
// kernel: hre_forward_pallas.1
= control target key start
LH: loop header
LB: loop body
LE: loop exit
PB: predicated region body
PF: predicated region fallthrough
CT: control target
= control target key end

     0   :  { %s3910_s0 = inlined_call_operand.vmem [shape: f32[64,64], index: 0, kind: input, shape index: {}]   ;;  %s3911_s1 = inlined_call_operand.vmem [shape: f32[64,32], index: 1, kind: input, shape index: {}]   ;;  %s3912_s2 = inlined_call_operand.vmem [shape: f32[4,32], index: 2, kind: input, shape index: {}]   ;;  %s3913_s3 = inlined_call_operand.vmem [shape: f32[64,4], index: 3, kind: input, shape index: {}]   ;;  %s3914_s4 = inlined_call_operand.vmem [shape: f32[2,32,32], index: 4, kind: input, shape index: {}]   ;;  %s3915_s5 = inlined_call_operand.vmem [shape: f32[2,1,32], index: 5, kind: input, shape index: {}]   ;;  %s3916_s6 = inlined_call_operand.vmem [shape: f32[1,1,32], index: 6, kind: input, shape index: {}]   ;;  %s3917_s7 = inlined_call_operand.vmem [shape: f32[1,1,32], index: 7, kind: input, shape index: {}]   ;;  %s3918_s8 = inlined_call_operand.vmem [shape: f32[2,32,32], index: 8, kind: input, shape index: {}]   ;;  %s3919_s9 = inlined_call_operand.vmem [shape: f32[2,1,32], index: 9, kind: input, shape index: {}]   ;;  %s3920_s10 = inlined_call_operand.vmem [shape: f32[128,128], index: 10, kind: input, shape index: {}]   ;;  %s3921_s11 = inlined_call_operand.vmem [shape: f32[128,128], index: 11, kind: input, shape index: {}]   ;;  %s3922_s12 = inlined_call_operand.vmem [shape: f32[128,128], index: 12, kind: input, shape index: {}]   ;;  %s3923_s13 = inlined_call_operand.vmem [shape: f32[128,128], index: 13, kind: input, shape index: {}]   ;;  %s3924_s14 = inlined_call_operand.vmem [shape: f32[1,128], index: 14, kind: input, shape index: {}]   ;;  %s3925_s15 = inlined_call_operand.vmem [shape: f32[1,128], index: 15, kind: input, shape index: {}]   ;;  %s3926_s16 = inlined_call_operand.vmem [shape: f32[1,128], index: 16, kind: input, shape index: {}]   ;;  %s3927_s17 = inlined_call_operand.vmem [shape: f32[1,128], index: 17, kind: input, shape index: {}]   ;;  %s3928_s18 = inlined_call_operand.vmem [shape: f32[32,4], index: 18, kind: input, shape index: {}]   ;;  %s3929_s19 = inlined_call_operand.vmem [shape: f32[4,32], index: 19, kind: input, shape index: {}]   ;;  %s3930_s20 = inlined_call_operand.vmem [shape: f32[1,128], index: 20, kind: input, shape index: {}]   ;;  %s3931_s21 = inlined_call_operand.vmem [shape: f32[128,128], index: 21, kind: input, shape index: {}]   ;;  %s3932_s22 = inlined_call_operand.vmem [shape: f32[1,128], index: 22, kind: input, shape index: {}]   ;;  %s3933_s23 = inlined_call_operand.vmem [shape: f32[1,128], index: 23, kind: input, shape index: {}]   ;;  %s3934_s24 = inlined_call_operand.vmem [shape: f32[4,128], index: 24, kind: input, shape index: {}]   ;;  %s3935_s25 = inlined_call_operand.vmem [shape: f32[128,4], index: 25, kind: input, shape index: {}]   ;;  %s3936_s26 = inlined_call_operand.vmem [shape: f32[128,32], index: 26, kind: input, shape index: {}]   ;;  %s3937_s27 = inlined_call_operand.hbm [shape: f32[16,32], index: 27, kind: output, shape index: {0}]   ;;  %s3938_s28 = inlined_call_operand.vmem [shape: f32[16,128], index: 28, kind: output, shape index: {1}]  }
   0x1   :  { %3953 = sst [smem:[#allocation5_spill]] %s3910_s0 }
   0x2   :  { %3954 = sst [smem:[#allocation6_spill]] %s3911_s1 }
   0x3   :  { %3955 = sst [smem:[#allocation7_spill]] %s3912_s2 }
   0x4   :  { %3956 = sst [smem:[#allocation8_spill]] %s3913_s3 }
   0x5   :  { %3957 = sst [smem:[#allocation9_spill]] %s3914_s4 }
   0x6   :  { %3958 = sst [smem:[#allocation10_spill]] %s3915_s5 }
   0x7   :  { %3959 = sst [smem:[#allocation11_spill]] %s3916_s6 }
   0x8   :  { %3960 = sst [smem:[#allocation12_spill]] %s3917_s7 }
   0x9   :  { %3961 = sst [smem:[#allocation13_spill]] %s3918_s8 }
   0xa   :  { %3962 = sst [smem:[#allocation14_spill]] %s3919_s9 }
   0xb   :  { %3963 = sst [smem:[#allocation15_spill]] %s3920_s10 }
   0xc   :  { %3964 = sst [smem:[#allocation16_spill]] %s3921_s11 }
   0xd   :  { %3965 = sst [smem:[#allocation17_spill]] %s3922_s12 }
   0xe   :  { %s3966_s9 = sld [smem:[#allocation7_spill]]  ;;  %vm139_vm0 = vcmask 1043456   ;;  %vm114_vm1 = vcmask 31744  }
   0xf   :  { %s3967_s6 = sld [smem:[#allocation8_spill]] }
  0x14   :  { %v2833_v0 = vld [vmem:[%s3966_s9] sm:$0xf] }
  0x15   :  { %v2838_v1 = vld [vmem:[%s3967_s6] sm:$0xff]  ;;  %2397 = vmatpush.msk.msra.mxu0 %vm139_vm0, %v2833_v0 }
  0x16   :  { %2398 = vmatmul.msk.f32.vlgmr.msra.gmra.mxu0 %vm114_vm1, %v2838_v1 }
  0x17   :  { %34 = vsyncpa [#allocation3], 0  ;;  %v2847_v2 = vld [vmem:[%s3967_s6 + $0x8] sm:$0xff]  ;;  %v2854_v3 = vld [vmem:[%s3967_s6 + $0x10] sm:$0xff]  ;;  %s3968_s11 = sld [smem:[#allocation6_spill]]  ;;  %vm192_vm2 = vcmask 523264  }
  0x18   :  { %v2861_v4 = vld [vmem:[%s3967_s6 + $0x18] sm:$0xff]  ;;  %v2868_v5 = vld [vmem:[%s3967_s6 + $0x20] sm:$0xff]  ;;  %v2875_v6 = vld [vmem:[%s3967_s6 + $0x28] sm:$0xff]  ;;  %s3970_s30 = sld [smem:[#allocation9_spill]]  ;;  %vm266_vm3 = vcmask 261120   ;;  %s2679_s9 = smov 96  }
  0x19   :  { %v2882_v7 = vld [vmem:[%s3967_s6 + $0x30] sm:$0xff]  ;;  %v2889_v8 = vld [vmem:[%s3967_s6 + $0x38] sm:$0xff]  ;;  %s3969_s6 = sld [smem:[#allocation5_spill]]  ;;  %s3949_s3 = smov 64   ;;  %vm646_vm4 = vcmask 785408  }
  0x1a   :  { %s3971_s0 = sld [smem:[#allocation13_spill]]  ;;  %s3951_s7 = smov 32  }
  0x1b   :  { %s3972_s12 = sld [smem:[#allocation14_spill]]  ;;  %s2381_s4 = sshll.u32 %s3937_s27, 4  ;;  %s2382_s4 = int_to_ptr.hbm [resolvable:$true] %s2381_s4 }
  0x1c   :  { %s3973_s1 = sld [smem:[#allocation10_spill]] }
  0x1d   :  { %v2896_v16 = vld [vmem:[%s3968_s11 + $0x38] sm:$0xff]  ;;  %v2901_v18 = vld [vmem:[%s3968_s11 + $0x30] sm:$0xff]  ;;  %v2907_v20 = vld [vmem:[%s3968_s11 + $0x28] sm:$0xff]  ;;  %s3974_s5 = sld [smem:[#allocation11_spill]] }
  0x1e   :  { %2399 = vmatmul.msk.f32.gmra.mxu0 %vm114_vm1, %v2847_v2  ;;  %v2913_v22 = vld [vmem:[%s3968_s11 + $0x20] sm:$0xff]  ;;  %v2919_v24 = vld [vmem:[%s3968_s11 + $0x18] sm:$0xff]  ;;  %v2925_v26 = vld [vmem:[%s3968_s11 + $0x10] sm:$0xff]  ;;  %s3976_s29 = sld [smem:[#allocation15_spill]] }
  0x1f   :  { %v2931_v28 = vld [vmem:[%s3968_s11 + $0x8] sm:$0xff]  ;;  %v2937_v30 = vld [vmem:[%s3968_s11] sm:$0xff]  ;;  %v2958_v35 = vld [vmem:[%s3969_s6 + $0x10] sm:$0xff]  ;;  %s3977_s8 = sld [smem:[#allocation16_spill]] }
  0x20   :  { %v2944_v33 = vld [vmem:[%s3969_s6] sm:$0xff]  ;;  %v2951_v34 = vld [vmem:[%s3969_s6 + $0x8] sm:$0xff]  ;;  %v2965_v36 = vld [vmem:[%s3969_s6 + $0x18] sm:$0xff] }
  0x21   :  { %v261_v37 = vld [vmem:[%s3970_s30 + $0x18] sm:$0xff]  ;;  %v260_v38 = vld [vmem:[%s3970_s30 + $0x10] sm:$0xff]  ;;  %v259_v39 = vld [vmem:[%s3970_s30 + $0x8] sm:$0xff] }
  0x22   :  { %2542 = vmatpush.msra.mxu2 %v261_v37  ;;  %2543 = vmatpush.msra.mxu3 %v261_v37  ;;  %v2981_v40 = vld [vmem:[%s3969_s6 + $0x20] sm:$0xff]  ;;  %v2988_v41 = vld [vmem:[%s3969_s6 + $0x28] sm:$0xff]  ;;  %v2995_v42 = vld [vmem:[%s3969_s6 + $0x30] sm:$0xff] }
  0x23   :  { %v3002_v43 = vld [vmem:[%s3969_s6 + $0x38] sm:$0xff]  ;;  %v258_v44 = vld [vmem:[%s3970_s30] sm:$0xff]  ;;  %v390_v50 = vld [vmem:[%s3971_s0 + $0x10] sm:$0xff]  ;;  %s3975_s6 = sld [smem:[#allocation12_spill]] }
  0x24   :  { %2544 = vmatpush.msra.mxu2 %v260_v38  ;;  %2545 = vmatpush.msra.mxu3 %v260_v38  ;;  %v391_v49 = vld [vmem:[%s3971_s0 + $0x18] sm:$0xff]  ;;  %v389_v51 = vld [vmem:[%s3971_s0 + $0x8] sm:$0xff]  ;;  %v388_v52 = vld [vmem:[%s3971_s0] sm:$0xff] }
  0x25   :  { %v2456_v57 = vld [vmem:[%s3971_s0 + $0x38] sm:$0xff]  ;;  %v2455_v58 = vld [vmem:[%s3971_s0 + $0x30] sm:$0xff]  ;;  %v2454_v59 = vld [vmem:[%s3971_s0 + $0x28] sm:$0xff] }
  0x26   :  { %2400 = vmatmul.msk.f32.gmra.mxu0 %vm114_vm1, %v2854_v3  ;;  %2546 = vmatpush.msra.mxu2 %v259_v39  ;;  %v2453_v60 = vld [vmem:[%s3971_s0 + $0x20] sm:$0xff] }
  0x27   :  { %2547 = vmatpush.msra.mxu3 %v259_v39  ;;  %v2559_v62 = vld [vmem:[%s3972_s12] ss:$0 sm:$0xff] }
  0x28   :  { %2548 = vmatpush.msra.mxu2 %v258_v44 }
  0x29   :  { %2549 = vmatpush.msra.mxu3 %v258_v44 }
  0x2b   :  { %410 = vmatpush.msrb.mxu3 %v391_v49 }
  0x2d   :  { %411 = vmatpush.msrb.mxu3 %v390_v50 }
  0x2e   :  { %2401 = vmatmul.msk.f32.gmra.mxu0 %vm114_vm1, %v2861_v4 }
  0x2f   :  { %412 = vmatpush.msrb.mxu3 %v389_v51 }
  0x31   :  { %413 = vmatpush.msrb.mxu3 %v388_v52 }
  0x36   :  { %2402 = vmatmul.msk.f32.gmra.mxu0 %vm114_vm1, %v2868_v5 }
  0x3e   :  { %2403 = vmatmul.msk.f32.gmra.mxu0 %vm114_vm1, %v2875_v6 }
  0x46   :  { %2404 = vmatmul.msk.f32.gmra.mxu0 %vm114_vm1, %v2882_v7 }
  0x4e   :  { %2405 = vmatmul.msk.f32.gmra.mxu0 %vm114_vm1, %v2889_v8 }
  0x93   :  { %v160_v9 = vpop.f32.mrf.mxu0 }
  0x94   :  { %v184_v32 = vmul.f32 %v160_v9, %v2937_v30 }
  0x9b   :  { %v163_v10 = vpop.f32.mrf.mxu0 }
  0x9c   :  { %v185_v31 = vmul.f32 %v163_v10, %v2931_v28 }
  0xa3   :  { %v166_v11 = vpop.f32.mrf.mxu0 }
  0xa4   :  { %v186_v29 = vmul.f32 %v166_v11, %v2925_v26 }
  0xab   :  { %v169_v12 = vpop.f32.mrf.mxu0 }
  0xac   :  { %v187_v27 = vmul.f32 %v169_v12, %v2919_v24 }
  0xb3   :  { %v172_v13 = vpop.f32.mrf.mxu0 }
  0xb4   :  { %v188_v25 = vmul.f32 %v172_v13, %v2913_v22 }
  0xbb   :  { %v175_v14 = vpop.f32.mrf.mxu0 }
  0xbc   :  { %v189_v23 = vmul.f32 %v175_v14, %v2907_v20 }
  0xc3   :  { %v178_v15 = vpop.f32.mrf.mxu0 }
  0xc4   :  { %v190_v21 = vmul.f32 %v178_v15, %v2901_v18 }
  0xcb   :  { %v181_v17 = vpop.f32.mrf.mxu0 }
  0xcc   :  { %v191_v19 = vmul.f32 %v181_v17, %v2896_v16 }
  0xce   :  { %225 = vmatpush.msra.mxu1 %v191_v19  ;;  %v2557_v19 = vld [vmem:[%s3974_s5] ss:$0 sm:$0xff]  ;;  %s3980_s5 = smov 64  }
  0xd0   :  { %226 = vmatpush.msra.mxu1 %v190_v21 }
  0xd2   :  { %227 = vmatpush.msra.mxu1 %v189_v23 }
  0xd4   :  { %228 = vmatpush.msra.mxu1 %v188_v25 }
  0xd6   :  { %229 = vmatpush.msra.mxu1 %v187_v27 }
  0xd8   :  { %230 = vmatpush.msra.mxu1 %v186_v29 }
  0xda   :  { %231 = vmatpush.msra.mxu1 %v185_v31 }
  0xdc   :  { %232 = vmatpush.msra.mxu1 %v184_v32 }
  0xdd   :  { %2406 = vmatmul.msk.f32.vlgmr.msra.gmra.mxu1 %vm192_vm2, %v2944_v33 }
  0xde   :  { %303 = vmatpush.msrb.mxu1 %v261_v37  ;;  %v2558_v37 = vld [vmem:[%s3975_s6] ss:$0 sm:$0xff]  ;;  %s3978_s6 = sld [smem:[#allocation17_spill]] }
  0xe0   :  { %304 = vmatpush.msrb.mxu1 %v260_v38 }
  0xe2   :  { %305 = vmatpush.msrb.mxu1 %v259_v39 }
  0xe4   :  { %306 = vmatpush.msrb.mxu1 %v258_v44 }
  0xe5   :  { %2407 = vmatmul.msk.f32.gmra.mxu1 %vm192_vm2, %v2951_v34 }
  0xe6   :  { %610 = vmatpush.msra.mxu1 %v2456_v57 }
  0xe8   :  { %611 = vmatpush.msra.mxu1 %v2455_v58 }
  0xea   :  { %612 = vmatpush.msra.mxu1 %v2454_v59 }
  0xec   :  { %613 = vmatpush.msra.mxu1 %v2453_v60 }
  0xed   :  { %2408 = vmatmul.msk.f32.gmra.mxu1 %vm192_vm2, %v2958_v35 }
  0xf5   :  { %2409 = vmatmul.msk.f32.gmra.mxu1 %vm192_vm2, %v2965_v36 }
  0xfd   :  { %2410 = vmatmul.msk.f32.gmra.mxu1 %vm192_vm2, %v2981_v40 }
 0x105   :  { %2411 = vmatmul.msk.f32.gmra.mxu1 %vm192_vm2, %v2988_v41 }
 0x10d   :  { %2412 = vmatmul.msk.f32.gmra.mxu1 %vm192_vm2, %v2995_v42 }
 0x115   :  { %2413 = vmatmul.msk.f32.gmra.mxu1 %vm192_vm2, %v3002_v43 }
 0x15a   :  { %v234_v45 = vpop.f32.mrf.mxu1 }
 0x15b   :  { %2414 = vmatmul.msk.f32.vlgmr.msrb.gmra.mxu1 %vm266_vm3, %v234_v45 }
 0x162   :  { %v237_v46 = vpop.f32.mrf.mxu1 }
 0x163   :  { %2415 = vmatmul.msk.f32.vlgmr.msra.gmra.mxu2 %vm266_vm3, %v237_v46 }
 0x16a   :  { %v240_v47 = vpop.f32.mrf.mxu1 }
 0x16b   :  { %2416 = vmatmul.msk.f32.gmra.mxu2 %vm266_vm3, %v240_v47 }
 0x172   :  { %v243_v48 = vpop.f32.mrf.mxu1 }
 0x173   :  { %2417 = vmatmul.msk.f32.gmra.mxu2 %vm266_vm3, %v243_v48 }
 0x17a   :  { %v246_v53 = vpop.f32.mrf.mxu1 }
 0x17b   :  { %2418 = vmatmul.msk.f32.gmra.mxu2 %vm266_vm3, %v246_v53 }
 0x182   :  { %v249_v54 = vpop.f32.mrf.mxu1 }
 0x183   :  { %2419 = vmatmul.msk.f32.gmra.mxu2 %vm266_vm3, %v249_v54 }
 0x18a   :  { %v252_v55 = vpop.f32.mrf.mxu1 }
 0x18b   :  { %2420 = vmatmul.msk.f32.gmra.mxu2 %vm266_vm3, %v252_v55 }
 0x192   :  { %v255_v56 = vpop.f32.mrf.mxu1 }
 0x193   :  { %2421 = vmatmul.msk.f32.vlgmr.msra.gmra.mxu3 %vm266_vm3, %v255_v56 }
 0x19b   :  { %2422 = vmatmul.msk.f32.vlgmr.msrb.gmra.mxu3 %vm266_vm3, %v2833_v0 }
 0x1d8   :  { %v308_v32 = vpop.f32.mrf.mxu1 }
 0x216   :  { %v329_v61 = vpop.f32.mrf.mxu3 }
 0x21e   :  { %v415_v63 = vpop.f32.mrf.mxu3 }
 0x21f   :  { %v416_v0 = vadd.f32 %v2559_v62, %v415_v63 }
 0x221   :  { %2423 = vmatpush.msk.msra.mxu3 %vm139_vm0, %v416_v0  ;;  %2458 = vmatmul.msk.f32.vlgmr.msra.gmra.mxu1 %vm266_vm3, %v416_v0 }
 0x222   :  { %2424 = vmatmul.msk.f32.vlgmr.msra.gmra.mxu3 %vm114_vm1, %v2838_v1  ;;  %v311_v1 = vpop.f32.mrf.mxu2 }
 0x22a   :  { %2425 = vmatmul.msk.f32.gmra.mxu3 %vm114_vm1, %v2847_v2  ;;  %v314_v2 = vpop.f32.mrf.mxu2 }
 0x232   :  { %2426 = vmatmul.msk.f32.gmra.mxu3 %vm114_vm1, %v2854_v3  ;;  %v317_v9 = vpop.f32.mrf.mxu2 }
 0x23a   :  { %2427 = vmatmul.msk.f32.gmra.mxu3 %vm114_vm1, %v2861_v4  ;;  %v320_v4 = vpop.f32.mrf.mxu2 }
 0x242   :  { %2428 = vmatmul.msk.f32.gmra.mxu3 %vm114_vm1, %v2868_v5  ;;  %v323_v5 = vpop.f32.mrf.mxu2 }
 0x24a   :  { %2429 = vmatmul.msk.f32.gmra.mxu3 %vm114_vm1, %v2875_v6  ;;  %v2556_v6 = vld [vmem:[%s3973_s1] ss:$0 sm:$0xff] }
 0x24b   :  { %v330_v13 = vadd.f32 %v2556_v6, %v329_v61  ;;  %v324_v15 = vadd.f32 %v2556_v6, %v323_v5  ;;  %v321_v21 = vadd.f32 %v2556_v6, %v320_v4  ;;  %v318_v25 = vadd.f32 %v2556_v6, %v317_v9 }
 0x24c   :  { %v315_v38 = vadd.f32 %v2556_v6, %v314_v2  ;;  %v312_v45 = vadd.f32 %v2556_v6, %v311_v1  ;;  %v309_v49 = vadd.f32 %v2556_v6, %v308_v32 }
 0x24d   :  { %v339_v17 = vmul.f32 0.999995, %v330_v13  ;;  %v337_v27 = vmul.f32 0.999995, %v324_v15  ;;  %v336_v39 = vmul.f32 0.999995, %v321_v21 }
 0x24e   :  { %v335_v46 = vmul.f32 0.999995, %v318_v25  ;;  %v334_v50 = vmul.f32 0.999995, %v315_v38  ;;  %v333_v53 = vmul.f32 0.999995, %v312_v45 }
 0x24f   :  { %v351_v29 = vmul.f32 %v2557_v19, %v339_v17  ;;  %v349_v47 = vmul.f32 %v2557_v19, %v337_v27  ;;  %v348_v51 = vmul.f32 %v2557_v19, %v336_v39  ;;  %v332_v57 = vmul.f32 0.999995, %v309_v49 }
 0x250   :  { %v347_v54 = vmul.f32 %v2557_v19, %v335_v46  ;;  %v346_v59 = vmul.f32 %v2557_v19, %v334_v50  ;;  %v345_v62 = vmul.f32 %v2557_v19, %v333_v53 }
 0x251   :  { %v363_v48 = vadd.f32 %v2558_v37, %v351_v29  ;;  %v361_v55 = vadd.f32 %v2558_v37, %v349_v47  ;;  %v360_v60 = vadd.f32 %v2558_v37, %v348_v51  ;;  %v344_v2 = vmul.f32 %v2557_v19, %v332_v57  ;;  %v661_v57 = vld [vmem:[%s3976_s29 + $0x60] sm:$0xff] }
 0x252   :  { %2430 = vmatmul.msk.f32.gmra.mxu3 %vm114_vm1, %v2882_v7  ;;  %v326_v7 = vpop.f32.mrf.mxu2  ;;  %v359_v63 = vadd.f32 %v2558_v37, %v347_v54  ;;  %v358_v9 = vadd.f32 %v2558_v37, %v346_v59  ;;  %v664_v54 = vld [vmem:[%s3976_s29 + $0x78] sm:$0xff] }
 0x253   :  { %v327_v14 = vadd.f32 %v2556_v6, %v326_v7  ;;  %v371_v56 = vmul.f32 0.01, %v363_v48  ;;  %v369_v1 = vmul.f32 0.01, %v361_v55  ;;  %v368_v5 = vmul.f32 0.01, %v360_v60  ;;  %669 = vmatpush.msrb.mxu3 %v664_v54 }
 0x254   :  { %v357_v6 = vadd.f32 %v2558_v37, %v345_v62  ;;  %v356_v15 = vadd.f32 %v2558_v37, %v344_v2  ;;  %v366_v27 = vmul.f32 0.01, %v358_v9  ;;  %v659_v62 = vld [vmem:[%s3976_s29 + $0x50] sm:$0xff] }
 0x255   :  { %v338_v23 = vmul.f32 0.999995, %v327_v14  ;;  %v379_v0 = vmax.f32 %v363_v48, %v371_v56  ;;  %v377_v13 = vmax.f32 %v361_v55, %v369_v1  ;;  %v367_v14 = vmul.f32 0.01, %v359_v63  ;;  %v663_v55 = vld [vmem:[%s3976_s29 + $0x70] sm:$0xff]  ;;  %v662_v56 = vld [vmem:[%s3976_s29 + $0x68] sm:$0xff] }
 0x256   :  { %v376_v25 = vmax.f32 %v360_v60, %v368_v5  ;;  %v365_v38 = vmul.f32 0.01, %v357_v6  ;;  %v364_v39 = vmul.f32 0.01, %v356_v15  ;;  %v374_v45 = vmax.f32 %v358_v9, %v366_v27  ;;  %670 = vmatpush.msrb.mxu3 %v663_v55  ;;  %v653_v27 = vld [vmem:[%s3976_s29 + $0x20] sm:$0xff] }
 0x257   :  { %v350_v44 = vmul.f32 %v2557_v19, %v338_v23  ;;  %v387_v7 = vadd.f32 %v379_v0, %v2896_v16  ;;  %v385_v32 = vadd.f32 %v377_v13, %v2907_v20  ;;  %v375_v19 = vmax.f32 %v359_v63, %v367_v14  ;;  %v658_v63 = vld [vmem:[%s3976_s29 + $0x48] sm:$0xff]  ;;  %v707_v13 = vld [vmem:[%s3977_s8 + $0x78] sm:$0xff] }
 0x258   :  { %v384_v16 = vadd.f32 %v376_v25, %v2913_v22  ;;  %v382_v48 = vadd.f32 %v374_v45, %v2925_v26  ;;  %v372_v49 = vmax.f32 %v356_v15, %v364_v39  ;;  %v2443_v26 = vld [vmem:[%s3970_s30 + $0x38] sm:$0xff]  ;;  %671 = vmatpush.msrb.mxu3 %v662_v56  ;;  %712 = vmatpush.msrb.mxu1 %v707_v13  ;;  %v706_v15 = vld [vmem:[%s3977_s8 + $0x70] sm:$0xff]  ;;  %v704_v25 = vld [vmem:[%s3977_s8 + $0x60] sm:$0xff] }
 0x259   :  { %v362_v52 = vadd.f32 %v2558_v37, %v350_v44  ;;  %v383_v46 = vadd.f32 %v375_v19, %v2919_v24  ;;  %557 = vmatpush.msrb.mxu2 %v2443_v26  ;;  %v656_v14 = vld [vmem:[%s3976_s29 + $0x38] sm:$0xff]  ;;  %v702_v19 = vld [vmem:[%s3977_s8 + $0x50] sm:$0xff]  ;;  %v701_v39 = vld [vmem:[%s3977_s8 + $0x48] sm:$0xff] }
 0x25a   :  { %2431 = vmatmul.msk.f32.gmra.mxu3 %vm114_vm1, %v2889_v8  ;;  %713 = vmatpush.msrb.mxu1 %v706_v15  ;;  %v649_v45 = vld [vmem:[%s3976_s29] sm:$0xff]  ;;  %v745_v26 = vld [vmem:[%s3978_s6 + $0x50] sm:$0xff] }
 0x25b   :  { %v370_v61 = vmul.f32 0.01, %v362_v52  ;;  %672 = vmatpush.msrb.mxu3 %v661_v57 }
 0x25d   :  { %v378_v4 = vmax.f32 %v362_v52, %v370_v61  ;;  %v660_v61 = vld [vmem:[%s3976_s29 + $0x58] sm:$0xff] }
 0x25e   :  { %673 = vmatpush.msrb.mxu3 %v660_v61  ;;  %v3314_v61 = vld [vmem:[%s3928_s18 + $0x10] sm:$0xff] }
 0x25f   :  { %v386_v21 = vadd.f32 %v378_v4, %v2901_v18  ;;  %v373_v18 = vmax.f32 %v357_v6, %v365_v38  ;;  %v651_v38 = vld [vmem:[%s3976_s29 + $0x10] sm:$0xff] }
 0x260   :  { %674 = vmatpush.msrb.mxu3 %v659_v62  ;;  %v3323_v62 = vld [vmem:[%s3928_s18 + $0x8] sm:$0xff] }
 0x261   :  { %v381_v50 = vadd.f32 %v373_v18, %v2931_v28  ;;  %v2442_v28 = vld [vmem:[%s3970_s30 + $0x30] sm:$0xff] }
 0x262   :  { %558 = vmatpush.msrb.mxu2 %v2442_v28  ;;  %675 = vmatpush.msrb.mxu3 %v658_v63  ;;  %v749_v18 = vld [vmem:[%s3978_s6 + $0x70] sm:$0xff]  ;;  %v693_v28 = vld [vmem:[%s3977_s8 + $0x8] sm:$0xff]  ;;  %v3332_v63 = vld [vmem:[%s3928_s18] sm:$0xff] }
 0x2a5   :  { %v3064_v10 = vpop.f32.mrf.mxu3 }
 0x2ad   :  { %v3066_v3 = vpop.f32.mrf.mxu3 }
 0x2ae   :  { %v463_v22 = vmul.f32 %v3066_v3, %v381_v50  ;;  %v2561_v3 = vld [vmem:[%s3973_s1 + $0x1] ss:$0 sm:$0xff] }
 0x2af   :  { %v747_v50 = vld [vmem:[%s3978_s6 + $0x60] sm:$0xff] }
 0x2b5   :  { %v3068_v11 = vpop.f32.mrf.mxu3 }
 0x2b6   :  { %v464_v20 = vmul.f32 %v3068_v11, %v382_v48  ;;  %v748_v48 = vld [vmem:[%s3978_s6 + $0x68] sm:$0xff] }
 0x2bd   :  { %v3070_v12 = vpop.f32.mrf.mxu3 }
 0x2be   :  { %v465_v47 = vmul.f32 %v3070_v12, %v383_v46  ;;  %v699_v46 = vld [vmem:[%s3977_s8 + $0x38] sm:$0xff] }
 0x2c5   :  { %v450_v8 = vpop.f32.mrf.mxu3 }
 0x2c6   :  { %v466_v37 = vmul.f32 %v450_v8, %v384_v16  ;;  %v700_v16 = vld [vmem:[%s3977_s8 + $0x40] sm:$0xff] }
 0x2cd   :  { %v453_v31 = vpop.f32.mrf.mxu3 }
 0x2ce   :  { %v467_v44 = vmul.f32 %v453_v31, %v385_v32  ;;  %v380_v31 = vadd.f32 %v372_v49, %v2937_v30  ;;  %v2441_v30 = vld [vmem:[%s3970_s30 + $0x28] sm:$0xff]  ;;  %v652_v32 = vld [vmem:[%s3976_s29 + $0x18] sm:$0xff] }
 0x2cf   :  { %559 = vmatpush.msrb.mxu2 %v2441_v30  ;;  %v697_v49 = vld [vmem:[%s3977_s8 + $0x28] sm:$0xff] }
 0x2d0   :  { %v462_v24 = vmul.f32 %v3064_v10, %v380_v31  ;;  %v746_v31 = vld [vmem:[%s3978_s6 + $0x58] sm:$0xff]  ;;  %v744_v30 = vld [vmem:[%s3978_s6 + $0x48] sm:$0xff] }
 0x2d5   :  { %v456_v58 = vpop.f32.mrf.mxu3 }
 0x2d6   :  { %v468_v29 = vmul.f32 %v456_v58, %v386_v21  ;;  %v705_v21 = vld [vmem:[%s3977_s8 + $0x68] sm:$0xff] }
 0x2d7   :  { %714 = vmatpush.msrb.mxu1 %v705_v21 }
 0x2d9   :  { %715 = vmatpush.msrb.mxu1 %v704_v25 }
 0x2dd   :  { %v459_v17 = vpop.f32.mrf.mxu3 }
 0x2de   :  { %v469_v23 = vmul.f32 %v459_v17, %v387_v7  ;;  %v657_v7 = vld [vmem:[%s3976_s29 + $0x40] sm:$0xff]  ;;  %v655_v17 = vld [vmem:[%s3976_s29 + $0x30] sm:$0xff] }
 0x2df   :  { %676 = vmatpush.msrb.mxu3 %v657_v7 }
 0x2e0   :  { %478 = vmatpush.msrb.mxu0 %v469_v23  ;;  %v654_v23 = vld [vmem:[%s3976_s29 + $0x28] sm:$0xff] }
 0x2e1   :  { %677 = vmatpush.msrb.mxu3 %v656_v14 }
 0x2e2   :  { %479 = vmatpush.msrb.mxu0 %v468_v29  ;;  %v703_v29 = vld [vmem:[%s3977_s8 + $0x58] sm:$0xff] }
 0x2e3   :  { %678 = vmatpush.msrb.mxu3 %v655_v17  ;;  %716 = vmatpush.msrb.mxu1 %v703_v29 }
 0x2e4   :  { %480 = vmatpush.msrb.mxu0 %v467_v44  ;;  %v650_v44 = vld [vmem:[%s3976_s29 + $0x8] sm:$0xff] }
 0x2e5   :  { %679 = vmatpush.msrb.mxu3 %v654_v23  ;;  %717 = vmatpush.msrb.mxu1 %v702_v19 }
 0x2e6   :  { %481 = vmatpush.msrb.mxu0 %v466_v37  ;;  %v750_v37 = vld [vmem:[%s3978_s6 + $0x78] sm:$0xff] }
 0x2e7   :  { %680 = vmatpush.msrb.mxu3 %v653_v27  ;;  %718 = vmatpush.msrb.mxu1 %v701_v39 }
 0x2e8   :  { %482 = vmatpush.msrb.mxu0 %v465_v47  ;;  %v698_v47 = vld [vmem:[%s3977_s8 + $0x30] sm:$0xff] }
 0x2e9   :  { %681 = vmatpush.msrb.mxu3 %v652_v32  ;;  %719 = vmatpush.msrb.mxu1 %v700_v16 }
 0x2ea   :  { %483 = vmatpush.msrb.mxu0 %v464_v20  ;;  %v696_v20 = vld [vmem:[%s3977_s8 + $0x20] sm:$0xff] }
 0x2eb   :  { %682 = vmatpush.msrb.mxu3 %v651_v38  ;;  %720 = vmatpush.msrb.mxu1 %v699_v46 }
 0x2ec   :  { %484 = vmatpush.msrb.mxu0 %v463_v22  ;;  %v695_v22 = vld [vmem:[%s3977_s8 + $0x18] sm:$0xff] }
 0x2ed   :  { %683 = vmatpush.msrb.mxu3 %v650_v44  ;;  %721 = vmatpush.msrb.mxu1 %v698_v47 }
 0x2ee   :  { %485 = vmatpush.msrb.mxu0 %v462_v24  ;;  %v694_v24 = vld [vmem:[%s3977_s8 + $0x10] sm:$0xff] }
 0x2ef   :  { %2432 = vmatmul.msk.f32.vlgmr.msrb.gmra.mxu0 %vm192_vm2, %v2944_v33  ;;  %v2440_v33 = vld [vmem:[%s3970_s30 + $0x20] sm:$0xff]  ;;  %684 = vmatpush.msrb.mxu3 %v649_v45 }
 0x2f0   :  { %560 = vmatpush.msrb.mxu2 %v2440_v33  ;;  %722 = vmatpush.msrb.mxu1 %v697_v49  ;;  %v692_v33 = vld [vmem:[%s3977_s8] sm:$0xff] }
 0x2f1   :  { %755 = vmatpush.msra.mxu3 %v750_v37 }
 0x2f2   :  { %723 = vmatpush.msrb.mxu1 %v696_v20 }
 0x2f3   :  { %756 = vmatpush.msra.mxu3 %v749_v18  ;;  %v2564_v18 = vld [vmem:[%s3926_s16] ss:$0 sm:$0xff] }
 0x2f4   :  { %724 = vmatpush.msrb.mxu1 %v695_v22 }
 0x2f5   :  { %757 = vmatpush.msra.mxu3 %v748_v48 }
 0x2f6   :  { %725 = vmatpush.msrb.mxu1 %v694_v24 }
 0x2f7   :  { %2433 = vmatmul.msk.f32.gmra.mxu0 %vm192_vm2, %v2951_v34  ;;  %758 = vmatpush.msra.mxu3 %v747_v50 }
 0x2f8   :  { %726 = vmatpush.msrb.mxu1 %v693_v28 }
 0x2f9   :  { %759 = vmatpush.msra.mxu3 %v746_v31 }
 0x2fa   :  { %727 = vmatpush.msrb.mxu1 %v692_v33  ;;  %v3408_v33 = vld [vmem:[%s3929_s19] sm:$0xf] }
 0x2fb   :  { %760 = vmatpush.msra.mxu3 %v745_v26 }
 0x2fd   :  { %761 = vmatpush.msra.mxu3 %v744_v30 }
 0x2ff   :  { %2434 = vmatmul.msk.f32.gmra.mxu0 %vm192_vm2, %v2958_v35 }
 0x307   :  { %2435 = vmatmul.msk.f32.gmra.mxu0 %vm192_vm2, %v2965_v36 }
 0x30f   :  { %2436 = vmatmul.msk.f32.gmra.mxu0 %vm192_vm2, %v2981_v40 }
 0x317   :  { %2437 = vmatmul.msk.f32.gmra.mxu0 %vm192_vm2, %v2988_v41 }
 0x31f   :  { %2438 = vmatmul.msk.f32.gmra.mxu0 %vm192_vm2, %v2995_v42 }
 0x327   :  { %2439 = vmatmul.msk.f32.gmra.mxu0 %vm192_vm2, %v3002_v43 }
 0x36c   :  { %v487_v34 = vpop.f32.mrf.mxu0 }
 0x36d   :  { %2445 = vmatmul.msk.f32.vlgmr.msrb.gmra.mxu2 %vm266_vm3, %v487_v34  ;;  %v743_v34 = vld [vmem:[%s3978_s6 + $0x40] sm:$0xff] }
 0x36e   :  { %762 = vmatpush.msra.mxu3 %v743_v34 }
 0x374   :  { %v490_v35 = vpop.f32.mrf.mxu0 }
 0x375   :  { %2446 = vmatmul.msk.f32.gmra.mxu2 %vm266_vm3, %v490_v35  ;;  %v742_v35 = vld [vmem:[%s3978_s6 + $0x38] sm:$0xff] }
 0x376   :  { %763 = vmatpush.msra.mxu3 %v742_v35 }
 0x37c   :  { %v493_v36 = vpop.f32.mrf.mxu0 }
 0x37d   :  { %2447 = vmatmul.msk.f32.gmra.mxu2 %vm266_vm3, %v493_v36  ;;  %v741_v36 = vld [vmem:[%s3978_s6 + $0x30] sm:$0xff] }
 0x37e   :  { %764 = vmatpush.msra.mxu3 %v741_v36 }
 0x384   :  { %v496_v40 = vpop.f32.mrf.mxu0 }
 0x385   :  { %2448 = vmatmul.msk.f32.gmra.mxu2 %vm266_vm3, %v496_v40  ;;  %v740_v40 = vld [vmem:[%s3978_s6 + $0x28] sm:$0xff] }
 0x386   :  { %765 = vmatpush.msra.mxu3 %v740_v40 }
 0x38c   :  { %v499_v41 = vpop.f32.mrf.mxu0 }
 0x38d   :  { %2449 = vmatmul.msk.f32.gmra.mxu2 %vm266_vm3, %v499_v41  ;;  %v739_v41 = vld [vmem:[%s3978_s6 + $0x20] sm:$0xff] }
 0x38e   :  { %766 = vmatpush.msra.mxu3 %v739_v41 }
 0x394   :  { %v502_v42 = vpop.f32.mrf.mxu0 }
 0x395   :  { %2450 = vmatmul.msk.f32.gmra.mxu2 %vm266_vm3, %v502_v42  ;;  %v738_v42 = vld [vmem:[%s3978_s6 + $0x18] sm:$0xff] }
 0x396   :  { %767 = vmatpush.msra.mxu3 %v738_v42 }
 0x39c   :  { %v505_v43 = vpop.f32.mrf.mxu0 }
 0x39d   :  { %2451 = vmatmul.msk.f32.gmra.mxu2 %vm266_vm3, %v505_v43  ;;  %v737_v43 = vld [vmem:[%s3978_s6 + $0x10] sm:$0xff] }
 0x39e   :  { %768 = vmatpush.msra.mxu3 %v737_v43 }
 0x3a4   :  { %v508_v10 = vpop.f32.mrf.mxu0 }
 0x3a5   :  { %2452 = vmatmul.msk.f32.gmra.mxu2 %vm266_vm3, %v508_v10  ;;  %v736_v10 = vld [vmem:[%s3978_s6 + $0x8] sm:$0xff] }
 0x3a6   :  { %769 = vmatpush.msra.mxu3 %v736_v10 }
 0x3f0   :  { %v562_v11 = vpop.f32.mrf.mxu2 }
 0x3f1   :  { %v563_v12 = vadd.f32 %v2561_v3, %v562_v11 }
 0x3f3   :  { %636 = vrot.lane.b32.xlu1 %v563_v12, %s2679_s9 }
 0x3f8   :  { %v565_v8 = vpop.f32.mrf.mxu2 }
 0x3f9   :  { %v566_v59 = vadd.f32 %v2561_v3, %v565_v8 }
 0x400   :  { %v568_v51 = vpop.f32.mrf.mxu2 }
 0x401   :  { %v569_v5 = vadd.f32 %v2561_v3, %v568_v51 }
 0x408   :  { %v571_v52 = vpop.f32.mrf.mxu2 }
 0x409   :  { %v572_v53 = vadd.f32 %v2561_v3, %v571_v52 }
 0x40b   :  { %630 = vrot.lane.b32.xlu2 %v572_v53, %s3949_s3 }
 0x410   :  { %v574_v58 = vpop.f32.mrf.mxu2 }
 0x411   :  { %v3146_v60 = vadd.f32 %v2561_v3, %v574_v58 }
 0x413   :  { %638 = vrot.lane.b32.xlu2 %v566_v59, %s2679_s9 }
 0x418   :  { %v577_v0 = vpop.f32.mrf.mxu2 }
 0x419   :  { %v3158_v1 = vadd.f32 %v2561_v3, %v577_v0  ;;  %v3340_v0 = vpop.f32.mrf.mxu1 }
 0x420   :  { %v580_v2 = vpop.f32.mrf.mxu2 }
 0x421   :  { %v581_v9 = vadd.f32 %v2561_v3, %v580_v2 }
 0x423   :  { %620 = vrot.lane.b32.xlu0 %v581_v9, %s3951_s7 }
 0x428   :  { %v583_v4 = vpop.f32.mrf.mxu2 }
 0x429   :  { %v584_v6 = vadd.f32 %v2561_v3, %v583_v4  ;;  %v735_v3 = vld [vmem:[%s3978_s6] sm:$0xff] }
 0x42a   :  { %770 = vmatpush.msra.mxu3 %v735_v3  ;;  %v2563_v4 = vld [vmem:[%s3924_s14] ss:$0 sm:$0xff] }
 0x42b   :  { %628 = vrot.lane.b32.xlu0 %v569_v5, %s3949_s3  ;;  %622 = vrot.lane.b32.xlu1 %v584_v6, %s3951_s7  ;;  %s2684_s7 = smov 8  }
 0x465   :  { %v637_v12 = vpop.permute.xlu1 %636  ;;  %v631_v8 = vpop.permute.xlu2 %630 }
 0x46d   :  { %v639_v58 = vpop.permute.xlu2 %638 }
 0x495   :  { %v621_v11 = vpop.permute.xlu0 %620 }
 0x496   :  { %v642_v51 = vsel %vm266_vm3, %v3146_v60, %v621_v11  ;;  %v3307_v60 = vld [vmem:[%s3928_s18 + $0x18] sm:$0xff]  ;;  %s3979_s18 = smov 32  }
 0x497   :  { %803 = vmatpush.msra.mxu1 %v3307_v60  ;;  %922 = vmatpush.msra.mxu2 %v3307_v60 }
 0x498   :  { %883 = vmatpush.msra.mxu0 %v3307_v60 }
 0x499   :  { %804 = vmatpush.msra.mxu1 %v3314_v61  ;;  %923 = vmatpush.msra.mxu2 %v3314_v61 }
 0x49a   :  { %884 = vmatpush.msra.mxu0 %v3314_v61 }
 0x49b   :  { %805 = vmatpush.msra.mxu1 %v3323_v62  ;;  %924 = vmatpush.msra.mxu2 %v3323_v62 }
 0x49c   :  { %885 = vmatpush.msra.mxu0 %v3323_v62 }
 0x49d   :  { %v629_v52 = vpop.permute.xlu0 %628  ;;  %v623_v54 = vpop.permute.xlu1 %622  ;;  %806 = vmatpush.msra.mxu1 %v3332_v63  ;;  %925 = vmatpush.msra.mxu2 %v3332_v63 }
 0x49e   :  { %v644_v53 = vsel %vm192_vm2, %v642_v51, %v629_v52  ;;  %v643_v56 = vsel %vm266_vm3, %v3158_v1, %v623_v54  ;;  %886 = vmatpush.msra.mxu0 %v3332_v63  ;;  %v2562_v1 = vld [vmem:[%s3925_s15] ss:$0 sm:$0xff] }
 0x49f   :  { %v3290_v55 = vsel %vm646_vm4, %v644_v53, %v637_v12  ;;  %v645_v57 = vsel %vm192_vm2, %v643_v56, %v631_v8  ;;  %2476 = vmatpush.msk.msrb.mxu2 %vm139_vm0, %v3408_v33 }
 0x4a0   :  { %685 = vmatmul.f32.vlgmr.msrb.gmra.mxu3 %v3290_v55  ;;  %728 = vmatmul.f32.vlgmr.msrb.gmra.mxu1 %v3290_v55  ;;  %v3298_v59 = vsel %vm646_vm4, %v645_v57, %v639_v58 }
 0x4a1   :  { %844 = vmatpush.msrb.mxu3 %v3307_v60  ;;  %2467 = vmatpush.msk.msrb.mxu1 %vm139_vm0, %v3408_v33 }
 0x4a2   :  { %2473 = vmatpush.msk.msrb.mxu0 %vm139_vm0, %v3408_v33 }
 0x4a3   :  { %845 = vmatpush.msrb.mxu3 %v3314_v61 }
 0x4a5   :  { %846 = vmatpush.msrb.mxu3 %v3323_v62 }
 0x4a7   :  { %847 = vmatpush.msrb.mxu3 %v3332_v63 }
 0x4a8   :  { %688 = vmatmul.f32.gmra.mxu3 %v3298_v59  ;;  %731 = vmatmul.f32.gmra.mxu1 %v3298_v59 }
 0x4b0   :  { %771 = vmatmul.f32.vlgmr.msra.gmra.mxu3 %v3290_v55 }
 0x4b1   :  { %2470 = vmatpush.msk.msra.mxu3 %vm139_vm0, %v3408_v33 }
 0x4b8   :  { %774 = vmatmul.f32.gmra.mxu3 %v3298_v59 }
 0x51d   :  { %v729_v2 = vpop.f32.mrf.mxu1 }
 0x51e   :  { %v730_v9 = vadd.f32 %v2562_v1, %v729_v2 }
 0x520   :  { %818 = vrot.lane.b32.xlu0 %v730_v9, %s2679_s9  ;;  %896 = vrot.lane.b32.xlu1 %v730_v9, %s3979_s18 }
 0x523   :  { %v686_v5 = vpop.f32.mrf.mxu3 }
 0x524   :  { %v687_v6 = vadd.f32 %v2563_v4, %v686_v5 }
 0x525   :  { %v732_v7 = vpop.f32.mrf.mxu1 }
 0x526   :  { %v783_v13 = vmul.f32 %v730_v9, %v687_v6  ;;  %v733_v14 = vadd.f32 %v2562_v1, %v732_v7 }
 0x528   :  { %857 = vrot.lane.b32.xlu0 %v730_v9, %s3980_s5  ;;  %2459 = vmatmul.msk.f32.vlgmr.msra.gmra.mxu1 %vm266_vm3, %v783_v13 }
 0x529   :  { %898 = vrot.lane.b32.xlu1 %v733_v14, %s3979_s18  ;;  %820 = vrot.lane.b32.xlu2 %v733_v14, %s2679_s9 }
 0x52a   :  { %1154 = vmatpush.msra.mxu1 %v3307_v60 }
 0x52b   :  { %v689_v15 = vpop.f32.mrf.mxu3 }
 0x52c   :  { %v690_v17 = vadd.f32 %v2563_v4, %v689_v15  ;;  %1155 = vmatpush.msra.mxu1 %v3314_v61 }
 0x52e   :  { %v784_v21 = vmul.f32 %v733_v14, %v690_v17  ;;  %1156 = vmatpush.msra.mxu1 %v3323_v62 }
 0x530   :  { %1167 = vrot.lane.b32.xlu0 %v783_v13, %s2679_s9  ;;  %2460 = vmatmul.msk.f32.gmra.mxu1 %vm266_vm3, %v784_v21 }
 0x531   :  { %859 = vrot.lane.b32.xlu2 %v733_v14, %s3980_s5  ;;  %1157 = vmatpush.msra.mxu1 %v3332_v63 }
 0x533   :  { %v772_v46 = vpop.f32.mrf.mxu3 }
 0x534   :  { %v3386_v47 = vadd.f32 %v2564_v18, %v772_v46 }
 0x538   :  { %1169 = vrot.lane.b32.xlu0 %v784_v21, %s2679_s9 }
 0x53b   :  { %v775_v48 = vpop.f32.mrf.mxu3 }
 0x53c   :  { %v3392_v49 = vadd.f32 %v2564_v18, %v775_v48 }
 0x583   :  { %v821_v23 = vpop.permute.xlu2 %820 }
 0x584   :  { %v825_v16 = vmul.f32 %v821_v23, %v690_v17 }
 0x58b   :  { %v860_v19 = vpop.permute.xlu2 %859 }
 0x58c   :  { %v864_v45 = vmul.f32 %v860_v19, %v690_v17 }
 0x592   :  { %v819_v25 = vpop.permute.xlu0 %818  ;;  %v897_v27 = vpop.permute.xlu1 %896 }
 0x593   :  { %v824_v29 = vmul.f32 %v819_v25, %v687_v6  ;;  %v902_v32 = vmul.f32 %v897_v27, %v687_v6 }
 0x595   :  { %2461 = vmatmul.msk.f32.vlgmr.msrb.gmra.mxu3 %vm266_vm3, %v824_v29  ;;  %1134 = vrot.lane.b32.xlu2 %v902_v32, %s2679_s9 }
 0x596   :  { %2465 = vmatmul.msk.f32.vlgmr.msra.gmra.mxu2 %vm266_vm3, %v902_v32  ;;  %1187 = vmatpush.msrb.mxu3 %v3307_v60 }
 0x597   :  { %1253 = vmatpush.msra.mxu2 %v3307_v60 }
 0x598   :  { %1188 = vmatpush.msrb.mxu3 %v3314_v61 }
 0x599   :  { %1254 = vmatpush.msra.mxu2 %v3314_v61 }
 0x59a   :  { %v858_v38 = vpop.permute.xlu0 %857  ;;  %1189 = vmatpush.msrb.mxu3 %v3323_v62 }
 0x59b   :  { %v863_v39 = vmul.f32 %v858_v38, %v687_v6  ;;  %v899_v44 = vpop.permute.xlu1 %898  ;;  %1255 = vmatpush.msra.mxu2 %v3323_v62 }
 0x59c   :  { %v903_v37 = vmul.f32 %v899_v44, %v690_v17  ;;  %1190 = vmatpush.msrb.mxu3 %v3332_v63 }
 0x59d   :  { %2463 = vmatmul.msk.f32.vlgmr.msra.gmra.mxu0 %vm266_vm3, %v863_v39  ;;  %1233 = vrot.lane.b32.xlu1 %v863_v39, %s2679_s9 }
 0x59e   :  { %2462 = vmatmul.msk.f32.gmra.mxu3 %vm266_vm3, %v825_v16  ;;  %1235 = vrot.lane.b32.xlu2 %v864_v45, %s2679_s9 }
 0x59f   :  { %1136 = vrot.lane.b32.xlu0 %v903_v37, %s2679_s9  ;;  %2466 = vmatmul.msk.f32.gmra.mxu2 %vm266_vm3, %v903_v37 }
 0x5a0   :  { %1220 = vmatpush.msra.mxu0 %v3307_v60  ;;  %1256 = vmatpush.msra.mxu2 %v3332_v63 }
 0x5a2   :  { %1221 = vmatpush.msra.mxu0 %v3314_v61 }
 0x5a4   :  { %1222 = vmatpush.msra.mxu0 %v3323_v62 }
 0x5a5   :  { %1200 = vrot.lane.b32.xlu1 %v824_v29, %s2679_s9  ;;  %2464 = vmatmul.msk.f32.gmra.mxu0 %vm266_vm3, %v864_v45  ;;  %v808_v20 = vpop.f32.mrf.mxu1 }
 0x5a6   :  { %1475 = vrot.lane.b32.xlu2 %v902_v32, %s3980_s5  ;;  %v814_v22 = vmul.f32 0.35355338, %v808_v20  ;;  %1223 = vmatpush.msra.mxu0 %v3332_v63 }
 0x5a7   :  { %1541 = vrot.lane.b32.xlu0 %v824_v29, %s3980_s5 }
 0x5ad   :  { %1202 = vrot.lane.b32.xlu1 %v825_v16, %s2679_s9  ;;  %v811_v36 = vpop.f32.mrf.mxu1 }
 0x5ae   :  { %1477 = vrot.lane.b32.xlu2 %v903_v37, %s3980_s5  ;;  %v815_v11 = vmul.f32 0.35355338, %v811_v36 }
 0x5af   :  { %1508 = vrot.lane.b32.xlu0 %v783_v13, %s3980_s5 }
 0x5b5   :  { %1442 = vrot.lane.b32.xlu1 %v863_v39, %s3980_s5 }
 0x5b6   :  { %1444 = vrot.lane.b32.xlu2 %v864_v45, %s3980_s5 }
 0x5b7   :  { %1510 = vrot.lane.b32.xlu0 %v784_v21, %s3980_s5 }
 0x5bd   :  { %1543 = vrot.lane.b32.xlu1 %v825_v16, %s3980_s5 }
 0x5be   :  { %1849 = vrot.lane.b32.xlu2 %v783_v13, %s3979_s18 }
 0x5bf   :  { %1750 = vrot.lane.b32.xlu0 %v824_v29, %s3979_s18 }
 0x5c5   :  { %1783 = vrot.lane.b32.xlu1 %v863_v39, %s3979_s18 }
 0x5c6   :  { %1816 = vrot.lane.b32.xlu2 %v902_v32, %s3979_s18 }
 0x5c7   :  { %1851 = vrot.lane.b32.xlu0 %v784_v21, %s3979_s18 }
 0x5cd   :  { %1785 = vrot.lane.b32.xlu1 %v864_v45, %s3979_s18 }
 0x5ce   :  { %1818 = vrot.lane.b32.xlu2 %v903_v37, %s3979_s18 }
 0x5cf   :  { %1042 = vrot.lane.b32.xlu0 %v3386_v47, %s2679_s9 }
 0x5d5   :  { %1752 = vrot.lane.b32.xlu1 %v825_v16, %s3979_s18 }
 0x5d6   :  { %1124 = vrot.lane.b32.xlu2 %v3386_v47, %s3979_s18 }
 0x5d7   :  { %1044 = vrot.lane.b32.xlu0 %v3392_v49, %s2679_s9 }
 0x5dd   :  { %1083 = vrot.lane.b32.xlu1 %v3386_v47, %s3980_s5 }
 0x5de   :  { %1126 = vrot.lane.b32.xlu2 %v3392_v49, %s3979_s18 }
 0x5e5   :  { %1085 = vrot.lane.b32.xlu1 %v3392_v49, %s3980_s5 }
 0x5ef   :  { %v1135_v36 = vpop.permute.xlu2 %1134 }
 0x618   :  { %v849_v50 = vpop.f32.mrf.mxu3 }
 0x619   :  { %v855_v31 = vmul.f32 0.35355338, %v849_v50  ;;  %v927_v24 = vpop.f32.mrf.mxu2 }
 0x61a   :  { %v888_v26 = vpop.f32.mrf.mxu0  ;;  %v933_v34 = vmul.f32 0.35355338, %v927_v24 }
 0x61b   :  { %v935_v28 = vmax.f32 %v814_v22, %v855_v31  ;;  %v894_v30 = vmul.f32 0.35355338, %v888_v26  ;;  %v1168_v26 = vpop.permute.xlu0 %1167 }
 0x61d   :  { %v937_v35 = vmax.f32 %v935_v28, %v894_v30 }
 0x61f   :  { %v939_v40 = vmax.f32 %v937_v35, %v933_v34 }
 0x621   :  { %v941_v41 = vsub.f32 %v814_v22, %v939_v40  ;;  %v947_v42 = vsub.f32 %v855_v31, %v939_v40  ;;  %v953_v43 = vsub.f32 %v894_v30, %v939_v40  ;;  %v959_v10 = vsub.f32 %v933_v34, %v939_v40  ;;  %v852_v3 = vpop.f32.mrf.mxu3  ;;  %v1234_v31 = vpop.permute.xlu1 %1233 }
 0x622   :  { %v856_v12 = vmul.f32 0.35355338, %v852_v3  ;;  %v891_v8 = vpop.f32.mrf.mxu0  ;;  %v930_v53 = vpop.f32.mrf.mxu2 }
 0x623   :  { %v943_v51 = vmul.f32 1.442695, %v941_v41  ;;  %v949_v52 = vmul.f32 1.442695, %v947_v42  ;;  %v955_v54 = vmul.f32 1.442695, %v953_v43  ;;  %v1170_v41 = vpop.permute.xlu0 %1169  ;;  %v1236_v43 = vpop.permute.xlu2 %1235 }
 0x624   :  { %v936_v56 = vmax.f32 %v815_v11, %v856_v12  ;;  %v895_v57 = vmul.f32 0.35355338, %v891_v8  ;;  %v961_v58 = vmul.f32 1.442695, %v959_v10  ;;  %v934_v1 = vmul.f32 0.35355338, %v930_v53 }
 0x625   :  { %2569 = vpow2.f32 %v943_v51 }
 0x626   :  { %2571 = vpow2.f32 %v949_v52  ;;  %v938_v2 = vmax.f32 %v936_v56, %v895_v57 }
 0x627   :  { %2573 = vpow2.f32 %v955_v54 }
 0x628   :  { %v940_v9 = vmax.f32 %v938_v2, %v934_v1  ;;  %2575 = vpow2.f32 %v961_v58 }
 0x629   :  { %v1201_v40 = vpop.permute.xlu1 %1200 }
 0x62a   :  { %v942_v4 = vsub.f32 %v815_v11, %v940_v9  ;;  %v948_v5 = vsub.f32 %v856_v12, %v940_v9  ;;  %v954_v6 = vsub.f32 %v895_v57, %v940_v9  ;;  %v960_v7 = vsub.f32 %v934_v1, %v940_v9 }
 0x62b   :  { %v2570_v13 = vpop.eup %2569  ;;  %v1137_v42 = vpop.permute.xlu0 %1136 }
 0x62c   :  { %v2572_v14 = vpop.eup %2571  ;;  %v945_v15 = vmul.f32 1.442695, %v942_v4  ;;  %v951_v17 = vmul.f32 1.442695, %v948_v5  ;;  %v957_v23 = vmul.f32 1.442695, %v954_v6  ;;  %v3474_v3 = vpop.permute.xlu2 %1475 }
 0x62d   :  { %v965_v21 = vadd.f32 %v2572_v14, %v2570_v13  ;;  %v2574_v25 = vpop.eup %2573  ;;  %v963_v27 = vmul.f32 1.442695, %v960_v7 }
 0x62e   :  { %2577 = vpow2.f32 %v945_v15  ;;  %v2576_v29 = vpop.eup %2575 }
 0x62f   :  { %v967_v32 = vadd.f32 %v2574_v25, %v965_v21  ;;  %2579 = vpow2.f32 %v951_v17 }
 0x630   :  { %2581 = vpow2.f32 %v957_v23 }
 0x631   :  { %v969_v19 = vadd.f32 %v2576_v29, %v967_v32  ;;  %2583 = vpow2.f32 %v963_v27  ;;  %v1203_v10 = vpop.permute.xlu1 %1202 }
 0x633   :  { %2585 = vrcp.f32 %v969_v19  ;;  %v3476_v11 = vpop.permute.xlu0 %1541 }
 0x634   :  { %v2578_v38 = vpop.eup %2577  ;;  %v3480_v8 = vpop.permute.xlu2 %1477 }
 0x635   :  { %v2580_v39 = vpop.eup %2579 }
 0x636   :  { %v966_v44 = vadd.f32 %v2580_v39, %v2578_v38  ;;  %v2582_v16 = vpop.eup %2581 }
 0x637   :  { %v2584_v45 = vpop.eup %2583 }
 0x638   :  { %v968_v37 = vadd.f32 %v2582_v16, %v966_v44 }
 0x639   :  { %v2586_v46 = vpop.eup %2585  ;;  %v3478_v12 = vpop.permute.xlu1 %1442 }
 0x63a   :  { %v1052_v18 = vmul.f32 %v2586_v46, %v2574_v25  ;;  %v970_v48 = vadd.f32 %v2584_v45, %v968_v37  ;;  %v973_v20 = vmul.f32 %v2586_v46, %v2570_v13  ;;  %v1009_v50 = vmul.f32 %v2586_v46, %v2572_v14 }
 0x63b   :  { %v1093_v22 = vmul.f32 %v2586_v46, %v2576_v29  ;;  %v3482_v51 = vpop.permute.xlu0 %1508 }
 0x63c   :  { %2587 = vrcp.f32 %v970_v48  ;;  %2468 = vmatmul.msk.f32.vlgmr.msrb.gmra.mxu1 %vm114_vm1, %v973_v20  ;;  %2471 = vmatmul.msk.f32.vlgmr.msra.gmra.mxu3 %vm114_vm1, %v1009_v50  ;;  %v3486_v53 = vpop.permute.xlu2 %1444 }
 0x63d   :  { %2474 = vmatmul.msk.f32.vlgmr.msrb.gmra.mxu0 %vm114_vm1, %v1052_v18  ;;  %2477 = vmatmul.msk.f32.vlgmr.msrb.gmra.mxu2 %vm114_vm1, %v1093_v22 }
 0x63e   :  { %2487 = vmatpush.msk.msrb.mxu1 %vm139_vm0, %v3408_v33  ;;  %2490 = vmatpush.msk.msra.mxu3 %vm139_vm0, %v3408_v33 }
 0x63f   :  { %2493 = vmatpush.msk.msrb.mxu0 %vm139_vm0, %v3408_v33  ;;  %2496 = vmatpush.msk.msrb.mxu2 %vm139_vm0, %v3408_v33 }
 0x641   :  { %v3484_v52 = vpop.permute.xlu1 %1543 }
 0x642   :  { %v2588_v24 = vpop.eup %2587 }
 0x643   :  { %v974_v28 = vmul.f32 %v2588_v24, %v2578_v38  ;;  %v1010_v30 = vmul.f32 %v2588_v24, %v2580_v39  ;;  %v1053_v34 = vmul.f32 %v2588_v24, %v2582_v16  ;;  %v1094_v35 = vmul.f32 %v2588_v24, %v2584_v45  ;;  %v3488_v54 = vpop.permute.xlu0 %1510 }
 0x644   :  { %v3492_v57 = vpop.permute.xlu2 %1849 }
 0x645   :  { %2469 = vmatmul.msk.f32.gmra.mxu1 %vm114_vm1, %v974_v28  ;;  %2472 = vmatmul.msk.f32.gmra.mxu3 %vm114_vm1, %v1010_v30 }
 0x646   :  { %2475 = vmatmul.msk.f32.gmra.mxu0 %vm114_vm1, %v1053_v34  ;;  %2478 = vmatmul.msk.f32.gmra.mxu2 %vm114_vm1, %v1094_v35 }
 0x649   :  { %v3490_v56 = vpop.permute.xlu1 %1783 }
 0x64b   :  { %v3494_v58 = vpop.permute.xlu0 %1750 }
 0x64c   :  { %v3498_v2 = vpop.permute.xlu2 %1816 }
 0x64d   :  { %2479 = vmatmul.msk.f32.vlgmr.msra.gmra.mxu1 %vm266_vm3, %v1135_v36  ;;  %2481 = vmatmul.msk.f32.vlgmr.msrb.gmra.mxu3 %vm266_vm3, %v1168_v26 }
 0x64e   :  { %2483 = vmatmul.msk.f32.vlgmr.msra.gmra.mxu0 %vm266_vm3, %v1201_v40  ;;  %2485 = vmatmul.msk.f32.vlgmr.msra.gmra.mxu2 %vm266_vm3, %v1234_v31 }
 0x64f   :  { %1462 = vmatpush.msra.mxu1 %v3307_v60  ;;  %1495 = vmatpush.msrb.mxu3 %v3307_v60 }
 0x650   :  { %1528 = vmatpush.msra.mxu0 %v3307_v60  ;;  %1561 = vmatpush.msra.mxu2 %v3307_v60 }
 0x651   :  { %1463 = vmatpush.msra.mxu1 %v3314_v61  ;;  %1496 = vmatpush.msrb.mxu3 %v3314_v61  ;;  %v3496_v1 = vpop.permute.xlu1 %1785 }
 0x652   :  { %1529 = vmatpush.msra.mxu0 %v3314_v61  ;;  %1562 = vmatpush.msra.mxu2 %v3314_v61 }
 0x653   :  { %1464 = vmatpush.msra.mxu1 %v3323_v62  ;;  %1497 = vmatpush.msrb.mxu3 %v3323_v62  ;;  %v3500_v9 = vpop.permute.xlu0 %1851 }
 0x654   :  { %1530 = vmatpush.msra.mxu0 %v3323_v62  ;;  %1563 = vmatpush.msra.mxu2 %v3323_v62  ;;  %v3504_v5 = vpop.permute.xlu2 %1818 }
 0x655   :  { %2480 = vmatmul.msk.f32.gmra.mxu1 %vm266_vm3, %v1137_v42  ;;  %2482 = vmatmul.msk.f32.gmra.mxu3 %vm266_vm3, %v1170_v41 }
 0x656   :  { %2484 = vmatmul.msk.f32.gmra.mxu0 %vm266_vm3, %v1203_v10  ;;  %2486 = vmatmul.msk.f32.gmra.mxu2 %vm266_vm3, %v1236_v43 }
 0x657   :  { %1465 = vmatpush.msra.mxu1 %v3332_v63  ;;  %1498 = vmatpush.msrb.mxu3 %v3332_v63 }
 0x658   :  { %1531 = vmatpush.msra.mxu0 %v3332_v63  ;;  %1564 = vmatpush.msra.mxu2 %v3332_v63 }
 0x659   :  { %v3502_v4 = vpop.permute.xlu1 %1752 }
 0x65b   :  { %v3506_v13 = vpop.permute.xlu0 %1042 }
 0x65c   :  { %v3512_v25 = vpop.permute.xlu2 %1124 }
 0x661   :  { %v3508_v15 = vpop.permute.xlu1 %1083 }
 0x663   :  { %v3518_v16 = vpop.permute.xlu0 %1044 }
 0x664   :  { %v3525_v22 = vpop.permute.xlu2 %1126 }
 0x669   :  { %v3522_v48 = vpop.permute.xlu1 %1085 }
 0x6b9   :  { %v1001_v6 = vpop.f32.mrf.mxu1 }
 0x6ba   :  { %v1077_v7 = vpop.f32.mrf.mxu0  ;;  %v1007_v17 = vmul.f32 %v1001_v6, %v3386_v47 }
 0x6bb   :  { %v1089_v27 = vmul.f32 %v3508_v15, %v1077_v7 }
 0x6bf   :  { %v1034_v14 = vpop.f32.mrf.mxu3 }
 0x6c0   :  { %v1048_v21 = vmul.f32 %v3506_v13, %v1034_v14  ;;  %v1118_v23 = vpop.f32.mrf.mxu2 }
 0x6c1   :  { %v1130_v38 = vmul.f32 %v3512_v25, %v1118_v23 }
 0x6c2   :  { %v1050_v29 = vadd.f32 %v1048_v21, %v1007_v17  ;;  %v1004_v32 = vpop.f32.mrf.mxu1 }
 0x6c3   :  { %v1080_v39 = vpop.f32.mrf.mxu0  ;;  %v1008_v37 = vmul.f32 %v1004_v32, %v3392_v49 }
 0x6c4   :  { %v1091_v19 = vadd.f32 %v1089_v27, %v1050_v29  ;;  %v1090_v20 = vmul.f32 %v3522_v48, %v1080_v39 }
 0x6c6   :  { %v3516_v44 = vadd.f32 %v1130_v38, %v1091_v19 }
 0x6c8   :  { %v1037_v45 = vpop.f32.mrf.mxu3 }
 0x6c9   :  { %v1049_v46 = vmul.f32 %v3518_v16, %v1037_v45  ;;  %v1121_v18 = vpop.f32.mrf.mxu2 }
 0x6ca   :  { %v1131_v24 = vmul.f32 %v3525_v22, %v1121_v18  ;;  %v1159_v26 = vpop.f32.mrf.mxu1 }
 0x6cb   :  { %v1051_v50 = vadd.f32 %v1049_v46, %v1008_v37  ;;  %v1225_v30 = vpop.f32.mrf.mxu0  ;;  %v1165_v35 = vmul.f32 0.35355338, %v1159_v26 }
 0x6cc   :  { %v1231_v41 = vmul.f32 0.35355338, %v1225_v30 }
 0x6cd   :  { %v1092_v31 = vadd.f32 %v1090_v20, %v1051_v50 }
 0x6cf   :  { %v3528_v28 = vadd.f32 %v1131_v24, %v1092_v31 }
 0x6d0   :  { %v1192_v34 = vpop.f32.mrf.mxu3 }
 0x6d1   :  { %v1198_v36 = vmul.f32 0.35355338, %v1192_v34  ;;  %v1258_v40 = vpop.f32.mrf.mxu2 }
 0x6d2   :  { %v1264_v43 = vmul.f32 0.35355338, %v1258_v40  ;;  %v1162_v7 = vpop.f32.mrf.mxu1 }
 0x6d3   :  { %v1266_v42 = vmax.f32 %v1165_v35, %v1198_v36  ;;  %v1228_v29 = vpop.f32.mrf.mxu0  ;;  %v1166_v32 = vmul.f32 0.35355338, %v1162_v7 }
 0x6d4   :  { %v1232_v46 = vmul.f32 0.35355338, %v1228_v29 }
 0x6d5   :  { %v1268_v10 = vmax.f32 %v1266_v42, %v1231_v41 }
 0x6d7   :  { %v1270_v6 = vmax.f32 %v1268_v10, %v1264_v43 }
 0x6d8   :  { %v1195_v14 = vpop.f32.mrf.mxu3 }
 0x6d9   :  { %v1272_v17 = vsub.f32 %v1165_v35, %v1270_v6  ;;  %v1278_v21 = vsub.f32 %v1198_v36, %v1270_v6  ;;  %v1284_v23 = vsub.f32 %v1231_v41, %v1270_v6  ;;  %v1290_v27 = vsub.f32 %v1264_v43, %v1270_v6  ;;  %v1261_v45 = vpop.f32.mrf.mxu2 }
 0x6da   :  { %v1199_v19 = vmul.f32 0.35355338, %v1195_v14  ;;  %v1265_v50 = vmul.f32 0.35355338, %v1261_v45 }
 0x6db   :  { %v1274_v38 = vmul.f32 1.442695, %v1272_v17  ;;  %v1280_v39 = vmul.f32 1.442695, %v1278_v21  ;;  %v1286_v37 = vmul.f32 1.442695, %v1284_v23 }
 0x6dc   :  { %v1267_v18 = vmax.f32 %v1166_v32, %v1199_v19  ;;  %v1292_v20 = vmul.f32 1.442695, %v1290_v27 }
 0x6dd   :  { %2589 = vpow2.f32 %v1274_v38 }
 0x6de   :  { %2591 = vpow2.f32 %v1280_v39  ;;  %v1269_v31 = vmax.f32 %v1267_v18, %v1232_v46 }
 0x6df   :  { %2593 = vpow2.f32 %v1286_v37 }
 0x6e0   :  { %v1271_v24 = vmax.f32 %v1269_v31, %v1265_v50  ;;  %2595 = vpow2.f32 %v1292_v20 }
 0x6e2   :  { %v1273_v26 = vsub.f32 %v1166_v32, %v1271_v24  ;;  %v1279_v30 = vsub.f32 %v1199_v19, %v1271_v24  ;;  %v1285_v34 = vsub.f32 %v1232_v46, %v1271_v24  ;;  %v1291_v35 = vsub.f32 %v1265_v50, %v1271_v24 }
 0x6e3   :  { %v2590_v36 = vpop.eup %2589 }
 0x6e4   :  { %v2592_v40 = vpop.eup %2591  ;;  %v1276_v41 = vmul.f32 1.442695, %v1273_v26  ;;  %v1282_v42 = vmul.f32 1.442695, %v1279_v30  ;;  %v1288_v10 = vmul.f32 1.442695, %v1285_v34 }
 0x6e5   :  { %v1296_v43 = vadd.f32 %v2592_v40, %v2590_v36  ;;  %v2594_v6 = vpop.eup %2593  ;;  %v1294_v7 = vmul.f32 1.442695, %v1291_v35 }
 0x6e6   :  { %2597 = vpow2.f32 %v1276_v41  ;;  %v2596_v14 = vpop.eup %2595 }
 0x6e7   :  { %v1298_v17 = vadd.f32 %v2594_v6, %v1296_v43  ;;  %2599 = vpow2.f32 %v1282_v42 }
 0x6e8   :  { %2601 = vpow2.f32 %v1288_v10 }
 0x6e9   :  { %v1300_v21 = vadd.f32 %v2596_v14, %v1298_v17  ;;  %2603 = vpow2.f32 %v1294_v7 }
 0x6eb   :  { %2605 = vrcp.f32 %v1300_v21 }
 0x6ec   :  { %v2598_v23 = vpop.eup %2597 }
 0x6ed   :  { %v2600_v27 = vpop.eup %2599 }
 0x6ee   :  { %v1297_v29 = vadd.f32 %v2600_v27, %v2598_v23  ;;  %v2602_v32 = vpop.eup %2601 }
 0x6ef   :  { %v2604_v19 = vpop.eup %2603 }
 0x6f0   :  { %v1299_v38 = vadd.f32 %v2602_v32, %v1297_v29 }
 0x6f1   :  { %v2606_v39 = vpop.eup %2605 }
 0x6f2   :  { %v1407_v45 = vmul.f32 %v2606_v39, %v2596_v14  ;;  %v1301_v37 = vadd.f32 %v2604_v19, %v1299_v38  ;;  %v1304_v46 = vmul.f32 %v2606_v39, %v2590_v36  ;;  %v1337_v18 = vmul.f32 %v2606_v39, %v2592_v40 }
 0x6f3   :  { %v1372_v20 = vmul.f32 %v2606_v39, %v2594_v6 }
 0x6f4   :  { %2607 = vrcp.f32 %v1301_v37  ;;  %2488 = vmatmul.msk.f32.vlgmr.msrb.gmra.mxu1 %vm114_vm1, %v1304_v46  ;;  %2491 = vmatmul.msk.f32.vlgmr.msra.gmra.mxu3 %vm114_vm1, %v1337_v18 }
 0x6f5   :  { %2494 = vmatmul.msk.f32.vlgmr.msrb.gmra.mxu0 %vm114_vm1, %v1372_v20  ;;  %2497 = vmatmul.msk.f32.vlgmr.msrb.gmra.mxu2 %vm114_vm1, %v1407_v45 }
 0x6f6   :  { %2507 = vmatpush.msk.msrb.mxu1 %vm139_vm0, %v3408_v33  ;;  %2510 = vmatpush.msk.msra.mxu3 %vm139_vm0, %v3408_v33 }
 0x6f7   :  { %2513 = vmatpush.msk.msrb.mxu0 %vm139_vm0, %v3408_v33  ;;  %2516 = vmatpush.msk.msrb.mxu2 %vm139_vm0, %v3408_v33 }
 0x6fa   :  { %v2608_v50 = vpop.eup %2607 }
 0x6fb   :  { %v1305_v31 = vmul.f32 %v2608_v50, %v2598_v23  ;;  %v1338_v24 = vmul.f32 %v2608_v50, %v2600_v27  ;;  %v1373_v26 = vmul.f32 %v2608_v50, %v2602_v32  ;;  %v1408_v30 = vmul.f32 %v2608_v50, %v2604_v19 }
 0x6fd   :  { %2489 = vmatmul.msk.f32.gmra.mxu1 %vm114_vm1, %v1305_v31  ;;  %2492 = vmatmul.msk.f32.gmra.mxu3 %vm114_vm1, %v1338_v24 }
 0x6fe   :  { %2495 = vmatmul.msk.f32.gmra.mxu0 %vm114_vm1, %v1373_v26  ;;  %2498 = vmatmul.msk.f32.gmra.mxu2 %vm114_vm1, %v1408_v30 }
 0x705   :  { %2499 = vmatmul.msk.f32.vlgmr.msra.gmra.mxu1 %vm266_vm3, %v3478_v12  ;;  %2501 = vmatmul.msk.f32.vlgmr.msrb.gmra.mxu3 %vm266_vm3, %v3474_v3 }
 0x706   :  { %2503 = vmatmul.msk.f32.vlgmr.msra.gmra.mxu0 %vm266_vm3, %v3482_v51  ;;  %2505 = vmatmul.msk.f32.vlgmr.msra.gmra.mxu2 %vm266_vm3, %v3476_v11 }
 0x707   :  { %1770 = vmatpush.msra.mxu1 %v3307_v60  ;;  %1803 = vmatpush.msrb.mxu3 %v3307_v60 }
 0x708   :  { %1836 = vmatpush.msra.mxu0 %v3307_v60  ;;  %1869 = vmatpush.msra.mxu2 %v3307_v60 }
 0x709   :  { %1771 = vmatpush.msra.mxu1 %v3314_v61  ;;  %1804 = vmatpush.msrb.mxu3 %v3314_v61 }
 0x70a   :  { %1837 = vmatpush.msra.mxu0 %v3314_v61  ;;  %1870 = vmatpush.msra.mxu2 %v3314_v61 }
 0x70b   :  { %1772 = vmatpush.msra.mxu1 %v3323_v62  ;;  %1805 = vmatpush.msrb.mxu3 %v3323_v62 }
 0x70c   :  { %1838 = vmatpush.msra.mxu0 %v3323_v62  ;;  %1871 = vmatpush.msra.mxu2 %v3323_v62 }
 0x70d   :  { %2500 = vmatmul.msk.f32.gmra.mxu1 %vm266_vm3, %v3486_v53  ;;  %2502 = vmatmul.msk.f32.gmra.mxu3 %vm266_vm3, %v3480_v8 }
 0x70e   :  { %2504 = vmatmul.msk.f32.gmra.mxu0 %vm266_vm3, %v3488_v54  ;;  %2506 = vmatmul.msk.f32.gmra.mxu2 %vm266_vm3, %v3484_v52 }
 0x70f   :  { %1773 = vmatpush.msra.mxu1 %v3332_v63  ;;  %1806 = vmatpush.msrb.mxu3 %v3332_v63 }
 0x710   :  { %1839 = vmatpush.msra.mxu0 %v3332_v63  ;;  %1872 = vmatpush.msra.mxu2 %v3332_v63 }
 0x771   :  { %v1329_v60 = vpop.f32.mrf.mxu1 }
 0x772   :  { %v1397_v61 = vpop.f32.mrf.mxu0  ;;  %v1335_v3 = vmul.f32 %v1329_v60, %v3386_v47 }
 0x773   :  { %v1403_v8 = vmul.f32 %v1397_v61, %v3508_v15 }
 0x777   :  { %v1362_v62 = vpop.f32.mrf.mxu3 }
 0x778   :  { %v1368_v11 = vmul.f32 %v1362_v62, %v3506_v13  ;;  %v1432_v12 = vpop.f32.mrf.mxu2 }
 0x779   :  { %v1438_v54 = vmul.f32 %v1432_v12, %v3512_v25 }
 0x77a   :  { %v1370_v51 = vadd.f32 %v1368_v11, %v1335_v3  ;;  %v1332_v52 = vpop.f32.mrf.mxu1 }
 0x77b   :  { %v1400_v34 = vpop.f32.mrf.mxu0  ;;  %v1336_v63 = vmul.f32 %v1332_v52, %v3392_v49 }
 0x77c   :  { %v1405_v53 = vadd.f32 %v1403_v8, %v1370_v51  ;;  %v1404_v42 = vmul.f32 %v1400_v34, %v3522_v48 }
 0x77e   :  { %v1440_v35 = vadd.f32 %v1438_v54, %v1405_v53 }
 0x780   :  { %v1365_v36 = vpop.f32.mrf.mxu3  ;;  %2060 = vrot.lane.b32.xlu0 %v1440_v35, %s3979_s18 }
 0x781   :  { %v1369_v40 = vmul.f32 %v1365_v36, %v3518_v16  ;;  %v1435_v41 = vpop.f32.mrf.mxu2 }
 0x782   :  { %v1439_v6 = vmul.f32 %v1435_v41, %v3525_v22  ;;  %v1467_v7 = vpop.f32.mrf.mxu1 }
 0x783   :  { %v1371_v43 = vadd.f32 %v1369_v40, %v1336_v63  ;;  %v1533_v17 = vpop.f32.mrf.mxu0  ;;  %v1473_v23 = vmul.f32 0.35355338, %v1467_v7 }
 0x784   :  { %v1539_v32 = vmul.f32 0.35355338, %v1533_v17 }
 0x785   :  { %v1406_v10 = vadd.f32 %v1404_v42, %v1371_v43 }
 0x787   :  { %v1441_v14 = vadd.f32 %v1439_v6, %v1406_v10 }
 0x788   :  { %v1500_v21 = vpop.f32.mrf.mxu3 }
 0x789   :  { %v1506_v27 = vmul.f32 0.35355338, %v1500_v21  ;;  %v1566_v29 = vpop.f32.mrf.mxu2  ;;  %2062 = vrot.lane.b32.xlu0 %v1441_v14, %s3979_s18 }
 0x78a   :  { %v1572_v38 = vmul.f32 0.35355338, %v1566_v29  ;;  %v1470_v37 = vpop.f32.mrf.mxu1 }
 0x78b   :  { %v1574_v19 = vmax.f32 %v1473_v23, %v1506_v27  ;;  %v1536_v24 = vpop.f32.mrf.mxu0  ;;  %v1474_v26 = vmul.f32 0.35355338, %v1470_v37 }
 0x78c   :  { %v1540_v11 = vmul.f32 0.35355338, %v1536_v24 }
 0x78d   :  { %v1576_v39 = vmax.f32 %v1574_v19, %v1539_v32 }
 0x78f   :  { %v1578_v45 = vmax.f32 %v1576_v39, %v1572_v38 }
 0x790   :  { %v1503_v46 = vpop.f32.mrf.mxu3 }
 0x791   :  { %v1580_v18 = vsub.f32 %v1473_v23, %v1578_v45  ;;  %v1586_v20 = vsub.f32 %v1506_v27, %v1578_v45  ;;  %v1592_v50 = vsub.f32 %v1539_v32, %v1578_v45  ;;  %v1598_v31 = vsub.f32 %v1572_v38, %v1578_v45  ;;  %v1569_v62 = vpop.f32.mrf.mxu2 }
 0x792   :  { %v1507_v30 = vmul.f32 0.35355338, %v1503_v46  ;;  %v1573_v51 = vmul.f32 0.35355338, %v1569_v62 }
 0x793   :  { %v1582_v60 = vmul.f32 1.442695, %v1580_v18  ;;  %v1588_v61 = vmul.f32 1.442695, %v1586_v20  ;;  %v1594_v3 = vmul.f32 1.442695, %v1592_v50 }
 0x794   :  { %v1575_v12 = vmax.f32 %v1474_v26, %v1507_v30  ;;  %v1600_v8 = vmul.f32 1.442695, %v1598_v31 }
 0x795   :  { %2609 = vpow2.f32 %v1582_v60 }
 0x796   :  { %2611 = vpow2.f32 %v1588_v61  ;;  %v1577_v52 = vmax.f32 %v1575_v12, %v1540_v11 }
 0x797   :  { %2613 = vpow2.f32 %v1594_v3 }
 0x798   :  { %v1579_v53 = vmax.f32 %v1577_v52, %v1573_v51  ;;  %2615 = vpow2.f32 %v1600_v8 }
 0x79a   :  { %v1581_v54 = vsub.f32 %v1474_v26, %v1579_v53  ;;  %v1587_v34 = vsub.f32 %v1507_v30, %v1579_v53  ;;  %v1593_v35 = vsub.f32 %v1540_v11, %v1579_v53  ;;  %v1599_v36 = vsub.f32 %v1573_v51, %v1579_v53 }
 0x79b   :  { %v2610_v63 = vpop.eup %2609 }
 0x79c   :  { %v2612_v40 = vpop.eup %2611  ;;  %v1584_v41 = vmul.f32 1.442695, %v1581_v54  ;;  %v1590_v42 = vmul.f32 1.442695, %v1587_v34  ;;  %v1596_v10 = vmul.f32 1.442695, %v1593_v35 }
 0x79d   :  { %v1604_v43 = vadd.f32 %v2612_v40, %v2610_v63  ;;  %v2614_v6 = vpop.eup %2613  ;;  %v1602_v7 = vmul.f32 1.442695, %v1599_v36 }
 0x79e   :  { %2617 = vpow2.f32 %v1584_v41  ;;  %v2616_v14 = vpop.eup %2615 }
 0x79f   :  { %v1606_v17 = vadd.f32 %v2614_v6, %v1604_v43  ;;  %2619 = vpow2.f32 %v1590_v42 }
 0x7a0   :  { %2621 = vpow2.f32 %v1596_v10 }
 0x7a1   :  { %v1608_v21 = vadd.f32 %v2616_v14, %v1606_v17  ;;  %2623 = vpow2.f32 %v1602_v7 }
 0x7a3   :  { %2625 = vrcp.f32 %v1608_v21 }
 0x7a4   :  { %v2618_v23 = vpop.eup %2617 }
 0x7a5   :  { %v2620_v27 = vpop.eup %2619 }
 0x7a6   :  { %v1605_v29 = vadd.f32 %v2620_v27, %v2618_v23  ;;  %v2622_v32 = vpop.eup %2621 }
 0x7a7   :  { %v2624_v19 = vpop.eup %2623 }
 0x7a8   :  { %v1607_v38 = vadd.f32 %v2622_v32, %v1605_v29 }
 0x7a9   :  { %v2626_v39 = vpop.eup %2625 }
 0x7aa   :  { %v1715_v45 = vmul.f32 %v2626_v39, %v2616_v14  ;;  %v1609_v37 = vadd.f32 %v2624_v19, %v1607_v38  ;;  %v1612_v46 = vmul.f32 %v2626_v39, %v2610_v63  ;;  %v1645_v18 = vmul.f32 %v2626_v39, %v2612_v40 }
 0x7ab   :  { %v1680_v20 = vmul.f32 %v2626_v39, %v2614_v6 }
 0x7ac   :  { %2627 = vrcp.f32 %v1609_v37  ;;  %2508 = vmatmul.msk.f32.vlgmr.msrb.gmra.mxu1 %vm114_vm1, %v1612_v46  ;;  %2511 = vmatmul.msk.f32.vlgmr.msra.gmra.mxu3 %vm114_vm1, %v1645_v18 }
 0x7ad   :  { %2514 = vmatmul.msk.f32.vlgmr.msrb.gmra.mxu0 %vm114_vm1, %v1680_v20  ;;  %2517 = vmatmul.msk.f32.vlgmr.msrb.gmra.mxu2 %vm114_vm1, %v1715_v45 }
 0x7ae   :  { %2527 = vmatpush.msk.msrb.mxu1 %vm139_vm0, %v3408_v33  ;;  %2530 = vmatpush.msk.msra.mxu3 %vm139_vm0, %v3408_v33 }
 0x7af   :  { %2533 = vmatpush.msk.msrb.mxu0 %vm139_vm0, %v3408_v33  ;;  %2536 = vmatpush.msk.msrb.mxu2 %vm139_vm0, %v3408_v33 }
 0x7b2   :  { %v2628_v50 = vpop.eup %2627 }
 0x7b3   :  { %v1613_v31 = vmul.f32 %v2628_v50, %v2618_v23  ;;  %v1646_v24 = vmul.f32 %v2628_v50, %v2620_v27  ;;  %v1681_v26 = vmul.f32 %v2628_v50, %v2622_v32  ;;  %v1716_v30 = vmul.f32 %v2628_v50, %v2624_v19 }
 0x7b5   :  { %2509 = vmatmul.msk.f32.gmra.mxu1 %vm114_vm1, %v1613_v31  ;;  %2512 = vmatmul.msk.f32.gmra.mxu3 %vm114_vm1, %v1646_v24 }
 0x7b6   :  { %2515 = vmatmul.msk.f32.gmra.mxu0 %vm114_vm1, %v1681_v26  ;;  %2518 = vmatmul.msk.f32.gmra.mxu2 %vm114_vm1, %v1716_v30 }
 0x7bd   :  { %2519 = vmatmul.msk.f32.vlgmr.msra.gmra.mxu1 %vm266_vm3, %v3494_v58  ;;  %2521 = vmatmul.msk.f32.vlgmr.msrb.gmra.mxu3 %vm266_vm3, %v3490_v56 }
 0x7be   :  { %2523 = vmatmul.msk.f32.vlgmr.msra.gmra.mxu0 %vm266_vm3, %v3498_v2  ;;  %2525 = vmatmul.msk.f32.vlgmr.msra.gmra.mxu2 %vm266_vm3, %v3492_v57 }
 0x7c5   :  { %2520 = vmatmul.msk.f32.gmra.mxu1 %vm266_vm3, %v3502_v4  ;;  %2522 = vmatmul.msk.f32.gmra.mxu3 %vm266_vm3, %v3496_v1 }
 0x7c6   :  { %2524 = vmatmul.msk.f32.gmra.mxu0 %vm266_vm3, %v3504_v5  ;;  %2526 = vmatmul.msk.f32.gmra.mxu2 %vm266_vm3, %v3500_v9 }
 0x829   :  { %v1637_v33 = vpop.f32.mrf.mxu1 }
 0x82a   :  { %v1705_v56 = vpop.f32.mrf.mxu0  ;;  %v1643_v2 = vmul.f32 %v1637_v33, %v3386_v47 }
 0x82b   :  { %v1711_v61 = vmul.f32 %v1705_v56, %v3508_v15 }
 0x82f   :  { %v1670_v58 = vpop.f32.mrf.mxu3 }
 0x830   :  { %v1676_v60 = vmul.f32 %v1670_v58, %v3506_v13  ;;  %v1740_v57 = vpop.f32.mrf.mxu2 }
 0x831   :  { %v1746_v1 = vmul.f32 %v1740_v57, %v3512_v25 }
 0x832   :  { %v1678_v4 = vadd.f32 %v1676_v60, %v1643_v2  ;;  %v1640_v62 = vpop.f32.mrf.mxu1 }
 0x833   :  { %v1708_v11 = vpop.f32.mrf.mxu0  ;;  %v1644_v9 = vmul.f32 %v1640_v62, %v3392_v49 }
 0x834   :  { %v1713_v3 = vadd.f32 %v1711_v61, %v1678_v4  ;;  %v1712_v52 = vmul.f32 %v1708_v11, %v3522_v48 }
 0x836   :  { %v1748_v5 = vadd.f32 %v1746_v1, %v1713_v3 }
 0x838   :  { %v1673_v12 = vpop.f32.mrf.mxu3  ;;  %2068 = vrot.lane.b32.xlu1 %v1748_v5, %s3980_s5 }
 0x839   :  { %v1677_v8 = vmul.f32 %v1673_v12, %v3518_v16  ;;  %v1743_v51 = vpop.f32.mrf.mxu2 }
 0x83a   :  { %v1747_v34 = vmul.f32 %v1743_v51, %v3525_v22  ;;  %v1775_v35 = vpop.f32.mrf.mxu1 }
 0x83b   :  { %v1679_v53 = vadd.f32 %v1677_v8, %v1644_v9  ;;  %v1841_v63 = vpop.f32.mrf.mxu0  ;;  %v1781_v41 = vmul.f32 0.35355338, %v1775_v35 }
 0x83c   :  { %v1847_v10 = vmul.f32 0.35355338, %v1841_v63 }
 0x83d   :  { %v1714_v54 = vadd.f32 %v1712_v52, %v1679_v53 }
 0x83f   :  { %v1749_v36 = vadd.f32 %v1747_v34, %v1714_v54 }
 0x840   :  { %v1808_v40 = vpop.f32.mrf.mxu3 }
 0x841   :  { %v1814_v42 = vmul.f32 0.35355338, %v1808_v40  ;;  %v1874_v43 = vpop.f32.mrf.mxu2  ;;  %2070 = vrot.lane.b32.xlu1 %v1749_v36, %s3980_s5 }
 0x842   :  { %v1880_v7 = vmul.f32 0.35355338, %v1874_v43  ;;  %v1778_v21 = vpop.f32.mrf.mxu1 }
 0x843   :  { %v1882_v6 = vmax.f32 %v1781_v41, %v1814_v42  ;;  %v1844_v38 = vpop.f32.mrf.mxu0  ;;  %v1782_v39 = vmul.f32 0.35355338, %v1778_v21  ;;  %v2103_v21 = vld [vmem:[%s3923_s13 + $0x78] sm:$0xff] }
 0x844   :  { %v1848_v50 = vmul.f32 0.35355338, %v1844_v38  ;;  %2108 = vmatpush.msra.mxu1 %v2103_v21  ;;  %v2097_v38 = vld [vmem:[%s3923_s13 + $0x48] sm:$0xff] }
 0x845   :  { %v1884_v14 = vmax.f32 %v1882_v6, %v1847_v10 }
 0x847   :  { %v1886_v17 = vmax.f32 %v1884_v14, %v1880_v7 }
 0x848   :  { %v1811_v23 = vpop.f32.mrf.mxu3 }
 0x849   :  { %v1888_v27 = vsub.f32 %v1781_v41, %v1886_v17  ;;  %v1894_v29 = vsub.f32 %v1814_v42, %v1886_v17  ;;  %v1900_v32 = vsub.f32 %v1847_v10, %v1886_v17  ;;  %v1906_v19 = vsub.f32 %v1880_v7, %v1886_v17  ;;  %v1877_v18 = vpop.f32.mrf.mxu2 }
 0x84a   :  { %v1815_v45 = vmul.f32 0.35355338, %v1811_v23  ;;  %v1881_v26 = vmul.f32 0.35355338, %v1877_v18  ;;  %v2102_v23 = vld [vmem:[%s3923_s13 + $0x70] sm:$0xff]  ;;  %v2095_v18 = vld [vmem:[%s3923_s13 + $0x38] sm:$0xff] }
 0x84b   :  { %v1890_v37 = vmul.f32 1.442695, %v1888_v27  ;;  %v1896_v46 = vmul.f32 1.442695, %v1894_v29  ;;  %v1902_v20 = vmul.f32 1.442695, %v1900_v32  ;;  %2109 = vmatpush.msra.mxu1 %v2102_v23 }
 0x84c   :  { %v1883_v31 = vmax.f32 %v1782_v39, %v1815_v45  ;;  %v1908_v24 = vmul.f32 1.442695, %v1906_v19  ;;  %v2101_v27 = vld [vmem:[%s3923_s13 + $0x68] sm:$0xff]  ;;  %v2100_v29 = vld [vmem:[%s3923_s13 + $0x60] sm:$0xff]  ;;  %v2099_v32 = vld [vmem:[%s3923_s13 + $0x58] sm:$0xff] }
 0x84d   :  { %2629 = vpow2.f32 %v1890_v37  ;;  %2110 = vmatpush.msra.mxu1 %v2101_v27  ;;  %v2098_v19 = vld [vmem:[%s3923_s13 + $0x50] sm:$0xff]  ;;  %v2148_v27 = vld [vmem:[%s3931_s21 + $0x18] sm:$0xff] }
 0x84e   :  { %2631 = vpow2.f32 %v1896_v46  ;;  %v1885_v30 = vmax.f32 %v1883_v31, %v1848_v50 }
 0x84f   :  { %2633 = vpow2.f32 %v1902_v20  ;;  %2111 = vmatpush.msra.mxu1 %v2100_v29  ;;  %v2147_v29 = vld [vmem:[%s3931_s21 + $0x10] sm:$0xff] }
 0x850   :  { %v1887_v33 = vmax.f32 %v1885_v30, %v1881_v26  ;;  %2635 = vpow2.f32 %v1908_v24  ;;  %v2094_v24 = vld [vmem:[%s3923_s13 + $0x30] sm:$0xff] }
 0x851   :  { %2112 = vmatpush.msra.mxu1 %v2099_v32  ;;  %v2145_v32 = vld [vmem:[%s3931_s21] sm:$0xff] }
 0x852   :  { %v1889_v56 = vsub.f32 %v1782_v39, %v1887_v33  ;;  %v1895_v58 = vsub.f32 %v1815_v45, %v1887_v33  ;;  %v1901_v2 = vsub.f32 %v1848_v50, %v1887_v33  ;;  %v1907_v60 = vsub.f32 %v1881_v26, %v1887_v33  ;;  %v2096_v45 = vld [vmem:[%s3923_s13 + $0x40] sm:$0xff]  ;;  %v2093_v33 = vld [vmem:[%s3923_s13 + $0x28] sm:$0xff] }
 0x853   :  { %v2630_v57 = vpop.eup %2629  ;;  %2113 = vmatpush.msra.mxu1 %v2098_v19  ;;  %v2213_v19 = vld [vmem:[%s3935_s25 + $0x78] sm:$0xff] }
 0x854   :  { %v2632_v61 = vpop.eup %2631  ;;  %v1892_v4 = vmul.f32 1.442695, %v1889_v56  ;;  %v1898_v62 = vmul.f32 1.442695, %v1895_v58  ;;  %v1904_v1 = vmul.f32 1.442695, %v1901_v2  ;;  %2214 = vmatpush.msra.mxu0 %v2213_v19 }
 0x855   :  { %v1912_v3 = vadd.f32 %v2632_v61, %v2630_v57  ;;  %v2634_v11 = vpop.eup %2633  ;;  %v1910_v5 = vmul.f32 1.442695, %v1907_v60  ;;  %2114 = vmatpush.msra.mxu1 %v2097_v38  ;;  %v2212_v38 = vld [vmem:[%s3935_s25 + $0x70] sm:$0xff] }
 0x856   :  { %2637 = vpow2.f32 %v1892_v4  ;;  %v2636_v12 = vpop.eup %2635  ;;  %v2090_v4 = vld [vmem:[%s3923_s13 + $0x10] sm:$0xff]  ;;  %2215 = vmatpush.msra.mxu0 %v2212_v38  ;;  %v2303_v38 = vld [vmem:[%s3936_s26 + $0x68] sm:$0xff] }
 0x857   :  { %v1914_v9 = vadd.f32 %v2634_v11, %v1912_v3  ;;  %2639 = vpow2.f32 %v1898_v62  ;;  %2115 = vmatpush.msra.mxu1 %v2096_v45  ;;  %v2210_v45 = vld [vmem:[%s3935_s25 + $0x60] sm:$0xff]  ;;  %v2304_v19 = vld [vmem:[%s3936_s26 + $0x70] sm:$0xff] }
 0x858   :  { %2641 = vpow2.f32 %v1904_v1 }
 0x859   :  { %v1916_v8 = vadd.f32 %v2636_v12, %v1914_v9  ;;  %2643 = vpow2.f32 %v1910_v5  ;;  %2116 = vmatpush.msra.mxu1 %v2095_v18  ;;  %v2159_v9 = vld [vmem:[%s3931_s21 + $0x70] sm:$0xff] }
 0x85a   :  { %v2208_v18 = vld [vmem:[%s3935_s25 + $0x50] sm:$0xff] }
 0x85b   :  { %2645 = vrcp.f32 %v1916_v8  ;;  %2117 = vmatpush.msra.mxu1 %v2094_v24  ;;  %v2157_v8 = vld [vmem:[%s3931_s21 + $0x60] sm:$0xff] }
 0x85c   :  { %v2638_v51 = vpop.eup %2637  ;;  %v2565_v24 = vld [vmem:[%s3927_s17] ss:$0 sm:$0xff] }
 0x85d   :  { %v2640_v52 = vpop.eup %2639  ;;  %2118 = vmatpush.msra.mxu1 %v2093_v33 }
 0x85e   :  { %v1913_v53 = vadd.f32 %v2640_v52, %v2638_v51  ;;  %v2642_v54 = vpop.eup %2641 }
 0x85f   :  { %v2644_v34 = vpop.eup %2643 }
 0x860   :  { %v1915_v35 = vadd.f32 %v2642_v54, %v1913_v53  ;;  %v2154_v53 = vld [vmem:[%s3931_s21 + $0x48] sm:$0xff] }
 0x861   :  { %v2646_v36 = vpop.eup %2645 }
 0x862   :  { %v2023_v63 = vmul.f32 %v2646_v36, %v2636_v12  ;;  %v1917_v40 = vadd.f32 %v2644_v34, %v1915_v35  ;;  %v1920_v41 = vmul.f32 %v2646_v36, %v2630_v57  ;;  %v1953_v42 = vmul.f32 %v2646_v36, %v2632_v61  ;;  %v2061_v35 = vpop.permute.xlu0 %2060 }
 0x863   :  { %v1988_v43 = vmul.f32 %v2646_v36, %v2634_v11  ;;  %v2089_v11 = vld [vmem:[%s3923_s13 + $0x8] sm:$0xff]  ;;  %v2151_v36 = vld [vmem:[%s3931_s21 + $0x30] sm:$0xff] }
 0x864   :  { %2647 = vrcp.f32 %v1917_v40  ;;  %2528 = vmatmul.msk.f32.vlgmr.msrb.gmra.mxu1 %vm114_vm1, %v1920_v41  ;;  %2531 = vmatmul.msk.f32.vlgmr.msra.gmra.mxu3 %vm114_vm1, %v1953_v42  ;;  %v2150_v40 = vld [vmem:[%s3931_s21 + $0x28] sm:$0xff]  ;;  %v2082_v41 = vsel %vm266_vm3, %v3516_v44, %v2061_v35  ;;  %v2149_v42 = vld [vmem:[%s3931_s21 + $0x20] sm:$0xff] }
 0x865   :  { %2534 = vmatmul.msk.f32.vlgmr.msrb.gmra.mxu0 %vm114_vm1, %v1988_v43  ;;  %2537 = vmatmul.msk.f32.vlgmr.msrb.gmra.mxu2 %vm114_vm1, %v2023_v63 }
 0x86a   :  { %v2648_v10 = vpop.eup %2647 }
 0x86b   :  { %v1921_v6 = vmul.f32 %v2648_v10, %v2638_v51  ;;  %v1954_v7 = vmul.f32 %v2648_v10, %v2640_v52  ;;  %v1989_v14 = vmul.f32 %v2648_v10, %v2642_v54  ;;  %v2024_v17 = vmul.f32 %v2648_v10, %v2644_v34  ;;  %v2156_v51 = vld [vmem:[%s3931_s21 + $0x58] sm:$0xff]  ;;  %v2155_v52 = vld [vmem:[%s3931_s21 + $0x50] sm:$0xff]  ;;  %v2153_v54 = vld [vmem:[%s3931_s21 + $0x40] sm:$0xff] }
 0x86c   :  { %v2152_v34 = vld [vmem:[%s3931_s21 + $0x38] sm:$0xff] }
 0x86d   :  { %2529 = vmatmul.msk.f32.gmra.mxu1 %vm114_vm1, %v1921_v6  ;;  %2532 = vmatmul.msk.f32.gmra.mxu3 %vm114_vm1, %v1954_v7  ;;  %v2063_v7 = vpop.permute.xlu0 %2062 }
 0x86e   :  { %2535 = vmatmul.msk.f32.gmra.mxu0 %vm114_vm1, %v1989_v14  ;;  %2538 = vmatmul.msk.f32.gmra.mxu2 %vm114_vm1, %v2024_v17  ;;  %v2083_v17 = vsel %vm266_vm3, %v3528_v28, %v2063_v7  ;;  %v2146_v28 = vld [vmem:[%s3931_s21 + $0x8] sm:$0xff] }
 0x8aa   :  { %v2069_v63 = vpop.permute.xlu1 %2068 }
 0x8ab   :  { %v2084_v43 = vsel %vm192_vm2, %v2082_v41, %v2069_v63 }
 0x8b3   :  { %v2071_v14 = vpop.permute.xlu1 %2070 }
 0x8b4   :  { %v2085_v21 = vsel %vm192_vm2, %v2083_v17, %v2071_v14 }
 0x8e1   :  { %v1945_v39 = vpop.f32.mrf.mxu1 }
 0x8e2   :  { %v2013_v37 = vpop.f32.mrf.mxu0  ;;  %v1951_v20 = vmul.f32 %v1945_v39, %v3386_v47  ;;  %v2092_v47 = vld [vmem:[%s3923_s13 + $0x20] sm:$0xff]  ;;  %v2211_v39 = vld [vmem:[%s3935_s25 + $0x68] sm:$0xff] }
 0x8e3   :  { %v2019_v26 = vmul.f32 %v2013_v37, %v3508_v15  ;;  %v2091_v15 = vld [vmem:[%s3923_s13 + $0x18] sm:$0xff]  ;;  %2119 = vmatpush.msra.mxu1 %v2092_v47  ;;  %2216 = vmatpush.msra.mxu0 %v2211_v39  ;;  %v2302_v39 = vld [vmem:[%s3936_s26 + $0x60] sm:$0xff] }
 0x8e4   :  { %v2209_v37 = vld [vmem:[%s3935_s25 + $0x58] sm:$0xff] }
 0x8e5   :  { %2120 = vmatpush.msra.mxu1 %v2091_v15  ;;  %2217 = vmatpush.msra.mxu0 %v2210_v45  ;;  %v2301_v45 = vld [vmem:[%s3936_s26 + $0x58] sm:$0xff] }
 0x8e7   :  { %v1978_v46 = vpop.f32.mrf.mxu3  ;;  %2121 = vmatpush.msra.mxu1 %v2090_v4  ;;  %2218 = vmatpush.msra.mxu0 %v2209_v37  ;;  %v2300_v37 = vld [vmem:[%s3936_s26 + $0x50] sm:$0xff] }
 0x8e8   :  { %v1984_v50 = vmul.f32 %v1978_v46, %v3506_v13  ;;  %v2048_v31 = vpop.f32.mrf.mxu2  ;;  %v2131_v46 = vld [vmem:[%s3930_s20] sm:$0x1] }
 0x8e9   :  { %v2054_v58 = vmul.f32 %v2048_v31, %v3512_v25  ;;  %2122 = vmatpush.msra.mxu1 %v2089_v11  ;;  %2219 = vmatpush.msra.mxu0 %v2208_v18  ;;  %v2206_v31 = vld [vmem:[%s3935_s25 + $0x40] sm:$0xff] }
 0x8ea   :  { %v1986_v30 = vadd.f32 %v1984_v50, %v1951_v20  ;;  %v1948_v2 = vpop.f32.mrf.mxu1  ;;  %v2207_v20 = vld [vmem:[%s3935_s25 + $0x48] sm:$0xff]  ;;  %v2137_v50 = vsub.f32 1.0, %v2131_v46  ;;  %v2198_v11 = vld [vmem:[%s3935_s25] sm:$0xff] }
 0x8eb   :  { %v2016_v60 = vpop.f32.mrf.mxu0  ;;  %v1952_v61 = vmul.f32 %v1948_v2, %v3392_v49  ;;  %2220 = vmatpush.msra.mxu0 %v2207_v20  ;;  %v2299_v46 = vld [vmem:[%s3936_s26 + $0x48] sm:$0xff]  ;;  %v2298_v18 = vld [vmem:[%s3936_s26 + $0x40] sm:$0xff] }
 0x8ec   :  { %v2021_v56 = vadd.f32 %v2019_v26, %v1986_v30  ;;  %v2020_v3 = vmul.f32 %v2016_v60, %v3522_v48  ;;  %v2160_v48 = vld [vmem:[%s3931_s21 + $0x78] sm:$0xff]  ;;  %v2566_v30 = vld [vmem:[%s3930_s20] ss:$0 sm:$0xff]  ;;  %v2139_v33 = vperm.slane %v2137_v50, 0 }
 0x8ed   :  { %2165 = vmatpush.msrb.mxu3 %v2160_v48  ;;  %v2205_v26 = vld [vmem:[%s3935_s25 + $0x38] sm:$0xff]  ;;  %2221 = vmatpush.msra.mxu0 %v2206_v31  ;;  %v2568_v48 = vld [vmem:[%s3933_s23] ss:$0 sm:$0xff]  ;;  %v2296_v31 = vld [vmem:[%s3936_s26 + $0x30] sm:$0xff] }
 0x8ee   :  { %v2056_v13 = vadd.f32 %v2054_v58, %v2021_v56  ;;  %v2204_v58 = vld [vmem:[%s3935_s25 + $0x30] sm:$0xff]  ;;  %v2141_v15 = vmul.f32 %v2139_v33, %v3290_v55  ;;  %v2142_v4 = vmul.f32 %v2139_v33, %v3298_v59  ;;  %v2201_v55 = vld [vmem:[%s3935_s25 + $0x18] sm:$0xff]  ;;  %v2199_v59 = vld [vmem:[%s3935_s25 + $0x8] sm:$0xff] }
 0x8ef   :  { %2166 = vmatpush.msrb.mxu3 %v2159_v9  ;;  %2222 = vmatpush.msra.mxu0 %v2205_v26  ;;  %v2297_v50 = vld [vmem:[%s3936_s26 + $0x38] sm:$0xff]  ;;  %v2294_v26 = vld [vmem:[%s3936_s26 + $0x20] sm:$0xff] }
 0x8f0   :  { %v1981_v57 = vpop.f32.mrf.mxu3  ;;  %2076 = vrot.lane.b32.xlu2 %v2056_v13, %s2679_s9  ;;  %v2203_v13 = vld [vmem:[%s3935_s25 + $0x28] sm:$0xff] }
 0x8f1   :  { %v1985_v25 = vmul.f32 %v1981_v57, %v3518_v16  ;;  %v2051_v62 = vpop.f32.mrf.mxu2  ;;  %v2088_v16 = vld [vmem:[%s3923_s13] sm:$0xff]  ;;  %2223 = vmatpush.msra.mxu0 %v2204_v58  ;;  %v2292_v58 = vld [vmem:[%s3936_s26 + $0x10] sm:$0xff] }
 0x8f2   :  { %v2055_v12 = vmul.f32 %v2051_v62, %v3525_v22  ;;  %2123 = vmatpush.msra.mxu1 %v2088_v16  ;;  %v2158_v22 = vld [vmem:[%s3931_s21 + $0x68] sm:$0xff] }
 0x8f3   :  { %v1987_v1 = vadd.f32 %v1985_v25, %v1952_v61  ;;  %2167 = vmatpush.msrb.mxu3 %v2158_v22  ;;  %2224 = vmatpush.msra.mxu0 %v2203_v13  ;;  %v2290_v13 = vld [vmem:[%s3936_s26] sm:$0xff] }
 0x8f5   :  { %v2022_v5 = vadd.f32 %v2020_v3, %v1987_v1  ;;  %2168 = vmatpush.msrb.mxu3 %v2157_v8  ;;  %v2202_v3 = vld [vmem:[%s3935_s25 + $0x20] sm:$0xff]  ;;  %v2200_v1 = vld [vmem:[%s3935_s25 + $0x10] sm:$0xff] }
 0x8f6   :  { %2225 = vmatpush.msra.mxu0 %v2202_v3 }
 0x8f7   :  { %v2057_v49 = vadd.f32 %v2055_v12, %v2022_v5  ;;  %2169 = vmatpush.msrb.mxu3 %v2156_v51  ;;  %v2567_v5 = vld [vmem:[%s3932_s22] ss:$0 sm:$0xff] }
 0x8f8   :  { %2226 = vmatpush.msra.mxu0 %v2201_v55 }
 0x8f9   :  { %2078 = vrot.lane.b32.xlu2 %v2057_v49, %s2679_s9  ;;  %2170 = vmatpush.msrb.mxu3 %v2155_v52 }
 0x8fa   :  { %2227 = vmatpush.msra.mxu0 %v2200_v1 }
 0x8fb   :  { %2171 = vmatpush.msrb.mxu3 %v2154_v53 }
 0x8fc   :  { %2228 = vmatpush.msra.mxu0 %v2199_v59 }
 0x8fd   :  { %2172 = vmatpush.msrb.mxu3 %v2153_v54 }
 0x8fe   :  { %2229 = vmatpush.msra.mxu0 %v2198_v11 }
 0x8ff   :  { %2173 = vmatpush.msrb.mxu3 %v2152_v34 }
 0x901   :  { %2174 = vmatpush.msrb.mxu3 %v2151_v36 }
 0x903   :  { %2175 = vmatpush.msrb.mxu3 %v2150_v40 }
 0x905   :  { %2176 = vmatpush.msrb.mxu3 %v2149_v42 }
 0x907   :  { %2177 = vmatpush.msrb.mxu3 %v2148_v27 }
 0x909   :  { %2178 = vmatpush.msrb.mxu3 %v2147_v29 }
 0x90b   :  { %2179 = vmatpush.msrb.mxu3 %v2146_v28  ;;  %v2258_v28 = vld [vmem:[%s3934_s24] sm:$0xf] }
 0x90c   :  { %2539 = vmatpush.msk.msra.mxu2 %vm139_vm0, %v2258_v28 }
 0x90d   :  { %2180 = vmatpush.msrb.mxu3 %v2145_v32  ;;  %v2305_v32 = vld [vmem:[%s3936_s26 + $0x78] sm:$0xff] }
 0x90e   :  { %2306 = vmatpush.msrb.mxu2 %v2305_v32 }
 0x910   :  { %2307 = vmatpush.msrb.mxu2 %v2304_v19 }
 0x912   :  { %2308 = vmatpush.msrb.mxu2 %v2303_v38 }
 0x914   :  { %2309 = vmatpush.msrb.mxu2 %v2302_v39 }
 0x916   :  { %2310 = vmatpush.msrb.mxu2 %v2301_v45 }
 0x918   :  { %2311 = vmatpush.msrb.mxu2 %v2300_v37 }
 0x91a   :  { %2312 = vmatpush.msrb.mxu2 %v2299_v46 }
 0x91c   :  { %2313 = vmatpush.msrb.mxu2 %v2298_v18 }
 0x91e   :  { %2314 = vmatpush.msrb.mxu2 %v2297_v50 }
 0x920   :  { %2315 = vmatpush.msrb.mxu2 %v2296_v31 }
 0x94a   :  { %v2077_v10 = vpop.permute.xlu2 %2076 }
 0x94b   :  { %v2086_v6 = vsel %vm646_vm4, %v2084_v43, %v2077_v10 }
 0x94c   :  { %2124 = vmatmul.f32.vlgmr.msra.gmra.mxu1 %v2086_v6 }
 0x953   :  { %v2079_v44 = vpop.permute.xlu2 %2078 }
 0x954   :  { %v2087_v23 = vsel %vm646_vm4, %v2085_v21, %v2079_v44 }
 0x955   :  { %2127 = vmatmul.f32.gmra.mxu1 %v2087_v23 }
 0x9c9   :  { %v2125_v56 = vpop.f32.mrf.mxu1 }
 0x9ca   :  { %v2126_v47 = vadd.f32 %v2565_v24, %v2125_v56  ;;  %v2293_v56 = vld [vmem:[%s3936_s26 + $0x18] sm:$0xff] }
 0x9cc   :  { %v2135_v2 = vmul.f32 %v2566_v30, %v2126_v47  ;;  %v2291_v47 = vld [vmem:[%s3936_s26 + $0x8] sm:$0xff] }
 0x9ce   :  { %v3795_v60 = vadd.f32 %v2141_v15, %v2135_v2 }
 0x9d0   :  { %2181 = vmatmul.f32.vlgmr.msrb.gmra.mxu3 %v3795_v60 }
 0x9d2   :  { %v2128_v57 = vpop.f32.mrf.mxu1 }
 0x9d3   :  { %v2129_v61 = vadd.f32 %v2565_v24, %v2128_v57  ;;  %v2295_v24 = vld [vmem:[%s3936_s26 + $0x28] sm:$0xff]  ;;  %s2682_s26 = smov [#allocation2]  }
 0x9d4   :  { %2316 = vmatpush.msrb.mxu2 %v2295_v24  ;;  %s2379_s29 = sshll.u32 %s2682_s26, 4  ;;  %s2380_s29 = int_to_ptr.vmem [resolvable:$true] %s2379_s29 }
 0x9d5   :  { %v2136_v25 = vmul.f32 %v2566_v30, %v2129_v61 }
 0x9d6   :  { %2317 = vmatpush.msrb.mxu2 %v2294_v26 }
 0x9d7   :  { %v3799_v62 = vadd.f32 %v2142_v4, %v2136_v25  ;;  %v2560_v25 = vld [vmem:[%s3972_s12 + $0x1] ss:$0 sm:$0xff]  ;;  %s2683_s12 = smov 128  }
 0x9d8   :  { %2318 = vmatpush.msrb.mxu2 %v2293_v56  ;;  %v616_v4 = vadd.f32 %v2560_v25, %v3340_v0 }
 0x9d9   :  { %2184 = vmatmul.f32.gmra.mxu3 %v3799_v62 }
 0x9da   :  { %2319 = vmatpush.msrb.mxu2 %v2292_v58  ;;  %v2334_v3 = vperm.slane %v616_v4, 3  ;;  %v2331_v55 = vperm.slane %v616_v4, 2 }
 0x9dc   :  { %2320 = vmatpush.msrb.mxu2 %v2291_v47 }
 0x9de   :  { %2321 = vmatpush.msrb.mxu2 %v2290_v13 }
 0xa53   :  { %v2182_v12 = vpop.f32.mrf.mxu3 }
 0xa54   :  { %v2183_v49 = vadd.f32 %v2567_v5, %v2182_v12  ;;  %v2340_v12 = vperm.slane %v616_v4, 1 }
 0xa56   :  { %v2188_v16 = vmul.f32 0.01, %v2183_v49 }
 0xa58   :  { %v2190_v9 = vmax.f32 %v2183_v49, %v2188_v16 }
 0xa5a   :  { %v2196_v22 = vmul.f32 %v2568_v48, %v2190_v9 }
 0xa5c   :  { %v2185_v8 = vpop.f32.mrf.mxu3  ;;  %2230 = vmatmul.f32.vlgmr.msra.gmra.mxu0 %v2196_v22 }
 0xa5d   :  { %v2186_v51 = vadd.f32 %v2567_v5, %v2185_v8 }
 0xa5f   :  { %v2189_v52 = vmul.f32 0.01, %v2186_v51 }
 0xa61   :  { %v2191_v53 = vmax.f32 %v2186_v51, %v2189_v52 }
 0xa63   :  { %v2197_v54 = vmul.f32 %v2568_v48, %v2191_v53 }
 0xa65   :  { %2233 = vmatmul.f32.gmra.mxu0 %v2197_v54 }
 0xad9   :  { %v2231_v34 = vpop.f32.mrf.mxu0 }
 0xada   :  { %v2237_v36 = vsel %vm114_vm1, %v2231_v34, 0.0 }
 0xae2   :  { %v2234_v35 = vpop.f32.mrf.mxu0 }
 0xae3   :  { %v2238_v63 = vsel %vm114_vm1, %v2234_v35, 0.0 }
 0xae4   :  { %v2239_v40 = vadd.f32 %v2238_v63, %v2237_v36 }
 0xae6   :  { %v2240_v41 = vrot.slane %v2239_v40, 4 }
 0xae8   :  { %v2241_v42 = vadd.f32 %v2240_v41, %v2239_v40 }
 0xaea   :  { %v2242_v43 = vrot.slane %v2241_v42, 2 }
 0xaec   :  { %v2243_v10 = vadd.f32 %v2242_v43, %v2241_v42 }
 0xaee   :  { %v2244_v6 = vrot.slane %v2243_v10, 1 }
 0xaf0   :  { %v2245_v7 = vadd.f32 %v2244_v6, %v2243_v10 }
 0xaf2   :  { %v2246_v14 = vmul.f32 0.0625, %v2245_v7 }
 0xaf4   :  { %v2247_v17 = vsel %vm114_vm1, %v2246_v14, -inf }
 0xaf5   :  { %2248 = vmax.xlane.f32.xlu0 %v2247_v17 }
 0xb68   :  { %v2249_v21 = vpop.xlane.xlu0 %2248 }
 0xb69   :  { %v2250_v44 = vsub.f32 %v2246_v14, %v2249_v21 }
 0xb6b   :  { %v2251_v23 = vmul.f32 1.442695, %v2250_v44 }
 0xb6d   :  { %2649 = vpow2.f32 %v2251_v23 }
 0xb73   :  { %v2650_v27 = vpop.eup %2649 }
 0xb74   :  { %v2253_v29 = vsel %vm114_vm1, %v2650_v27, 0.0 }
 0xb75   :  { %2254 = vadd.xlane.f32.xlu1 %v2253_v29 }
 0xbe8   :  { %v2255_v20 = vpop.xlane.xlu1 %2254 }
 0xbe9   :  { %2651 = vrcp.f32 %v2255_v20 }
 0xbef   :  { %v2652_v30 = vpop.eup %2651 }
 0xbf0   :  { %v2257_v33 = vmul.f32 %v2652_v30, %v2650_v27 }
 0xbf2   :  { %2540 = vmatmul.msk.f32.vlgmr.msra.gmra.mxu2 %vm114_vm1, %v2257_v33 }
 0xbfa   :  { %2541 = vmatmul.msk.f32.gmra.mxu2 %vm114_vm1, %v2257_v33 }
 0xc75   :  { %v2282_v2 = vpop.f32.mrf.mxu2 }
 0xc76   :  { %v2288_v15 = vmul.f32 %v2282_v2, %v3795_v60  ;;  %v2337_v60 = vperm.slane %v616_v4, 0 }
 0xc78   :  { %2322 = vmatmul.f32.vlgmr.msrb.gmra.mxu2 %v2288_v15 }
 0xc7d   :  { %v2285_v57 = vpop.f32.mrf.mxu2 }
 0xc7e   :  { %v2289_v61 = vmul.f32 %v2285_v57, %v3799_v62 }
 0xc80   :  { %2325 = vmatmul.f32.gmra.mxu2 %v2289_v61 }
 0xcfb   :  { %v2323_v1 = vpop.f32.mrf.mxu2 }
 0xcfc   :  { %2329 = vst.msk [vmem:[#allocation2] sm:$0xff] %vm266_vm3, %v2323_v1  ;;  %v2335_v59 = vmul.f32 %v2334_v3, %v2323_v1  ;;  %v2332_v11 = vmul.f32 %v2331_v55, %v2323_v1  ;;  %v2338_v5 = vmul.f32 %v2337_v60, %v2323_v1  ;;  %v2341_v49 = vmul.f32 %v2340_v12, %v2323_v1 }
 0xcfe   :  { %2345 = vrot.lane.b32.xlu2 %v2335_v59, %s3979_s18 }
 0xd03   :  { %v2326_v62 = vpop.f32.mrf.mxu2 }
 0xd04   :  { %2330 = vst.msk [vmem:[#allocation2 + $0x8] sm:$0xff] %vm266_vm3, %v2326_v62  ;;  %v2333_v0 = vmul.f32 %v2331_v55, %v2326_v62  ;;  %v2336_v16 = vmul.f32 %v2334_v3, %v2326_v62  ;;  %v2339_v48 = vmul.f32 %v2337_v60, %v2326_v62  ;;  %v2342_v9 = vmul.f32 %v2340_v12, %v2326_v62 }
 0xd05   :  { %2387 = dma.vmem_to_hbm [thread:$0]  %s2380_s29, 256, %s2382_s4, [#allocation3], %s2683_s12, %s2683_s12, %s2684_s7  }
 0xd06   :  { %2353 = vrot.lane.b32.xlu2 %v2338_v5, %s3980_s5 }
 0xd0e   :  { %2361 = vrot.lane.b32.xlu2 %v2341_v49, %s2679_s9 }
 0xd16   :  { %2347 = vrot.lane.b32.xlu2 %v2336_v16, %s3979_s18 }
 0xd1e   :  { %2355 = vrot.lane.b32.xlu2 %v2339_v48, %s3980_s5 }
 0xd26   :  { %2363 = vrot.lane.b32.xlu2 %v2342_v9, %s2679_s9 }
 0xd58   :  { %v2346_v22 = vpop.permute.xlu2 %2345 }
 0xd59   :  { %v2367_v51 = vsel %vm266_vm3, %v2332_v11, %v2346_v22 }
 0xd60   :  { %v2354_v8 = vpop.permute.xlu2 %2353 }
 0xd61   :  { %v2369_v52 = vsel %vm192_vm2, %v2367_v51, %v2354_v8 }
 0xd68   :  { %v2362_v53 = vpop.permute.xlu2 %2361 }
 0xd69   :  { %v2371_v54 = vsel %vm646_vm4, %v2369_v52, %v2362_v53 }
 0xd6a   :  { %2373 = vst [vmem:[%s3938_s28] sm:$0xff] %v2371_v54 }
 0xd70   :  { %v2348_v34 = vpop.permute.xlu2 %2347 }
 0xd71   :  { %v2368_v36 = vsel %vm266_vm3, %v2333_v0, %v2348_v34 }
 0xd78   :  { %v2356_v35 = vpop.permute.xlu2 %2355 }
 0xd79   :  { %v2370_v63 = vsel %vm192_vm2, %v2368_v36, %v2356_v35 }
 0xd80   :  { %v2364_v40 = vpop.permute.xlu2 %2363 }
 0xd81   :  { %v2372_v41 = vsel %vm646_vm4, %v2370_v63, %v2364_v40 }
 0xd82   :  { %2374 = vst [vmem:[%s3938_s28 + $0x8] sm:$0xff] %v2372_v41 }
 0xd83   :  { %2677 = dma.done.wait [#allocation3], 256  }
 0xd84   :  { %2678 = vsyncadd [#allocation3], 4294967040 }
 0xd85   :  { %2396 = vsyncpa [#allocation3], 1 }

</bundles_post_ra>
